<compile_context>
chip_gen: v5e
topology: v5e:2x2
jax: 0.10.0
libtpu: 0.0.40
codegen_flags: <defaults>
</compile_context>

<pallas_src>
import functools

import numpy as np

import jax
import jax.numpy as jnp
from jax.experimental import pallas as pl
from jax.experimental.pallas import tpu as pltpu

_LANE = 128  # TPU vreg lane width


def generator_kernel(
    x_ref,                       # (B, K_pad)                f32
    w1_ref, b1_ref,              # block 1 (no BN)           w: bf16, b: f32
    w2_ref, g2_ref, be2_ref,     # blocks 2-4: pre-BN biases dropped (cancel under BN)
    w3_ref, g3_ref, be3_ref,
    w4_ref, g4_ref, be4_ref,
    w5_ref, b5_ref,              # final linear (padded N)   w: bf16, b: f32
    out_ref,                     # (B, N_pad)                f32
):
    def mm(h, w_ref):
        # Feed bf16 operands straight to the MXU; accumulate in f32.
        return jnp.dot(h.astype(jnp.bfloat16), w_ref[...],
                       preferred_element_type=jnp.float32)

    def bn_lrelu(x, gamma, beta, eps=0.8):
        # Training-mode BatchNorm1d, biased batch stats, single reduction pass.
        # var = E[x^2] - mean^2 (clamped >= 0); safe here because eps=0.8 dominates.
        inv_n = 1.0 / x.shape[0]
        s = jnp.sum(x, axis=0, keepdims=True)
        sq = jnp.sum(x * x, axis=0, keepdims=True)
        mean = s * inv_n
        var = jnp.maximum(sq * inv_n - mean * mean, 0.0)
        scale = jax.lax.rsqrt(var + eps) * gamma        # (1,N) row work, EUP rsqrt
        shift = beta - mean * scale
        y = x * scale + shift                            # 2 VPU ops on the (B,N) tensor
        return jnp.maximum(y, 0.2 * y)                   # LeakyReLU(0.2)

    x = x_ref[...]

    # block 1: Linear -> LeakyReLU   (normalize=False, bias kept)
    h = mm(x, w1_ref) + b1_ref[...]
    h = jnp.maximum(h, 0.2 * h)
    # blocks 2-4: Linear (bias cancels under BN) -> BN(eps=0.8) -> LeakyReLU
    h = bn_lrelu(mm(h, w2_ref), g2_ref[...], be2_ref[...])
    h = bn_lrelu(mm(h, w3_ref), g3_ref[...], be3_ref[...])
    h = bn_lrelu(mm(h, w4_ref), g4_ref[...], be4_ref[...])
    # final Linear -> Tanh (padded output cols: w5/b5 pads are 0 -> tanh(0)=0)
    out_ref[...] = jnp.tanh(mm(h, w5_ref) + b5_ref[...])


@functools.partial(jax.jit, static_argnames=("out_dim",))
def generator_forward(gen_in, params, *, out_dim):
    """gen_in: (B, K_pad) float32 (already lane-padded) -> (B, out_dim) float32."""
    B, k_pad = gen_in.shape
    assert k_pad == params["w1"].shape[0], "gen_in must be pre-padded to w1's K"
    n_pad = params["w5"].shape[1]             # padded output feature dim

    flat_args = (
        gen_in,
        params["w1"], params["b1"],
        params["w2"], params["g2"], params["be2"],
        params["w3"], params["g3"], params["be3"],
        params["w4"], params["g4"], params["be4"],
        params["w5"], params["b5"],
    )

    # Explicit VMEM residency: all operands + output + a few live (B,1024) f32
    # activation temporaries (plus their bf16 casts), with ~50% headroom.
    operand_bytes = sum(int(np.prod(a.shape)) * a.dtype.itemsize for a in flat_args)
    out_bytes = B * n_pad * 4
    act_bytes = 3 * B * 1024 * 4 + 2 * B * 1024 * 2
    vmem_limit = int((operand_bytes + out_bytes + act_bytes) * 1.5)
    vmem_limit = int(min(max(vmem_limit, 4 << 20), 64 << 20))

    vmem = pl.BlockSpec(memory_space=pltpu.MemorySpace.VMEM)
    y = pl.pallas_call(
        generator_kernel,
        out_shape=jax.ShapeDtypeStruct((B, n_pad), jnp.float32),
        in_specs=[vmem] * len(flat_args),
        out_specs=vmem,
        compiler_params=pltpu.CompilerParams(vmem_limit_bytes=vmem_limit),
    )(*flat_args)
    # Padded columns are exactly 0; slice to the module's output width.
    return y[:, :out_dim]


def init_params(key, latent_dim, n_classes, out_dim):
    """PyTorch-style init; weights stored bf16, padded to lane-dense shapes.

    The embedding table is zero-padded on the column axis so that
    concat(noise, emb(label)) is already (B, K_pad) -- no per-call jnp.pad.
    """
    in_f = latent_dim + n_classes
    dims = [in_f, 128, 256, 512, 1024, out_dim]
    k_pad = ((in_f + _LANE - 1) // _LANE) * _LANE        # 42 -> 128
    in_row_pad = k_pad - in_f
    out_col_pad = (-out_dim) % _LANE                     # 64 -> 128

    params = {}
    keys = jax.random.split(key, 12)
    ki = 0

    def linear(fan_in, fan_out, pad_rows=0, pad_cols=0):
        nonlocal ki
        bound = 1.0 / np.sqrt(float(fan_in))
        w = jax.random.uniform(keys[ki], (fan_in, fan_out), jnp.float32, -bound, bound)
        b = jax.random.uniform(keys[ki + 1], (1, fan_out), jnp.float32, -bound, bound)
        ki += 2
        if pad_rows:
            w = jnp.pad(w, ((0, pad_rows), (0, 0)))
        if pad_cols:
            w = jnp.pad(w, ((0, 0), (0, pad_cols)))
            b = jnp.pad(b, ((0, 0), (0, pad_cols)))
        return w.astype(jnp.bfloat16), b                 # weights bf16, biases f32

    params["w1"], params["b1"] = linear(dims[0], dims[1], pad_rows=in_row_pad)
    # b2/b3/b4 are created for reference/fidelity but NOT passed to the kernel:
    # they cancel exactly under training-mode BatchNorm.
    params["w2"], params["b2"] = linear(dims[1], dims[2])
    params["w3"], params["b3"] = linear(dims[2], dims[3])
    params["w4"], params["b4"] = linear(dims[3], dims[4])
    params["w5"], params["b5"] = linear(dims[4], dims[5], pad_cols=out_col_pad)
    # BatchNorm affine params (PyTorch init: gamma=1, beta=0), kept f32.
    for name, d in (("2", dims[2]), ("3", dims[3]), ("4", dims[4])):
        params["g" + name] = jnp.ones((1, d), jnp.float32)
        params["be" + name] = jnp.zeros((1, d), jnp.float32)
    # Embedding table (n_classes, n_classes) ~ N(0,1) like nn.Embedding default,
    # zero-padded on columns so gen_in comes out lane-dense.
    emb = jax.random.normal(keys[ki], (n_classes, n_classes), jnp.float32)
    emb_col_pad = k_pad - latent_dim - n_classes
    if emb_col_pad:
        emb = jnp.pad(emb, ((0, 0), (0, emb_col_pad)))
    return params, emb


def _reference_forward(gen_in_padded, params, out_dim):
    """Pure-JAX reference: two-pass BN, un-folded affine, biases INCLUDED before BN
    (verifies the kernel's bias-drop + folded-affine algebra). bf16 mirrored at the
    matmuls so MXU precision matches."""
    def lin(h, w, b):
        return jnp.dot(h.astype(jnp.bfloat16), w,
                       preferred_element_type=jnp.float32) + b

    def bn(x, g, b, eps=0.8):
        mean = jnp.mean(x, axis=0, keepdims=True)
        var = jnp.mean((x - mean) ** 2, axis=0, keepdims=True)
        return (x - mean) * jax.lax.rsqrt(var + eps) * g + b

    lrelu = lambda x: jnp.where(x >= 0, x, 0.2 * x)
    h = lrelu(lin(gen_in_padded, params["w1"], params["b1"]))
    h = lrelu(bn(lin(h, params["w2"], params["b2"]), params["g2"], params["be2"]))
    h = lrelu(bn(lin(h, params["w3"], params["b3"]), params["g3"], params["be3"]))
    h = lrelu(bn(lin(h, params["w4"], params["b4"]), params["g4"], params["be4"]))
    return jnp.tanh(lin(h, params["w5"], params["b5"]))[:, :out_dim]


if __name__ == "__main__":
    # Small, module-consistent shapes.
    batch = 8
    n_classes = 10
    latent_dim = 32
    img_shape = (1, 8, 8)                     # prod = 64
    out_dim = int(np.prod(img_shape))

    key = jax.random.PRNGKey(0)
    k_param, k_noise, k_label = jax.random.split(key, 3)

    params, emb_table = init_params(k_param, latent_dim, n_classes, out_dim)

    noise = jax.random.normal(k_noise, (batch, latent_dim), jnp.float32)
    label = jax.random.randint(k_label, (batch,), 0, n_classes, jnp.int32)

    # Plain-JAX glue: embedding lookup + concat (matches torch.cat((noise, emb(label)), -1)).
    # emb_table columns are zero-padded, so gen_in is already lane-dense (B, 128).
    label_emb = jnp.take(emb_table, label, axis=0)          # (B, n_classes + pad)
    gen_in = jnp.concatenate([noise, label_emb], axis=-1)   # (B, K_pad)

    gen_img = generator_forward(gen_in, params, out_dim=out_dim)   # (B, prod(img_shape))
    jax.block_until_ready(gen_img)

    # Correctness checks.
    assert gen_img.shape == (batch, out_dim)
    assert bool(jnp.all(jnp.isfinite(gen_img)))
    assert bool(jnp.all(jnp.abs(gen_img) <= 1.0))           # tanh output range

    ref = _reference_forward(gen_in, params, out_dim)
    assert bool(jnp.all(jnp.abs(gen_img - ref) < 5e-2))      # bf16-matmul tolerance

    print("KERNEL_OK")
</pallas_src>

<mosaic_0001>
module attributes {stable_mosaic.version = 11 : i64} {
  func.func @generator_kernel(%arg0: memref<8x128xf32, #tpu.memory_space<vmem>>, %arg1: memref<128x128xbf16, #tpu.memory_space<vmem>>, %arg2: memref<1x128xf32, #tpu.memory_space<vmem>>, %arg3: memref<128x256xbf16, #tpu.memory_space<vmem>>, %arg4: memref<1x256xf32, #tpu.memory_space<vmem>>, %arg5: memref<1x256xf32, #tpu.memory_space<vmem>>, %arg6: memref<256x512xbf16, #tpu.memory_space<vmem>>, %arg7: memref<1x512xf32, #tpu.memory_space<vmem>>, %arg8: memref<1x512xf32, #tpu.memory_space<vmem>>, %arg9: memref<512x1024xbf16, #tpu.memory_space<vmem>>, %arg10: memref<1x1024xf32, #tpu.memory_space<vmem>>, %arg11: memref<1x1024xf32, #tpu.memory_space<vmem>>, %arg12: memref<1024x128xbf16, #tpu.memory_space<vmem>>, %arg13: memref<1x128xf32, #tpu.memory_space<vmem>>, %arg14: memref<8x128xf32, #tpu.memory_space<vmem>>) attributes {dimension_semantics = [], scalar_prefetch = 0 : i64, scratch_operands = 0 : i64, tpu.core_type = #tpu.core_type<tc>} {
    %c0 = arith.constant 0 : index
    %c0_0 = arith.constant 0 : index
    %0 = vector.load %arg0[%c0, %c0_0] : memref<8x128xf32, #tpu.memory_space<vmem>>, vector<8x128xf32>
    %1 = arith.truncf %0 : vector<8x128xf32> to vector<8x128xbf16>
    %c0_1 = arith.constant 0 : index
    %c0_2 = arith.constant 0 : index
    %2 = vector.load %arg1[%c0_1, %c0_2] : memref<128x128xbf16, #tpu.memory_space<vmem>>, vector<128x128xbf16>
    %cst = arith.constant dense<0.000000e+00> : vector<8x128xf32>
    %3 = tpu.matmul %1, %2, %cst {dimension_numbers = #tpu.dot_dimension_numbers<[1], [0], [0], [1], [0, 0, 1, 1], [], []>} : vector<8x128xbf16>, vector<128x128xbf16>, vector<8x128xf32> -> vector<8x128xf32>
    %c0_3 = arith.constant 0 : index
    %c0_4 = arith.constant 0 : index
    %4 = vector.load %arg2[%c0_3, %c0_4] : memref<1x128xf32, #tpu.memory_space<vmem>>, vector<1x128xf32>
    %5 = vector.broadcast %4 : vector<1x128xf32> to vector<8x128xf32>
    %6 = arith.addf %3, %5 : vector<8x128xf32>
    %cst_5 = arith.constant 2.000000e-01 : f32
    %7 = vector.broadcast %cst_5 : f32 to vector<8x128xf32>
    %8 = arith.mulf %7, %6 : vector<8x128xf32>
    %9 = arith.maximumf %6, %8 : vector<8x128xf32>
    %10 = arith.truncf %9 : vector<8x128xf32> to vector<8x128xbf16>
    %c0_6 = arith.constant 0 : index
    %c0_7 = arith.constant 0 : index
    %11 = vector.load %arg3[%c0_6, %c0_7] : memref<128x256xbf16, #tpu.memory_space<vmem>>, vector<128x256xbf16>
    %cst_8 = arith.constant dense<0.000000e+00> : vector<8x256xf32>
    %12 = tpu.matmul %10, %11, %cst_8 {dimension_numbers = #tpu.dot_dimension_numbers<[1], [0], [0], [1], [0, 0, 1, 1], [], []>} : vector<8x128xbf16>, vector<128x256xbf16>, vector<8x256xf32> -> vector<8x256xf32>
    %c0_9 = arith.constant 0 : index
    %c0_10 = arith.constant 0 : index
    %13 = vector.load %arg4[%c0_9, %c0_10] : memref<1x256xf32, #tpu.memory_space<vmem>>, vector<1x256xf32>
    %c0_11 = arith.constant 0 : index
    %c0_12 = arith.constant 0 : index
    %14 = vector.load %arg5[%c0_11, %c0_12] : memref<1x256xf32, #tpu.memory_space<vmem>>, vector<1x256xf32>
    %cst_13 = arith.constant dense<0.000000e+00> : vector<256xf32>
    %15 = vector.multi_reduction <add>, %12, %cst_13 [0] : vector<8x256xf32> to vector<256xf32>
    %16 = vector.shape_cast %15 : vector<256xf32> to vector<1x256xf32>
    %17 = arith.mulf %12, %12 : vector<8x256xf32>
    %cst_14 = arith.constant dense<0.000000e+00> : vector<256xf32>
    %18 = vector.multi_reduction <add>, %17, %cst_14 [0] : vector<8x256xf32> to vector<256xf32>
    %19 = vector.shape_cast %18 : vector<256xf32> to vector<1x256xf32>
    %cst_15 = arith.constant 1.250000e-01 : f32
    %20 = vector.broadcast %cst_15 : f32 to vector<1x256xf32>
    %21 = arith.mulf %16, %20 : vector<1x256xf32>
    %cst_16 = arith.constant 1.250000e-01 : f32
    %22 = vector.broadcast %cst_16 : f32 to vector<1x256xf32>
    %23 = arith.mulf %19, %22 : vector<1x256xf32>
    %24 = arith.mulf %21, %21 : vector<1x256xf32>
    %25 = arith.subf %23, %24 : vector<1x256xf32>
    %cst_17 = arith.constant 0.000000e+00 : f32
    %26 = vector.broadcast %cst_17 : f32 to vector<1x256xf32>
    %27 = arith.maximumf %25, %26 : vector<1x256xf32>
    %cst_18 = arith.constant 8.000000e-01 : f32
    %28 = vector.broadcast %cst_18 : f32 to vector<1x256xf32>
    %29 = arith.addf %27, %28 : vector<1x256xf32>
    %30 = math.rsqrt %29 : vector<1x256xf32>
    %31 = arith.mulf %30, %13 : vector<1x256xf32>
    %32 = arith.mulf %21, %31 : vector<1x256xf32>
    %33 = arith.subf %14, %32 : vector<1x256xf32>
    %34 = vector.broadcast %31 : vector<1x256xf32> to vector<8x256xf32>
    %35 = arith.mulf %12, %34 : vector<8x256xf32>
    %36 = vector.broadcast %33 : vector<1x256xf32> to vector<8x256xf32>
    %37 = arith.addf %35, %36 : vector<8x256xf32>
    %cst_19 = arith.constant 2.000000e-01 : f32
    %38 = vector.broadcast %cst_19 : f32 to vector<8x256xf32>
    %39 = arith.mulf %38, %37 : vector<8x256xf32>
    %40 = arith.maximumf %37, %39 : vector<8x256xf32>
    %41 = arith.truncf %40 : vector<8x256xf32> to vector<8x256xbf16>
    %c0_20 = arith.constant 0 : index
    %c0_21 = arith.constant 0 : index
    %42 = vector.load %arg6[%c0_20, %c0_21] : memref<256x512xbf16, #tpu.memory_space<vmem>>, vector<256x512xbf16>
    %cst_22 = arith.constant dense<0.000000e+00> : vector<8x512xf32>
    %43 = tpu.matmul %41, %42, %cst_22 {dimension_numbers = #tpu.dot_dimension_numbers<[1], [0], [0], [1], [0, 0, 1, 1], [], []>} : vector<8x256xbf16>, vector<256x512xbf16>, vector<8x512xf32> -> vector<8x512xf32>
    %c0_23 = arith.constant 0 : index
    %c0_24 = arith.constant 0 : index
    %44 = vector.load %arg7[%c0_23, %c0_24] : memref<1x512xf32, #tpu.memory_space<vmem>>, vector<1x512xf32>
    %c0_25 = arith.constant 0 : index
    %c0_26 = arith.constant 0 : index
    %45 = vector.load %arg8[%c0_25, %c0_26] : memref<1x512xf32, #tpu.memory_space<vmem>>, vector<1x512xf32>
    %cst_27 = arith.constant dense<0.000000e+00> : vector<512xf32>
    %46 = vector.multi_reduction <add>, %43, %cst_27 [0] : vector<8x512xf32> to vector<512xf32>
    %47 = vector.shape_cast %46 : vector<512xf32> to vector<1x512xf32>
    %48 = arith.mulf %43, %43 : vector<8x512xf32>
    %cst_28 = arith.constant dense<0.000000e+00> : vector<512xf32>
    %49 = vector.multi_reduction <add>, %48, %cst_28 [0] : vector<8x512xf32> to vector<512xf32>
    %50 = vector.shape_cast %49 : vector<512xf32> to vector<1x512xf32>
    %cst_29 = arith.constant 1.250000e-01 : f32
    %51 = vector.broadcast %cst_29 : f32 to vector<1x512xf32>
    %52 = arith.mulf %47, %51 : vector<1x512xf32>
    %cst_30 = arith.constant 1.250000e-01 : f32
    %53 = vector.broadcast %cst_30 : f32 to vector<1x512xf32>
    %54 = arith.mulf %50, %53 : vector<1x512xf32>
    %55 = arith.mulf %52, %52 : vector<1x512xf32>
    %56 = arith.subf %54, %55 : vector<1x512xf32>
    %cst_31 = arith.constant 0.000000e+00 : f32
    %57 = vector.broadcast %cst_31 : f32 to vector<1x512xf32>
    %58 = arith.maximumf %56, %57 : vector<1x512xf32>
    %cst_32 = arith.constant 8.000000e-01 : f32
    %59 = vector.broadcast %cst_32 : f32 to vector<1x512xf32>
    %60 = arith.addf %58, %59 : vector<1x512xf32>
    %61 = math.rsqrt %60 : vector<1x512xf32>
    %62 = arith.mulf %61, %44 : vector<1x512xf32>
    %63 = arith.mulf %52, %62 : vector<1x512xf32>
    %64 = arith.subf %45, %63 : vector<1x512xf32>
    %65 = vector.broadcast %62 : vector<1x512xf32> to vector<8x512xf32>
    %66 = arith.mulf %43, %65 : vector<8x512xf32>
    %67 = vector.broadcast %64 : vector<1x512xf32> to vector<8x512xf32>
    %68 = arith.addf %66, %67 : vector<8x512xf32>
    %cst_33 = arith.constant 2.000000e-01 : f32
    %69 = vector.broadcast %cst_33 : f32 to vector<8x512xf32>
    %70 = arith.mulf %69, %68 : vector<8x512xf32>
    %71 = arith.maximumf %68, %70 : vector<8x512xf32>
    %72 = arith.truncf %71 : vector<8x512xf32> to vector<8x512xbf16>
    %c0_34 = arith.constant 0 : index
    %c0_35 = arith.constant 0 : index
    %73 = vector.load %arg9[%c0_34, %c0_35] : memref<512x1024xbf16, #tpu.memory_space<vmem>>, vector<512x1024xbf16>
    %cst_36 = arith.constant dense<0.000000e+00> : vector<8x1024xf32>
    %74 = tpu.matmul %72, %73, %cst_36 {dimension_numbers = #tpu.dot_dimension_numbers<[1], [0], [0], [1], [0, 0, 1, 1], [], []>} : vector<8x512xbf16>, vector<512x1024xbf16>, vector<8x1024xf32> -> vector<8x1024xf32>
    %c0_37 = arith.constant 0 : index
    %c0_38 = arith.constant 0 : index
    %75 = vector.load %arg10[%c0_37, %c0_38] : memref<1x1024xf32, #tpu.memory_space<vmem>>, vector<1x1024xf32>
    %c0_39 = arith.constant 0 : index
    %c0_40 = arith.constant 0 : index
    %76 = vector.load %arg11[%c0_39, %c0_40] : memref<1x1024xf32, #tpu.memory_space<vmem>>, vector<1x1024xf32>
    %cst_41 = arith.constant dense<0.000000e+00> : vector<1024xf32>
    %77 = vector.multi_reduction <add>, %74, %cst_41 [0] : vector<8x1024xf32> to vector<1024xf32>
    %78 = vector.shape_cast %77 : vector<1024xf32> to vector<1x1024xf32>
    %79 = arith.mulf %74, %74 : vector<8x1024xf32>
    %cst_42 = arith.constant dense<0.000000e+00> : vector<1024xf32>
    %80 = vector.multi_reduction <add>, %79, %cst_42 [0] : vector<8x1024xf32> to vector<1024xf32>
    %81 = vector.shape_cast %80 : vector<1024xf32> to vector<1x1024xf32>
    %cst_43 = arith.constant 1.250000e-01 : f32
    %82 = vector.broadcast %cst_43 : f32 to vector<1x1024xf32>
    %83 = arith.mulf %78, %82 : vector<1x1024xf32>
    %cst_44 = arith.constant 1.250000e-01 : f32
    %84 = vector.broadcast %cst_44 : f32 to vector<1x1024xf32>
    %85 = arith.mulf %81, %84 : vector<1x1024xf32>
    %86 = arith.mulf %83, %83 : vector<1x1024xf32>
    %87 = arith.subf %85, %86 : vector<1x1024xf32>
    %cst_45 = arith.constant 0.000000e+00 : f32
    %88 = vector.broadcast %cst_45 : f32 to vector<1x1024xf32>
    %89 = arith.maximumf %87, %88 : vector<1x1024xf32>
    %cst_46 = arith.constant 8.000000e-01 : f32
    %90 = vector.broadcast %cst_46 : f32 to vector<1x1024xf32>
    %91 = arith.addf %89, %90 : vector<1x1024xf32>
    %92 = math.rsqrt %91 : vector<1x1024xf32>
    %93 = arith.mulf %92, %75 : vector<1x1024xf32>
    %94 = arith.mulf %83, %93 : vector<1x1024xf32>
    %95 = arith.subf %76, %94 : vector<1x1024xf32>
    %96 = vector.broadcast %93 : vector<1x1024xf32> to vector<8x1024xf32>
    %97 = arith.mulf %74, %96 : vector<8x1024xf32>
    %98 = vector.broadcast %95 : vector<1x1024xf32> to vector<8x1024xf32>
    %99 = arith.addf %97, %98 : vector<8x1024xf32>
    %cst_47 = arith.constant 2.000000e-01 : f32
    %100 = vector.broadcast %cst_47 : f32 to vector<8x1024xf32>
    %101 = arith.mulf %100, %99 : vector<8x1024xf32>
    %102 = arith.maximumf %99, %101 : vector<8x1024xf32>
    %103 = arith.truncf %102 : vector<8x1024xf32> to vector<8x1024xbf16>
    %c0_48 = arith.constant 0 : index
    %c0_49 = arith.constant 0 : index
    %104 = vector.load %arg12[%c0_48, %c0_49] : memref<1024x128xbf16, #tpu.memory_space<vmem>>, vector<1024x128xbf16>
    %cst_50 = arith.constant dense<0.000000e+00> : vector<8x128xf32>
    %105 = tpu.matmul %103, %104, %cst_50 {dimension_numbers = #tpu.dot_dimension_numbers<[1], [0], [0], [1], [0, 0, 1, 1], [], []>} : vector<8x1024xbf16>, vector<1024x128xbf16>, vector<8x128xf32> -> vector<8x128xf32>
    %c0_51 = arith.constant 0 : index
    %c0_52 = arith.constant 0 : index
    %106 = vector.load %arg13[%c0_51, %c0_52] : memref<1x128xf32, #tpu.memory_space<vmem>>, vector<1x128xf32>
    %107 = vector.broadcast %106 : vector<1x128xf32> to vector<8x128xf32>
    %108 = arith.addf %105, %107 : vector<8x128xf32>
    %109 = math.tanh %108 : vector<8x128xf32>
    %c0_53 = arith.constant 0 : index
    %c0_54 = arith.constant 0 : index
    %110 = vector.load %arg14[%c0_53, %c0_54] : memref<8x128xf32, #tpu.memory_space<vmem>>, vector<8x128xf32>
    tpu.vector_store %arg14[%c0_53, %c0_54], %109 {strides = array<i32>} : memref<8x128xf32, #tpu.memory_space<vmem>>, vector<8x128xf32>,
    return
  }
}

</mosaic_0001>

<bundles_post_ra>
// kernel: generator_forward.1
= control target key start
LH: loop header
LB: loop body
LE: loop exit
PB: predicated region body
PF: predicated region fallthrough
CT: control target
= control target key end

     0   :  { %19 = vsyncpa [#allocation3], 0  ;;  %s7085_s0 = inlined_call_operand.hbm [shape: f32[8,128], index: 0, kind: input, shape index: {}]   ;;  %s7086_s1 = inlined_call_operand.hbm [shape: bf16[128,128], index: 1, kind: input, shape index: {}]   ;;  %s7087_s2 = inlined_call_operand.hbm [shape: f32[1,128], index: 2, kind: input, shape index: {}]   ;;  %s7088_s3 = inlined_call_operand.hbm [shape: bf16[128,256], index: 3, kind: input, shape index: {}]   ;;  %s7089_s4 = inlined_call_operand.vmem [shape: f32[1,256], index: 4, kind: input, shape index: {}]   ;;  %s7090_s5 = inlined_call_operand.hbm [shape: f32[1,256], index: 5, kind: input, shape index: {}]   ;;  %s7091_s6 = inlined_call_operand.hbm [shape: bf16[256,512], index: 6, kind: input, shape index: {}]   ;;  %s7092_s7 = inlined_call_operand.vmem [shape: f32[1,512], index: 7, kind: input, shape index: {}]   ;;  %s7093_s8 = inlined_call_operand.hbm [shape: f32[1,512], index: 8, kind: input, shape index: {}]   ;;  %s7094_s9 = inlined_call_operand.hbm [shape: bf16[512,1024], index: 9, kind: input, shape index: {}]   ;;  %s7095_s10 = inlined_call_operand.hbm [shape: f32[1,1024], index: 10, kind: input, shape index: {}]   ;;  %s7096_s11 = inlined_call_operand.hbm [shape: f32[1,1024], index: 11, kind: input, shape index: {}]   ;;  %s7097_s12 = inlined_call_operand.hbm [shape: bf16[1024,128], index: 12, kind: input, shape index: {}]   ;;  %s7098_s13 = inlined_call_operand.hbm [shape: f32[1,128], index: 13, kind: input, shape index: {}]   ;;  %s7099_s14 = inlined_call_operand.hbm [shape: f32[8,128], index: 14, kind: output, shape index: {}]  }
   0x1   :  { %20 = vsyncpa [#allocation6], 0 }
   0x2   :  { %21 = vsyncpa [#allocation9], 0 }
   0x3   :  { %22 = vsyncpa [#allocation12], 0 }
   0x4   :  { %23 = vsyncpa [#allocation15], 0 }
   0x5   :  { %24 = vsyncpa [#allocation18], 0 }
   0x6   :  { %25 = vsyncpa [#allocation21], 0  ;;  %s42_s15 = sshll.u32 %s7086_s1, 4  ;;  %s43_s15 = int_to_ptr.hbm [resolvable:$true] %s42_s15 }
   0x7   :  { %26 = vsyncpa [#allocation4], 0  ;;  %s6570_s16 = smov [#allocation5]   ;;  %s66_s20 = sshll.u32 %s7088_s3, 4  ;;  %s67_s20 = int_to_ptr.hbm [resolvable:$true] %s66_s20 }
   0x8   :  { %s44_s17 = sshll.u32 %s6570_s16, 4  ;;  %s6571_s21 = smov 64   ;;  %s45_s17 = int_to_ptr.vmem [resolvable:$true] %s44_s17 }
   0x9   :  { %s6572_s22 = smov 4   ;;  %s6573_s23 = smov [#allocation8]  }
   0xa   :  { %50 = dma.hbm_to_vmem [thread:$0]  %s43_s15, 1024, %s45_s17, [#allocation6], %s6571_s21, %s6571_s21, %s6572_s22  }
   0xb   :  { %s68_s24 = sshll.u32 %s6573_s23, 4  ;;  %s6574_s1 = smov 128   ;;  %s69_s24 = int_to_ptr.vmem [resolvable:$true] %s68_s24 }
   0xc   :  { %s6575_s25 = smov 8   ;;  %s92_s28 = sshll.u32 %s7091_s6, 4  ;;  %s93_s28 = int_to_ptr.hbm [resolvable:$true] %s92_s28 }
   0xd   :  { %74 = dma.hbm_to_vmem [thread:$0]  %s67_s20, 2048, %s69_s24, [#allocation9], %s6574_s1, %s6574_s1, %s6575_s25  }
   0xe   :  { %s6576_s29 = smov [#allocation11]   ;;  %s118_s18 = sshll.u32 %s7094_s9, 4  ;;  %s119_s18 = int_to_ptr.hbm [resolvable:$true] %s118_s18 }
   0xf   :  { %s94_s3 = sshll.u32 %s6576_s29, 4  ;;  %s6577_s15 = smov 256   ;;  %s95_s3 = int_to_ptr.vmem [resolvable:$true] %s94_s3 }
  0x10   :  { %s6578_s17 = smov 16   ;;  %s6579_s19 = smov [#allocation14]  }
  0x11   :  { %100 = dma.hbm_to_vmem [thread:$0]  %s93_s28, 8192, %s95_s3, [#allocation12], %s6577_s15, %s6577_s15, %s6578_s17  }
  0x12   :  { %s120_s23 = sshll.u32 %s6579_s19, 4  ;;  %s6580_s20 = smov 512   ;;  %s121_s23 = int_to_ptr.vmem [resolvable:$true] %s120_s23 }
  0x13   :  { %s6581_s24 = smov 32   ;;  %s143_s25 = sshll.u32 %s7096_s11, 4  ;;  %s144_s25 = int_to_ptr.hbm [resolvable:$true] %s143_s25 }
  0x14   :  { %126 = dma.hbm_to_vmem [thread:$0]  %s119_s18, 32768, %s121_s23, [#allocation15], %s6580_s20, %s6580_s20, %s6581_s24  }
  0x15   :  { %s6582_s26 = smov [#allocation17]   ;;  %s32_s30 = sshll.u32 %s7085_s0, 4  ;;  %s33_s30 = int_to_ptr.hbm [resolvable:$true] %s32_s30 }
  0x16   :  { %s145_s27 = sshll.u32 %s6582_s26, 4  ;;  %s6583_s28 = smov [#allocation2]   ;;  %s146_s27 = int_to_ptr.vmem [resolvable:$true] %s145_s27 }
  0x17   :  { %148 = dma.hbm_to_vmem [thread:$0]  %s144_s25, 128, %s146_s27, [#allocation18]  }
  0x18   :  { %s34_s3 = sshll.u32 %s6583_s28, 4  ;;  %s56_s18 = sshll.u32 %s7087_s2, 4  ;;  %s35_s3 = int_to_ptr.vmem [resolvable:$true] %s34_s3  ;;  %s57_s18 = int_to_ptr.hbm [resolvable:$true] %s56_s18 }
  0x19   :  { %37 = dma.hbm_to_vmem [thread:$0]  %s33_s30, 128, %s35_s3, [#allocation3]  }
  0x1a   :  { %s82_s19 = sshll.u32 %s7090_s5, 4  ;;  %s6584_s23 = smov [#allocation7]   ;;  %s83_s19 = int_to_ptr.hbm [resolvable:$true] %s82_s19 }
  0x1b   :  { %s58_s20 = sshll.u32 %s6584_s23, 4  ;;  %s6585_s0 = smov [#allocation10]   ;;  %s59_s20 = int_to_ptr.vmem [resolvable:$true] %s58_s20 }
  0x1c   :  { %61 = dma.hbm_to_vmem [thread:$0]  %s57_s18, 16, %s59_s20, [#allocation6]  }
  0x1d   :  { %s84_s24 = sshll.u32 %s6585_s0, 4  ;;  %s108_s25 = sshll.u32 %s7093_s8, 4  ;;  %s85_s24 = int_to_ptr.vmem [resolvable:$true] %s84_s24  ;;  %s109_s25 = int_to_ptr.hbm [resolvable:$true] %s108_s25 }
  0x1e   :  { %87 = dma.hbm_to_vmem [thread:$0]  %s83_s19, 32, %s85_s24, [#allocation9]  }
  0x1f   :  { %s132_s27 = sshll.u32 %s7095_s10, 4  ;;  %s6586_s29 = smov [#allocation13]   ;;  %s133_s27 = int_to_ptr.hbm [resolvable:$true] %s132_s27 }
  0x20   :  { %s110_s5 = sshll.u32 %s6586_s29, 4  ;;  %s6587_s9 = smov [#allocation16]   ;;  %s111_s5 = int_to_ptr.vmem [resolvable:$true] %s110_s5 }
  0x21   :  { %113 = dma.hbm_to_vmem [thread:$0]  %s109_s25, 64, %s111_s5, [#allocation12]  }
  0x22   :  { %s134_s30 = sshll.u32 %s6587_s9, 4  ;;  %s153_s16 = sshll.u32 %s7097_s12, 4  ;;  %s135_s30 = int_to_ptr.vmem [resolvable:$true] %s134_s30  ;;  %s154_s16 = int_to_ptr.hbm [resolvable:$true] %s153_s16 }
  0x23   :  { %137 = dma.hbm_to_vmem [thread:$0]  %s133_s27, 128, %s135_s30, [#allocation15]  }
  0x24   :  { %s167_s18 = sshll.u32 %s7098_s13, 4  ;;  %s6588_s11 = smov [#allocation19]   ;;  %s168_s18 = int_to_ptr.hbm [resolvable:$true] %s167_s18 }
  0x25   :  { %s155_s10 = sshll.u32 %s6588_s11, 4  ;;  %s6589_s17 = smov [#allocation20]   ;;  %s156_s10 = int_to_ptr.vmem [resolvable:$true] %s155_s10 }
  0x26   :  { %161 = dma.hbm_to_vmem [thread:$0]  %s154_s16, 8192, %s156_s10, [#allocation18], %s6571_s21, %s6571_s21, %s6572_s22  }
  0x27   :  { %s169_s19 = sshll.u32 %s6589_s17, 4  ;;  %s170_s19 = int_to_ptr.vmem [resolvable:$true] %s169_s19 }
  0x28   :  { %172 = dma.hbm_to_vmem [thread:$0]  %s168_s18, 16, %s170_s19, [#allocation21]  }
  0x29   :  { %6554 = dma.done.wait [#allocation3], 128  }
  0x2a   :  { %6555 = vsyncadd [#allocation3], 4294967168 }
  0x2b   :  { %6556 = dma.done.wait [#allocation6], 1040  }
  0x2c   :  { %6557 = vsyncadd [#allocation6], 4294966256 }
  0x2d   :  { %6558 = dma.done.wait [#allocation9], 2080  }
  0x2e   :  { %6559 = vsyncadd [#allocation9], 4294965216 }
  0x2f   :  { %6560 = dma.done.wait [#allocation12], 8256  }
  0x30   :  { %6561 = vsyncadd [#allocation12], 4294959040 }
  0x31   :  { %6562 = dma.done.wait [#allocation15], 32896  }
  0x32   :  { %6563 = vsyncadd [#allocation15], 4294934400 }
  0x33   :  { %6564 = dma.done.wait [#allocation18], 8320  }
  0x34   :  { %6565 = vsyncadd [#allocation18], 4294958976 }
  0x35   :  { %6566 = dma.done.wait [#allocation21], 16  }
  0x36   :  { %6567 = vsyncadd [#allocation21], 4294967280  ;;  %v5788_v0 = vld [vmem:[#allocation5 + $0x38] sm:$0xff]  ;;  %v5787_v1 = vld [vmem:[#allocation5 + $0x30] sm:$0xff]  ;;  %vm501_vm6 = vcmask 1040384   ;;  %s4133_s0 = sshll.u32 %s7099_s14, 4  ;;  %s4134_s0 = int_to_ptr.hbm [resolvable:$true] %s4133_s0 }
  0x37   :  { %291 = vmatpush.bf16.msra.mxu0 %v5788_v0  ;;  %v4239_v2 = vld [vmem:[#allocation8 + $0x70] sm:$0xf]  ;;  %v5804_v3 = vld [vmem:[#allocation8 + $0x74] sm:$0xf0]  ;;  %v5803_v4 = vld [vmem:[#allocation8 + $0x74] sm:$0xf] }
  0x38   :  { %v4240_v5 = vor.u32 %v5804_v3, %v4239_v2  ;;  %v4241_v6 = vld [vmem:[#allocation8 + $0x78] sm:$0xf0]  ;;  %v4231_v7 = vld [vmem:[#allocation8 + $0x60] sm:$0xf]  ;;  %v5802_v8 = vld [vmem:[#allocation8 + $0x64] sm:$0xf0] }
  0x39   :  { %v4244_v9 = vor.u32 %v5803_v4, %v4241_v6  ;;  %v5801_v10 = vld [vmem:[#allocation8 + $0x64] sm:$0xf]  ;;  %v4233_v11 = vld [vmem:[#allocation8 + $0x68] sm:$0xf0]  ;;  %v4232_v13 = vor.u32 %v5802_v8, %v4231_v7  ;;  %v4223_v15 = vld [vmem:[#allocation8 + $0x50] sm:$0xf] }
  0x3a   :  { %v5786_v12 = vld [vmem:[#allocation5 + $0x28] sm:$0xff]  ;;  %403 = vmatpush.bf16.msra.mxu1 %v4240_v5  ;;  %v4236_v14 = vor.u32 %v5801_v10, %v4233_v11  ;;  %v5800_v16 = vld [vmem:[#allocation8 + $0x54] sm:$0xf0]  ;;  %v5799_v17 = vld [vmem:[#allocation8 + $0x54] sm:$0xf] }
  0x3b   :  { %292 = vmatpush.bf16.msra.mxu0 %v5787_v1  ;;  %416 = vmatpush.bf16.msra.mxu2 %v4244_v9  ;;  %v4225_v18 = vld [vmem:[#allocation8 + $0x58] sm:$0xf0]  ;;  %v4224_v20 = vor.u32 %v5800_v16, %v4223_v15  ;;  %v4215_v21 = vld [vmem:[#allocation8 + $0x40] sm:$0xf]  ;;  %v5798_v23 = vld [vmem:[#allocation8 + $0x44] sm:$0xf0] }
  0x3c   :  { %v5785_v19 = vld [vmem:[#allocation5 + $0x20] sm:$0xff]  ;;  %v4228_v22 = vor.u32 %v5799_v17, %v4225_v18  ;;  %v4217_v25 = vld [vmem:[#allocation8 + $0x48] sm:$0xf0]  ;;  %v5784_v26 = vld [vmem:[#allocation5 + $0x18] sm:$0xff]  ;;  %v4216_v27 = vor.u32 %v5798_v23, %v4215_v21 }
  0x3d   :  { %v5797_v24 = vld [vmem:[#allocation8 + $0x44] sm:$0xf]  ;;  %v4207_v29 = vld [vmem:[#allocation8 + $0x30] sm:$0xf]  ;;  %v5796_v30 = vld [vmem:[#allocation8 + $0x34] sm:$0xf0] }
  0x3e   :  { %404 = vmatpush.bf16.msra.mxu1 %v4232_v13  ;;  %v4220_v28 = vor.u32 %v5797_v24, %v4217_v25  ;;  %v5795_v31 = vld [vmem:[#allocation8 + $0x34] sm:$0xf]  ;;  %v4209_v32 = vld [vmem:[#allocation8 + $0x38] sm:$0xf0]  ;;  %v4208_v34 = vor.u32 %v5796_v30, %v4207_v29  ;;  %v4199_v36 = vld [vmem:[#allocation8 + $0x20] sm:$0xf] }
  0x3f   :  { %293 = vmatpush.bf16.msra.mxu0 %v5786_v12  ;;  %417 = vmatpush.bf16.msra.mxu2 %v4236_v14  ;;  %v5783_v33 = vld [vmem:[#allocation5 + $0x10] sm:$0xff]  ;;  %v4212_v35 = vor.u32 %v5795_v31, %v4209_v32  ;;  %v5794_v37 = vld [vmem:[#allocation8 + $0x24] sm:$0xf0]  ;;  %v5793_v38 = vld [vmem:[#allocation8 + $0x24] sm:$0xf] }
  0x40   :  { %v4201_v39 = vld [vmem:[#allocation8 + $0x28] sm:$0xf0]  ;;  %v4200_v41 = vor.u32 %v5794_v37, %v4199_v36  ;;  %v5781_v43 = vld [vmem:[#allocation5] sm:$0xff]  ;;  %v221_v44 = vld [vmem:[#allocation2] sm:$0xff] }
  0x41   :  { %v5782_v40 = vld [vmem:[#allocation5 + $0x8] sm:$0xff]  ;;  %v4204_v42 = vor.u32 %v5793_v38, %v4201_v39  ;;  %v222_v45 = vpack.c.bf16 %v221_v44, %v221_v44  ;;  %v4191_v46 = vld [vmem:[#allocation8 + $0x10] sm:$0xf]  ;;  %v5792_v47 = vld [vmem:[#allocation8 + $0x14] sm:$0xf0] }
  0x42   :  { %405 = vmatpush.bf16.msra.mxu1 %v4224_v20  ;;  %v5791_v48 = vld [vmem:[#allocation8 + $0x14] sm:$0xf]  ;;  %v4192_v49 = vor.u32 %v5792_v47, %v4191_v46  ;;  %v4193_v50 = vld [vmem:[#allocation8 + $0x18] sm:$0xf0]  ;;  %v4183_v52 = vld [vmem:[#allocation8] sm:$0xf] }
  0x43   :  { %294 = vmatpush.bf16.msra.mxu0 %v5785_v19  ;;  %418 = vmatpush.bf16.msra.mxu2 %v4228_v22  ;;  %v4196_v51 = vor.u32 %v5791_v48, %v4193_v50  ;;  %v5790_v53 = vld [vmem:[#allocation8 + $0x4] sm:$0xf0]  ;;  %v5789_v54 = vld [vmem:[#allocation8 + $0x4] sm:$0xf]  ;;  %v4185_v56 = vld [vmem:[#allocation8 + $0x8] sm:$0xf0] }
  0x44   :  { %v4184_v55 = vor.u32 %v5790_v53, %v4183_v52  ;;  %v4188_v57 = vor.u32 %v5789_v54, %v4185_v56  ;;  %v6210_v58 = vld [vmem:[#allocation7] ss:$0 sm:$0xff]  ;;  %v4359_v1 = vld [vmem:[#allocation11 + $0xe0] sm:$0xf]  ;;  %v5835_v2 = vld [vmem:[#allocation11 + $0xec] sm:$0xf0] }
  0x45   :  { %v4487_v3 = vld [vmem:[#allocation11 + $0x1e0] sm:$0xf]  ;;  %v4360_v4 = vor.u32 %v5835_v2, %v4359_v1  ;;  %v5867_v5 = vld [vmem:[#allocation11 + $0x1ec] sm:$0xf0]  ;;  %v5833_v6 = vld [vmem:[#allocation11 + $0xe4] sm:$0xf] }
  0x46   :  { %406 = vmatpush.bf16.msra.mxu1 %v4216_v27  ;;  %v4361_v7 = vld [vmem:[#allocation11 + $0xf0] sm:$0xf0]  ;;  %v4488_v8 = vor.u32 %v5867_v5, %v4487_v3  ;;  %v5865_v10 = vld [vmem:[#allocation11 + $0x1e4] sm:$0xf]  ;;  %v4343_v13 = vld [vmem:[#allocation11 + $0xc0] sm:$0xf] }
  0x47   :  { %295 = vmatpush.bf16.msra.mxu0 %v5784_v26  ;;  %419 = vmatpush.bf16.msra.mxu2 %v4220_v28  ;;  %v4364_v9 = vor.u32 %v5833_v6, %v4361_v7  ;;  %v4489_v11 = vld [vmem:[#allocation11 + $0x1f0] sm:$0xf0]  ;;  %v5831_v14 = vld [vmem:[#allocation11 + $0xcc] sm:$0xf0]  ;;  %v4471_v15 = vld [vmem:[#allocation11 + $0x1c0] sm:$0xf] }
  0x48   :  { %906 = vmatpush.bf16.msra.mxu3 %v4360_v4  ;;  %v4492_v12 = vor.u32 %v5865_v10, %v4489_v11  ;;  %v4344_v16 = vor.u32 %v5831_v14, %v4343_v13  ;;  %v5863_v17 = vld [vmem:[#allocation11 + $0x1cc] sm:$0xf0]  ;;  %v5829_v18 = vld [vmem:[#allocation11 + $0xc4] sm:$0xf]  ;;  %v4345_v19 = vld [vmem:[#allocation11 + $0xd0] sm:$0xf0] }
  0x49   :  { %v4472_v20 = vor.u32 %v5863_v17, %v4471_v15  ;;  %v4348_v21 = vor.u32 %v5829_v18, %v4345_v19  ;;  %v5861_v22 = vld [vmem:[#allocation11 + $0x1c4] sm:$0xf]  ;;  %v4473_v23 = vld [vmem:[#allocation11 + $0x1d0] sm:$0xf0]  ;;  %v4327_v25 = vld [vmem:[#allocation11 + $0xa0] sm:$0xf] }
  0x4a   :  { %407 = vmatpush.bf16.msra.mxu1 %v4208_v34  ;;  %v4476_v24 = vor.u32 %v5861_v22, %v4473_v23  ;;  %v5827_v26 = vld [vmem:[#allocation11 + $0xac] sm:$0xf0]  ;;  %v4455_v27 = vld [vmem:[#allocation11 + $0x1a0] sm:$0xf]  ;;  %v5825_v30 = vld [vmem:[#allocation11 + $0xa4] sm:$0xf] }
  0x4b   :  { %296 = vmatpush.bf16.msra.mxu0 %v5783_v33  ;;  %420 = vmatpush.bf16.msra.mxu2 %v4212_v35  ;;  %v4328_v28 = vor.u32 %v5827_v26, %v4327_v25  ;;  %v5859_v29 = vld [vmem:[#allocation11 + $0x1ac] sm:$0xf0]  ;;  %v4329_v31 = vld [vmem:[#allocation11 + $0xb0] sm:$0xf0]  ;;  %v5857_v34 = vld [vmem:[#allocation11 + $0x1a4] sm:$0xf] }
  0x4c   :  { %907 = vmatpush.bf16.msra.mxu3 %v4344_v16  ;;  %v4456_v32 = vor.u32 %v5859_v29, %v4455_v27  ;;  %v4332_v33 = vor.u32 %v5825_v30, %v4329_v31  ;;  %v4457_v35 = vld [vmem:[#allocation11 + $0x1b0] sm:$0xf0]  ;;  %v4311_v38 = vld [vmem:[#allocation11 + $0x80] sm:$0xf]  ;;  %v5823_v39 = vld [vmem:[#allocation11 + $0x8c] sm:$0xf0] }
  0x4d   :  { %v4460_v36 = vor.u32 %v5857_v34, %v4457_v35  ;;  %v5855_v44 = vld [vmem:[#allocation11 + $0x18c] sm:$0xf0]  ;;  %v4313_v47 = vld [vmem:[#allocation11 + $0x90] sm:$0xf0]  ;;  %v5853_v48 = vld [vmem:[#allocation11 + $0x184] sm:$0xf] }
  0x4e   :  { %408 = vmatpush.bf16.msra.mxu1 %v4200_v41  ;;  %v4295_v54 = vld [vmem:[#allocation11 + $0x60] sm:$0xf]  ;;  %v5849_v1 = vld [vmem:[#allocation11 + $0x164] sm:$0xf]  ;;  %v4425_v2 = vld [vmem:[#allocation11 + $0x170] sm:$0xf0] }
  0x4f   :  { %297 = vmatpush.bf16.msra.mxu0 %v5782_v40  ;;  %421 = vmatpush.bf16.msra.mxu2 %v4204_v42  ;;  %v4439_v40 = vld [vmem:[#allocation11 + $0x180] sm:$0xf]  ;;  %v5815_v11 = vld [vmem:[#allocation11 + $0x4c] sm:$0xf0]  ;;  %v5813_v18 = vld [vmem:[#allocation11 + $0x44] sm:$0xf] }
  0x50   :  { %908 = vmatpush.bf16.msra.mxu3 %v4328_v28  ;;  %v4440_v46 = vor.u32 %v5855_v44, %v4439_v40  ;;  %v4423_v56 = vld [vmem:[#allocation11 + $0x160] sm:$0xf]  ;;  %v5847_v17 = vld [vmem:[#allocation11 + $0x14c] sm:$0xf0]  ;;  %v5845_v22 = vld [vmem:[#allocation11 + $0x144] sm:$0xf] }
  0x51   :  { %v4279_v10 = vld [vmem:[#allocation11 + $0x40] sm:$0xf]  ;;  %v4409_v27 = vld [vmem:[#allocation11 + $0x150] sm:$0xf0]  ;;  %v5811_v31 = vld [vmem:[#allocation11 + $0x2c] sm:$0xf0] }
  0x52   :  { %409 = vmatpush.bf16.msra.mxu1 %v4192_v49  ;;  %v4441_v49 = vld [vmem:[#allocation11 + $0x190] sm:$0xf0]  ;;  %v4280_v16 = vor.u32 %v5815_v11, %v4279_v10  ;;  %v4412_v29 = vor.u32 %v5845_v22, %v4409_v27  ;;  %v4263_v30 = vld [vmem:[#allocation11 + $0x20] sm:$0xf]  ;;  %v4495_v10 = vld [vmem:[#allocation11 + $0x1e8] sm:$0xf] }
  0x53   :  { %298 = vmatpush.bf16.msra.mxu0 %v5781_v43  ;;  %422 = vmatpush.bf16.msra.mxu2 %v4196_v51  ;;  %v4312_v43 = vor.u32 %v5823_v39, %v4311_v38  ;;  %v4444_v53 = vor.u32 %v5853_v48, %v4441_v49  ;;  %v5843_v38 = vld [vmem:[#allocation11 + $0x12c] sm:$0xf0]  ;;  %v5841_v48 = vld [vmem:[#allocation11 + $0x124] sm:$0xf]  ;;  %v4393_v49 = vld [vmem:[#allocation11 + $0x130] sm:$0xf0] }
  0x54   :  { %v5868_v11 = vld [vmem:[#allocation11 + $0x1f4] sm:$0xf0]  ;;  %v4351_v22 = vld [vmem:[#allocation11 + $0xc8] sm:$0xf] }
  0x55   :  { %909 = vmatpush.bf16.msra.mxu3 %v4312_v43  ;;  %v4265_v43 = vld [vmem:[#allocation11 + $0x30] sm:$0xf0]  ;;  %v5864_v27 = vld [vmem:[#allocation11 + $0x1d4] sm:$0xf0] }
  0x56   :  { %299 = vmatmul.bf16.vlgmr.msra.gmra.mxu0 %v222_v45  ;;  %410 = vmatpush.bf16.msra.mxu1 %v4184_v55  ;;  %v5821_v45 = vld [vmem:[#allocation11 + $0x84] sm:$0xf]  ;;  %v5819_v55 = vld [vmem:[#allocation11 + $0x6c] sm:$0xf0] }
  0x57   :  { %423 = vmatpush.bf16.msra.mxu2 %v4188_v57  ;;  %919 = vmatpush.bf16.msrb.mxu0 %v4488_v8  ;;  %v4316_v52 = vor.u32 %v5821_v45, %v4313_v47 }
  0x5a   :  { %932 = vmatpush.bf16.msrb.mxu1 %v4364_v9  ;;  %v4428_v9 = vor.u32 %v5849_v1, %v4425_v2  ;;  %v5837_v1 = vld [vmem:[#allocation11 + $0x104] sm:$0xf]  ;;  %v4377_v2 = vld [vmem:[#allocation11 + $0x110] sm:$0xf0] }
  0x5b   :  { %945 = vmatpush.bf16.msrb.mxu2 %v4492_v12  ;;  %920 = vmatpush.bf16.msrb.mxu0 %v4472_v20  ;;  %v4407_v12 = vld [vmem:[#allocation11 + $0x140] sm:$0xf] }
  0x5c   :  { %v4408_v20 = vor.u32 %v5847_v17, %v4407_v12 }
  0x5e   :  { %933 = vmatpush.bf16.msrb.mxu1 %v4348_v21  ;;  %v4281_v21 = vld [vmem:[#allocation11 + $0x50] sm:$0xf0] }
  0x5f   :  { %946 = vmatpush.bf16.msrb.mxu2 %v4476_v24  ;;  %921 = vmatpush.bf16.msrb.mxu0 %v4456_v32  ;;  %v4284_v26 = vor.u32 %v5813_v18, %v4281_v21  ;;  %v4391_v32 = vld [vmem:[#allocation11 + $0x120] sm:$0xf] }
  0x62   :  { %934 = vmatpush.bf16.msrb.mxu1 %v4332_v33 }
  0x63   :  { %947 = vmatpush.bf16.msrb.mxu2 %v4460_v36  ;;  %922 = vmatpush.bf16.msrb.mxu0 %v4440_v46  ;;  %v4264_v36 = vor.u32 %v5811_v31, %v4263_v30 }
  0x66   :  { %935 = vmatpush.bf16.msrb.mxu1 %v4316_v52  ;;  %v4247_v52 = vld [vmem:[#allocation11] sm:$0xf] }
  0x67   :  { %948 = vmatpush.bf16.msrb.mxu2 %v4444_v53  ;;  %v5807_v53 = vld [vmem:[#allocation11 + $0xc] sm:$0xf0] }
  0x6b   :  { %949 = vmatpush.bf16.msrb.mxu2 %v4428_v9 }
  0x6f   :  { %950 = vmatpush.bf16.msrb.mxu2 %v4412_v29  ;;  %v4353_v29 = vld [vmem:[#allocation11 + $0xd8] sm:$0xf0] }
  0xd3   :  { %v300_v59 = vpop.f32.mrf.mxu0 }
  0xd4   :  { %v301_v60 = vadd.f32 %v6210_v58, %v300_v59  ;;  %v4296_v59 = vor.u32 %v5819_v55, %v4295_v54  ;;  %v4375_v54 = vld [vmem:[#allocation11 + $0x100] sm:$0xf] }
  0xd6   :  { %v304_v61 = vmul.f32 0.2, %v301_v60  ;;  %910 = vmatpush.bf16.msra.mxu3 %v4296_v59  ;;  %v5805_v59 = vld [vmem:[#allocation11 + $0x4] sm:$0xf] }
  0xd8   :  { %v305_v62 = vmax.f32 %v301_v60, %v304_v61  ;;  %v5851_v60 = vld [vmem:[#allocation11 + $0x16c] sm:$0xf0]  ;;  %v5817_v61 = vld [vmem:[#allocation11 + $0x64] sm:$0xf] }
  0xda   :  { %v306_v63 = vpack.c.bf16 %v305_v62, %v305_v62  ;;  %911 = vmatpush.bf16.msra.mxu3 %v4280_v16  ;;  %v4369_v16 = vld [vmem:[#allocation11 + $0xf8] sm:$0xf0] }
  0xdb   :  { %v302_v0 = vpop.f32.mrf.mxu0 }
  0xdc   :  { %411 = vmatmul.bf16.vlgmr.msra.gmra.mxu1 %v306_v63  ;;  %424 = vmatmul.bf16.vlgmr.msra.gmra.mxu2 %v306_v63  ;;  %v4424_v63 = vor.u32 %v5851_v60, %v4423_v56  ;;  %v4297_v0 = vld [vmem:[#allocation11 + $0x70] sm:$0xf0] }
  0xdd   :  { %v4300_v8 = vor.u32 %v5817_v61, %v4297_v0  ;;  %v4249_v60 = vld [vmem:[#allocation11 + $0x10] sm:$0xf0] }
  0xde   :  { %923 = vmatpush.bf16.msrb.mxu0 %v4424_v63  ;;  %912 = vmatpush.bf16.msra.mxu3 %v4264_v36  ;;  %v4252_v0 = vor.u32 %v5805_v59, %v4249_v60 }
  0xdf   :  { %936 = vmatpush.bf16.msrb.mxu1 %v4300_v8 }
  0xe2   :  { %924 = vmatpush.bf16.msrb.mxu0 %v4408_v20  ;;  %v4497_v20 = vld [vmem:[#allocation11 + $0x1f8] sm:$0xf0] }
  0xe3   :  { %937 = vmatpush.bf16.msrb.mxu1 %v4284_v26 }
 0x159   :  { %v6708_v37 = vpop.f32.mrf.mxu1 }
 0x15a   :  { %v431_v41 = vrot.slane %v6708_v37, 4  ;;  %v443_v42 = vmul.f32 %v6708_v37, %v6708_v37 }
 0x15c   :  { %v432_v50 = vadd.f32 %v431_v41, %v6708_v37  ;;  %v445_v51 = vrot.slane %v443_v42, 4  ;;  %v4392_v41 = vor.u32 %v5843_v38, %v4391_v32  ;;  %v5862_v32 = vld [vmem:[#allocation11 + $0x1cc] sm:$0xf] }
 0x15e   :  { %v433_v57 = vrot.slane %v432_v50, 2  ;;  %v446_v58 = vadd.f32 %v445_v51, %v443_v42  ;;  %v5809_v42 = vld [vmem:[#allocation11 + $0x24] sm:$0xf]  ;;  %925 = vmatpush.bf16.msrb.mxu0 %v4392_v41  ;;  %v4396_v51 = vor.u32 %v5841_v48, %v4393_v49  ;;  %v5858_v48 = vld [vmem:[#allocation11 + $0x1ac] sm:$0xf] }
 0x15f   :  { %v6714_v62 = vpop.f32.mrf.mxu2  ;;  %v4268_v47 = vor.u32 %v5809_v42, %v4265_v43  ;;  %v5860_v42 = vld [vmem:[#allocation11 + $0x1b4] sm:$0xf0]  ;;  %v5826_v43 = vld [vmem:[#allocation11 + $0xac] sm:$0xf]  ;;  %v4465_v49 = vld [vmem:[#allocation11 + $0x1b8] sm:$0xf0] }
 0x160   :  { %v434_v3 = vadd.f32 %v433_v57, %v432_v50  ;;  %v447_v4 = vrot.slane %v446_v58, 2  ;;  %v437_v5 = vrot.slane %v6714_v62, 4  ;;  %v444_v6 = vmul.f32 %v6714_v62, %v6714_v62  ;;  %951 = vmatpush.bf16.msrb.mxu2 %v4396_v51 }
 0x161   :  { %v414_v7 = vpop.f32.mrf.mxu1  ;;  %v4248_v57 = vor.u32 %v5807_v53, %v4247_v52  ;;  %938 = vmatpush.bf16.msrb.mxu1 %v4268_v47  ;;  %v4468_v51 = vor.u32 %v5858_v48, %v4465_v49  ;;  %v4319_v52 = vld [vmem:[#allocation11 + $0x88] sm:$0xf]  ;;  %v5824_v53 = vld [vmem:[#allocation11 + $0x94] sm:$0xf0]  ;;  %v5842_v48 = vld [vmem:[#allocation11 + $0x12c] sm:$0xf] }
 0x162   :  { %v435_v13 = vrot.slane %v434_v3, 1  ;;  %v448_v14 = vadd.f32 %v447_v4, %v446_v58  ;;  %v438_v15 = vadd.f32 %v437_v5, %v6714_v62  ;;  %v451_v19 = vrot.slane %v444_v6, 4  ;;  %v5839_v58 = vld [vmem:[#allocation11 + $0x10c] sm:$0xf0]  ;;  %v5836_v7 = vld [vmem:[#allocation11 + $0xf4] sm:$0xf0] }
 0x163   :  { %v4376_v63 = vor.u32 %v5839_v58, %v4375_v54  ;;  %913 = vmatpush.bf16.msra.mxu3 %v4248_v57  ;;  %v4380_v5 = vor.u32 %v5837_v1, %v4377_v2  ;;  %v4447_v54 = vld [vmem:[#allocation11 + $0x188] sm:$0xf]  ;;  %v5822_v57 = vld [vmem:[#allocation11 + $0x8c] sm:$0xf]  ;;  %v4321_v58 = vld [vmem:[#allocation11 + $0x98] sm:$0xf0]  ;;  %v4320_v59 = vor.u32 %v5824_v53, %v4319_v52 }
 0x164   :  { %v436_v23 = vadd.f32 %v435_v13, %v434_v3  ;;  %v449_v24 = vrot.slane %v448_v14, 1  ;;  %v439_v25 = vrot.slane %v438_v15, 2  ;;  %v452_v28 = vadd.f32 %v451_v19, %v444_v6  ;;  %v4367_v6 = vld [vmem:[#allocation11 + $0xe8] sm:$0xf]  ;;  %v5866_v19 = vld [vmem:[#allocation11 + $0x1ec] sm:$0xf] }
 0x165   :  { %926 = vmatpush.bf16.msrb.mxu0 %v4376_v63  ;;  %v4368_v9 = vor.u32 %v5836_v7, %v4367_v6  ;;  %939 = vmatpush.bf16.msrb.mxu1 %v4252_v0  ;;  %v4500_v21 = vor.u32 %v5866_v19, %v4497_v20  ;;  %v4449_v63 = vld [vmem:[#allocation11 + $0x198] sm:$0xf0]  ;;  %v4324_v1 = vor.u32 %v5822_v57, %v4321_v58  ;;  %v6742_v2 = vld [vmem:[%s7089_s4] sm:$0x3]  ;;  %v4303_v6 = vld [vmem:[#allocation11 + $0x68] sm:$0xf] }
 0x166   :  { %v450_v33 = vadd.f32 %v449_v24, %v448_v14  ;;  %v6720_v34 = vmul.f32 0.125, %v436_v23  ;;  %v440_v35 = vadd.f32 %v439_v25, %v438_v15  ;;  %v453_v39 = vrot.slane %v452_v28, 2  ;;  %v5834_v15 = vld [vmem:[#allocation11 + $0xec] sm:$0xf]  ;;  %952 = vmatpush.bf16.msrb.mxu2 %v4380_v5  ;;  %v5832_v23 = vld [vmem:[#allocation11 + $0xd4] sm:$0xf0] }
 0x167   :  { %v427_v40 = vpop.f32.mrf.mxu2  ;;  %v4496_v14 = vor.u32 %v5868_v11, %v4495_v10  ;;  %v4372_v18 = vor.u32 %v5834_v15, %v4369_v16  ;;  %958 = vmatpush.bf16.msrb.mxu3 %v4368_v9  ;;  %v4479_v24 = vld [vmem:[#allocation11 + $0x1c8] sm:$0xf]  ;;  %v4352_v26 = vor.u32 %v5832_v23, %v4351_v22  ;;  %v5820_v7 = vld [vmem:[#allocation11 + $0x74] sm:$0xf0]  ;;  %v5818_v11 = vld [vmem:[#allocation11 + $0x6c] sm:$0xf] }
 0x168   :  { %v459_v44 = vmul.f32 0.125, %v450_v33  ;;  %v461_v45 = vmul.f32 %v6720_v34, %v6720_v34  ;;  %v441_v46 = vrot.slane %v440_v35, 1  ;;  %v454_v50 = vadd.f32 %v453_v39, %v452_v28  ;;  %v5830_v28 = vld [vmem:[#allocation11 + $0xcc] sm:$0xf]  ;;  %v4481_v33 = vld [vmem:[#allocation11 + $0x1d8] sm:$0xf0] }
 0x169   :  { %971 = vmatpush.bf16.msra.mxu0 %v4496_v14  ;;  %984 = vmatpush.bf16.msra.mxu1 %v4372_v18  ;;  %v4480_v30 = vor.u32 %v5864_v27, %v4479_v24  ;;  %v4356_v31 = vor.u32 %v5830_v28, %v4353_v29  ;;  %v4484_v38 = vor.u32 %v5862_v32, %v4481_v33  ;;  %v5828_v39 = vld [vmem:[#allocation11 + $0xb4] sm:$0xf0]  ;;  %v4463_v40 = vld [vmem:[#allocation11 + $0x1a8] sm:$0xf]  ;;  %v4305_v16 = vld [vmem:[#allocation11 + $0x78] sm:$0xf0] }
 0x16a   :  { %v463_v55 = vsub.f32 %v459_v44, %v461_v45  ;;  %v442_v56 = vadd.f32 %v441_v46, %v440_v35  ;;  %v455_v61 = vrot.slane %v454_v50, 1  ;;  %997 = vmatpush.bf16.msra.mxu2 %v4500_v21  ;;  %v4335_v35 = vld [vmem:[#allocation11 + $0xa8] sm:$0xf]  ;;  %v4337_v44 = vld [vmem:[#allocation11 + $0xb8] sm:$0xf0]  ;;  %v4464_v46 = vor.u32 %v5860_v42, %v4463_v40 }
 0x16b   :  { %959 = vmatpush.bf16.msrb.mxu3 %v4352_v26  ;;  %v4336_v41 = vor.u32 %v5828_v39, %v4335_v35  ;;  %v4340_v47 = vor.u32 %v5826_v43, %v4337_v44  ;;  %v4431_v9 = vld [vmem:[#allocation11 + $0x168] sm:$0xf]  ;;  %v5852_v10 = vld [vmem:[#allocation11 + $0x174] sm:$0xf0]  ;;  %v4308_v19 = vor.u32 %v5818_v11, %v4305_v16  ;;  %v4433_v20 = vld [vmem:[#allocation11 + $0x178] sm:$0xf0] }
 0x16c   :  { %v465_v3 = vmax.f32 %v463_v55, 0.0  ;;  %v6724_v4 = vmul.f32 0.125, %v442_v56  ;;  %v456_v8 = vadd.f32 %v455_v61, %v454_v50  ;;  %v5856_v56 = vld [vmem:[#allocation11 + $0x194] sm:$0xf0]  ;;  %v5854_v61 = vld [vmem:[#allocation11 + $0x18c] sm:$0xf]  ;;  %v4432_v15 = vor.u32 %v5852_v10, %v4431_v9 }
 0x16d   :  { %972 = vmatpush.bf16.msra.mxu0 %v4480_v30  ;;  %985 = vmatpush.bf16.msra.mxu1 %v4356_v31  ;;  %v4448_v60 = vor.u32 %v5856_v56, %v4447_v54  ;;  %v4287_v21 = vld [vmem:[#allocation11 + $0x48] sm:$0xf]  ;;  %v5816_v22 = vld [vmem:[#allocation11 + $0x54] sm:$0xf0]  ;;  %v490_v23 = vperm.slane %v6742_v2, 0 }
 0x16e   :  { %v6726_v12 = vadd.f32 0.8, %v465_v3  ;;  %v462_v13 = vmul.f32 %v6724_v4, %v6724_v4  ;;  %v460_v17 = vmul.f32 0.125, %v456_v8  ;;  %998 = vmatpush.bf16.msra.mxu2 %v4484_v38  ;;  %v4452_v3 = vor.u32 %v5854_v61, %v4449_v63  ;;  %v5848_v26 = vld [vmem:[#allocation11 + $0x154] sm:$0xf0] }
 0x16f   :  { %960 = vmatpush.bf16.msrb.mxu3 %v4336_v41  ;;  %v4304_v8 = vor.u32 %v5820_v7, %v4303_v6  ;;  %v4288_v28 = vor.u32 %v5816_v22, %v4287_v21  ;;  %v5814_v30 = vld [vmem:[#allocation11 + $0x4c] sm:$0xf]  ;;  %v4289_v31 = vld [vmem:[#allocation11 + $0x58] sm:$0xf0]  ;;  %v5812_v38 = vld [vmem:[#allocation11 + $0x34] sm:$0xf0] }
 0x170   :  { %6212 = vrsqrt.f32 %v6726_v12  ;;  %v464_v25 = vsub.f32 %v460_v17, %v462_v13  ;;  %v5850_v17 = vld [vmem:[#allocation11 + $0x16c] sm:$0xf]  ;;  %v4292_v33 = vor.u32 %v5814_v30, %v4289_v31  ;;  %v4417_v35 = vld [vmem:[#allocation11 + $0x158] sm:$0xf0]  ;;  %v491_v41 = vperm.slane %v6742_v2, 1 }
 0x171   :  { %973 = vmatpush.bf16.msra.mxu0 %v4464_v46  ;;  %986 = vmatpush.bf16.msra.mxu1 %v4340_v47  ;;  %v4436_v24 = vor.u32 %v5850_v17, %v4433_v20  ;;  %v5846_v32 = vld [vmem:[#allocation11 + $0x14c] sm:$0xf]  ;;  %v4399_v43 = vld [vmem:[#allocation11 + $0x128] sm:$0xf]  ;;  %v5844_v44 = vld [vmem:[#allocation11 + $0x134] sm:$0xf0]  ;;  %vm475_vm1 = vweird.f32 %v6726_v12 }
 0x172   :  { %v466_v36 = vmax.f32 %v464_v25, 0.0  ;;  %999 = vmatpush.bf16.msra.mxu2 %v4468_v51  ;;  %v4415_v25 = vld [vmem:[#allocation11 + $0x148] sm:$0xf]  ;;  %v4420_v42 = vor.u32 %v5846_v32, %v4417_v35  ;;  %v5810_v46 = vld [vmem:[#allocation11 + $0x2c] sm:$0xf]  ;;  %v4400_v53 = vor.u32 %v5844_v44, %v4399_v43 }
 0x173   :  { %961 = vmatpush.bf16.msrb.mxu3 %v4320_v59  ;;  %v4416_v29 = vor.u32 %v5848_v26, %v4415_v25  ;;  %v4273_v47 = vld [vmem:[#allocation11 + $0x38] sm:$0xf0]  ;;  %v5808_v56 = vld [vmem:[#allocation11 + $0x14] sm:$0xf0]  ;;  %v4383_v57 = vld [vmem:[#allocation11 + $0x108] sm:$0xf] }
 0x174   :  { %v6731_v45 = vadd.f32 0.8, %v466_v36  ;;  %v4271_v36 = vld [vmem:[#allocation11 + $0x28] sm:$0xf]  ;;  %v4401_v54 = vld [vmem:[#allocation11 + $0x138] sm:$0xf0] }
 0x175   :  { %974 = vmatpush.bf16.msra.mxu0 %v4448_v60  ;;  %987 = vmatpush.bf16.msra.mxu1 %v4324_v1  ;;  %v4272_v52 = vor.u32 %v5812_v38, %v4271_v36  ;;  %v5840_v58 = vld [vmem:[#allocation11 + $0x114] sm:$0xf0]  ;;  %v4404_v61 = vor.u32 %v5842_v48, %v4401_v54  ;;  %v5806_v63 = vld [vmem:[#allocation11 + $0xc] sm:$0xf]  ;;  %v4385_v2 = vld [vmem:[#allocation11 + $0x118] sm:$0xf0] }
 0x176   :  { %v6733_v50 = vpop.eup %6212  ;;  %6214 = vrsqrt.f32 %v6731_v45  ;;  %1000 = vmatpush.bf16.msra.mxu2 %v4452_v3  ;;  %vm485_vm4 = vweird.f32 %v6731_v45  ;;  %v5838_v1 = vld [vmem:[#allocation11 + $0x10c] sm:$0xf]  ;;  %v4384_v6 = vor.u32 %v5840_v58, %v4383_v57  ;;  %v430_v11 = vld [vmem:[#allocation10] sm:$0x3]  ;;  %v5993_v30 = vld [vmem:[#allocation14 + $0x3dc] sm:$0xf0] }
 0x177   :  { %v470_v55 = vmul.f32 %v6733_v50, %v6726_v12  ;;  %962 = vmatpush.bf16.msrb.mxu3 %v4304_v8  ;;  %vm476_vm0 = vweird.f32 %v6733_v50  ;;  %v4276_v12 = vor.u32 %v5810_v46, %v4273_v47  ;;  %v5239_v31 = vld [vmem:[#allocation14 + $0x5c0] sm:$0xf] }
 0x178   :  { %vm6756_vm2 = vmor %vm475_vm1, %vm476_vm0  ;;  %v6057_v32 = vld [vmem:[#allocation14 + $0x5dc] sm:$0xf0] }
 0x179   :  { %v471_v0 = vmul.f32 %v6733_v50, %v470_v55  ;;  %975 = vmatpush.bf16.msra.mxu0 %v4432_v15  ;;  %988 = vmatpush.bf16.msra.mxu1 %v4308_v19  ;;  %v4255_v55 = vld [vmem:[#allocation11 + $0x8] sm:$0xf]  ;;  %v5240_v35 = vor.u32 %v6057_v32, %v5239_v31  ;;  %v5495_v36 = vld [vmem:[#allocation14 + $0x7c0] sm:$0xf] }
 0x17a   :  { %1001 = vmatpush.bf16.msra.mxu2 %v4436_v24  ;;  %v6121_v38 = vld [vmem:[#allocation14 + $0x7dc] sm:$0xf0] }
 0x17b   :  { %v472_v5 = vmul.f32 0.5, %v471_v0  ;;  %963 = vmatpush.bf16.msrb.mxu3 %v4288_v28  ;;  %v4257_v0 = vld [vmem:[#allocation11 + $0x18] sm:$0xf0]  ;;  %v4983_v28 = vld [vmem:[#allocation14 + $0x3c0] sm:$0xf] }
 0x17c   :  { %v6744_v13 = vpop.eup %6214  ;;  %v4260_v8 = vor.u32 %v5806_v63, %v4257_v0  ;;  %v4951_v43 = vld [vmem:[#allocation14 + $0x380] sm:$0xf] }
 0x17d   :  { %v473_v14 = vsub.f32 1.5, %v472_v5  ;;  %v480_v18 = vmul.f32 %v6744_v13, %v6731_v45  ;;  %vm486_vm3 = vweird.f32 %v6744_v13  ;;  %976 = vmatpush.bf16.msra.mxu0 %v4416_v29  ;;  %989 = vmatpush.bf16.msra.mxu1 %v4292_v33  ;;  %v4256_v5 = vor.u32 %v5808_v56, %v4255_v55  ;;  %v5985_v47 = vld [vmem:[#allocation14 + $0x39c] sm:$0xf0] }
 0x17e   :  { %1002 = vmatpush.bf16.msra.mxu2 %v4420_v42  ;;  %vm487_vm5 = vmor %vm485_vm4, %vm486_vm3  ;;  %v4388_v45 = vor.u32 %v5838_v1, %v4385_v2  ;;  %v4984_v33 = vor.u32 %v5993_v30, %v4983_v28  ;;  %v5921_v42 = vld [vmem:[#allocation14 + $0x19c] sm:$0xf0]  ;;  %vm1153_vm3 = vcmask 1042434   ;;  %vm1155_vm4 = vcmask 1041408  }
 0x17f   :  { %v481_v27 = vmul.f32 %v6744_v13, %v480_v18  ;;  %v474_v39 = vmul.f32 %v6733_v50, %v473_v14  ;;  %964 = vmatpush.bf16.msrb.mxu3 %v4272_v52  ;;  %v5207_v48 = vld [vmem:[#allocation14 + $0x580] sm:$0xf] }
 0x180   :  { %v6049_v49 = vld [vmem:[#allocation14 + $0x59c] sm:$0xf0] }
 0x181   :  { %v482_v40 = vmul.f32 0.5, %v481_v27  ;;  %v478_v59 = vsel %vm6756_vm2, %v6733_v50, %v474_v39  ;;  %977 = vmatpush.bf16.msra.mxu0 %v4400_v53  ;;  %990 = vmatpush.bf16.msra.mxu1 %v4276_v12  ;;  %v5496_v39 = vor.u32 %v6121_v38, %v5495_v36  ;;  %v5208_v52 = vor.u32 %v6049_v49, %v5207_v48  ;;  %v5463_v53 = vld [vmem:[#allocation14 + $0x780] sm:$0xf] }
 0x182   :  { %v494_v50 = vmul.f32 %v490_v23, %v478_v59  ;;  %1003 = vmatpush.bf16.msra.mxu2 %v4404_v61  ;;  %v6113_v54 = vld [vmem:[#allocation14 + $0x79c] sm:$0xf0] }
 0x183   :  { %v483_v51 = vsub.f32 1.5, %v482_v40  ;;  %965 = vmatpush.bf16.msrb.mxu3 %v4256_v5  ;;  %v5464_v55 = vor.u32 %v6113_v54, %v5463_v53  ;;  %v4663_v12 = vld [vmem:[#allocation14 + $0x140] sm:$0xf] }
 0x184   :  { %v496_v10 = vmul.f32 %v494_v50, %v6720_v34  ;;  %v5913_v56 = vld [vmem:[#allocation14 + $0x15c] sm:$0xf0] }
 0x185   :  { %v484_v60 = vmul.f32 %v6744_v13, %v483_v51  ;;  %978 = vmatpush.bf16.msra.mxu0 %v4384_v6  ;;  %991 = vmatpush.bf16.msra.mxu1 %v4260_v8  ;;  %v4952_v51 = vor.u32 %v5985_v47, %v4951_v43  ;;  %v4919_v57 = vld [vmem:[#allocation14 + $0x340] sm:$0xf]  ;;  %v4664_v58 = vor.u32 %v5913_v56, %v4663_v12 }
 0x186   :  { %1004 = vmatpush.bf16.msra.mxu2 %v4388_v45  ;;  %v5977_v59 = vld [vmem:[#allocation14 + $0x35c] sm:$0xf0] }
 0x187   :  { %v488_v3 = vsel %vm487_vm5, %v6744_v13, %v484_v60  ;;  %v505_v13 = vperm.slane %v494_v50, 0  ;;  %v5175_v60 = vld [vmem:[#allocation14 + $0x540] sm:$0xf]  ;;  %v4920_v0 = vor.u32 %v5977_v59, %v4919_v57 }
 0x188   :  { %v495_v7 = vmul.f32 %v491_v41, %v488_v3  ;;  %v4695_v41 = vld [vmem:[#allocation14 + $0x180] sm:$0xf] }
 0x189   :  { %v507_v18 = vmul.f32 %v505_v13, %v6708_v37  ;;  %v4727_v37 = vld [vmem:[#allocation14 + $0x1c0] sm:$0xf]  ;;  %v4696_v46 = vor.u32 %v5921_v42, %v4695_v41 }
 0x18a   :  { %v497_v9 = vmul.f32 %v495_v7, %v6724_v4  ;;  %v506_v15 = vperm.slane %v495_v7, 0  ;;  %v6041_v61 = vld [vmem:[#allocation14 + $0x55c] sm:$0xf0] }
 0x18b   :  { %v5176_v1 = vor.u32 %v6041_v61, %v5175_v60  ;;  %v5431_v2 = vld [vmem:[#allocation14 + $0x740] sm:$0xf] }
 0x18c   :  { %v500_v14 = vrot.slane %v497_v9, 7  ;;  %v508_v19 = vmul.f32 %v506_v15, %v6714_v62  ;;  %v5929_v62 = vld [vmem:[#allocation14 + $0x1dc] sm:$0xf0] }
 0x18d   :  { %v4728_v29 = vor.u32 %v5929_v62, %v4727_v37  ;;  %v6105_v3 = vld [vmem:[#allocation14 + $0x75c] sm:$0xf0] }
 0x18e   :  { %v502_v16 = vsel %vm501_vm6, %v496_v10, %v500_v14  ;;  %v5432_v50 = vor.u32 %v6105_v3, %v5431_v2  ;;  %v4631_v45 = vld [vmem:[#allocation14 + $0x100] sm:$0xf] }
 0x18f   :  { %v504_v17 = vsub.f32 %v430_v11, %v502_v16  ;;  %v5905_v9 = vld [vmem:[#allocation14 + $0x11c] sm:$0xf0] }
 0x190   :  { %v4887_v10 = vld [vmem:[#allocation14 + $0x300] sm:$0xf]  ;;  %v4632_v15 = vor.u32 %v5905_v9, %v4631_v45 }
 0x191   :  { %v511_v20 = vperm.slane %v504_v17, 1  ;;  %v510_v4 = vperm.slane %v504_v17, 0  ;;  %v5969_v16 = vld [vmem:[#allocation14 + $0x31c] sm:$0xf0] }
 0x192   :  { %v5143_v17 = vld [vmem:[#allocation14 + $0x500] sm:$0xf] }
 0x193   :  { %v515_v21 = vadd.f32 %v511_v20, %v508_v19  ;;  %v514_v22 = vadd.f32 %v510_v4, %v507_v18  ;;  %v4888_v20 = vor.u32 %v5969_v16, %v4887_v10  ;;  %v6033_v4 = vld [vmem:[#allocation14 + $0x51c] sm:$0xf0] }
 0x194   :  { %v4599_v37 = vld [vmem:[#allocation14 + $0xc0] sm:$0xf] }
 0x195   :  { %v517_v23 = vmul.f32 0.2, %v515_v21  ;;  %v516_v24 = vmul.f32 0.2, %v514_v22  ;;  %v5897_v62 = vld [vmem:[#allocation14 + $0xdc] sm:$0xf0] }
 0x196   :  { %v4600_v30 = vor.u32 %v5897_v62, %v4599_v37  ;;  %v4855_v31 = vld [vmem:[#allocation14 + $0x2c0] sm:$0xf] }
 0x197   :  { %v518_v34 = vmax.f32 %v514_v22, %v516_v24  ;;  %v519_v25 = vmax.f32 %v515_v21, %v517_v23  ;;  %v5399_v21 = vld [vmem:[#allocation14 + $0x700] sm:$0xf]  ;;  %v5144_v24 = vor.u32 %v6033_v4, %v5143_v17 }
 0x198   :  { %v5961_v32 = vld [vmem:[#allocation14 + $0x2dc] sm:$0xf0] }
 0x199   :  { %v520_v26 = vpack.c.bf16 %v518_v34, %v518_v34  ;;  %v521_v27 = vpack.c.bf16 %v519_v25, %v519_v25  ;;  %v6097_v34 = vld [vmem:[#allocation14 + $0x71c] sm:$0xf0]  ;;  %v4856_v38 = vor.u32 %v5961_v32, %v4855_v31 }
 0x19a   :  { %v6089_v47 = vld [vmem:[#allocation14 + $0x6dc] sm:$0xf0] }
 0x19b   :  { %914 = vmatmul.bf16.vlgmr.msra.gmra.mxu3 %v520_v26  ;;  %927 = vmatmul.bf16.vlgmr.msrb.gmra.mxu0 %v521_v27  ;;  %v5889_v56 = vld [vmem:[#allocation14 + $0x9c] sm:$0xf0] }
 0x19c   :  { %940 = vmatmul.bf16.vlgmr.msrb.gmra.mxu1 %v520_v26  ;;  %953 = vmatmul.bf16.vlgmr.msrb.gmra.mxu2 %v521_v27  ;;  %v4823_v57 = vld [vmem:[#allocation14 + $0x280] sm:$0xf] }
 0x19d   :  { %2728 = vmatpush.bf16.msra.mxu3 %v4728_v29  ;;  %2741 = vmatpush.bf16.msrb.mxu0 %v4984_v33  ;;  %v5953_v61 = vld [vmem:[#allocation14 + $0x29c] sm:$0xf0] }
 0x19e   :  { %2754 = vmatpush.bf16.msrb.mxu1 %v5240_v35  ;;  %2767 = vmatpush.bf16.msrb.mxu2 %v5496_v39  ;;  %v5111_v39 = vld [vmem:[#allocation14 + $0x4c0] sm:$0xf]  ;;  %v4824_v2 = vor.u32 %v5953_v61, %v4823_v57 }
 0x19f   :  { %v6017_v3 = vld [vmem:[#allocation14 + $0x49c] sm:$0xf0] }
 0x1a0   :  { %v6081_v9 = vld [vmem:[#allocation14 + $0x69c] sm:$0xf0] }
 0x1a1   :  { %2729 = vmatpush.bf16.msra.mxu3 %v4696_v46  ;;  %2742 = vmatpush.bf16.msrb.mxu0 %v4952_v51  ;;  %v5367_v46 = vld [vmem:[#allocation14 + $0x6c0] sm:$0xf] }
 0x1a2   :  { %2755 = vmatpush.bf16.msrb.mxu1 %v5208_v52  ;;  %2768 = vmatpush.bf16.msrb.mxu2 %v5464_v55  ;;  %v4567_v52 = vld [vmem:[#allocation14 + $0x80] sm:$0xf]  ;;  %v5368_v12 = vor.u32 %v6089_v47, %v5367_v46 }
 0x1a3   :  { %v4568_v60 = vor.u32 %v5889_v56, %v4567_v52  ;;  %v4535_v10 = vld [vmem:[#allocation14 + $0x40] sm:$0xf] }
 0x1a4   :  { %v4791_v16 = vld [vmem:[#allocation14 + $0x240] sm:$0xf] }
 0x1a5   :  { %2730 = vmatpush.bf16.msra.mxu3 %v4664_v58  ;;  %2743 = vmatpush.bf16.msrb.mxu0 %v4920_v0  ;;  %v5945_v4 = vld [vmem:[#allocation14 + $0x25c] sm:$0xf0] }
 0x1a6   :  { %2756 = vmatpush.bf16.msrb.mxu1 %v5176_v1  ;;  %2769 = vmatpush.bf16.msrb.mxu2 %v5432_v50  ;;  %v6073_v31 = vld [vmem:[#allocation14 + $0x65c] sm:$0xf0] }
 0x1a7   :  { %v4503_v32 = vld [vmem:[#allocation14] sm:$0xf] }
 0x1a8   :  { %v5937_v47 = vld [vmem:[#allocation14 + $0x21c] sm:$0xf0] }
 0x1a9   :  { %2731 = vmatpush.bf16.msra.mxu3 %v4632_v15  ;;  %2744 = vmatpush.bf16.msrb.mxu0 %v4888_v20  ;;  %v5881_v15 = vld [vmem:[#allocation14 + $0x5c] sm:$0xf0] }
 0x1aa   :  { %2757 = vmatpush.bf16.msrb.mxu1 %v5144_v24  ;;  %v4536_v20 = vor.u32 %v5881_v15, %v4535_v10  ;;  %v4985_v15 = vld [vmem:[#allocation14 + $0x3e0] sm:$0xf0] }
 0x1ab   :  { %966 = vmatmul.bf16.vlgmr.msrb.gmra.mxu3 %v520_v26  ;;  %979 = vmatmul.bf16.vlgmr.msra.gmra.mxu0 %v521_v27 }
 0x1ac   :  { %992 = vmatmul.bf16.vlgmr.msra.gmra.mxu1 %v520_v26  ;;  %1005 = vmatmul.bf16.vlgmr.msra.gmra.mxu2 %v521_v27  ;;  %v5400_v27 = vor.u32 %v6097_v34, %v5399_v21  ;;  %v5047_v21 = vld [vmem:[#allocation14 + $0x440] sm:$0xf] }
 0x1ad   :  { %2732 = vmatpush.bf16.msra.mxu3 %v4600_v30  ;;  %2745 = vmatpush.bf16.msrb.mxu0 %v4856_v38 }
 0x1ae   :  { %2770 = vmatpush.bf16.msrb.mxu2 %v5400_v27  ;;  %v5303_v27 = vld [vmem:[#allocation14 + $0x640] sm:$0xf] }
 0x1b1   :  { %2733 = vmatpush.bf16.msra.mxu3 %v4568_v60  ;;  %2746 = vmatpush.bf16.msrb.mxu0 %v4824_v2  ;;  %v5925_v60 = vld [vmem:[#allocation14 + $0x1c4] sm:$0xf] }
 0x1b2   :  { %2771 = vmatpush.bf16.msrb.mxu2 %v5368_v12  ;;  %v4729_v2 = vld [vmem:[#allocation14 + $0x1e0] sm:$0xf0] }
 0x1b5   :  { %2734 = vmatpush.bf16.msra.mxu3 %v4536_v20  ;;  %v6117_v20 = vld [vmem:[#allocation14 + $0x7c4] sm:$0xf] }
 0x218   :  { %v928_v40 = vpop.f32.mrf.mxu0 }
 0x219   :  { %v941_v44 = vpop.f32.mrf.mxu1 }
 0x21e   :  { %v915_v63 = vpop.f32.mrf.mxu3 }
 0x21f   :  { %v6774_v5 = vadd.f32 %v928_v40, %v915_v63  ;;  %v954_v6 = vpop.f32.mrf.mxu2  ;;  %v6025_v40 = vld [vmem:[#allocation14 + $0x4dc] sm:$0xf0] }
 0x220   :  { %v6776_v7 = vadd.f32 %v954_v6, %v941_v44  ;;  %v930_v8 = vpop.f32.mrf.mxu0  ;;  %v5112_v44 = vor.u32 %v6025_v40, %v5111_v39  ;;  %v5079_v63 = vld [vmem:[#allocation14 + $0x480] sm:$0xf]  ;;  %v5304_v39 = vor.u32 %v6073_v31, %v5303_v27 }
 0x221   :  { %v1012_v11 = vrot.slane %v6774_v5, 4  ;;  %v1036_v14 = vmul.f32 %v6774_v5, %v6774_v5  ;;  %v943_v13 = vpop.f32.mrf.mxu1  ;;  %v5335_v6 = vld [vmem:[#allocation14 + $0x680] sm:$0xf]  ;;  %v5080_v45 = vor.u32 %v6017_v3, %v5079_v63 }
 0x222   :  { %v1018_v18 = vrot.slane %v6776_v7, 4  ;;  %v1037_v19 = vmul.f32 %v6776_v7, %v6776_v7  ;;  %2758 = vmatpush.bf16.msrb.mxu1 %v5112_v44  ;;  %v5336_v13 = vor.u32 %v6081_v9, %v5335_v6  ;;  %v5873_v40 = vld [vmem:[#allocation14 + $0x1c] sm:$0xf0]  ;;  %v5989_v9 = vld [vmem:[#allocation14 + $0x3c4] sm:$0xf] }
 0x223   :  { %v1013_v22 = vadd.f32 %v1012_v11, %v6774_v5  ;;  %v1040_v23 = vrot.slane %v1036_v14, 4  ;;  %v4504_v46 = vor.u32 %v5873_v40, %v4503_v32  ;;  %v5209_v40 = vld [vmem:[#allocation14 + $0x5a0] sm:$0xf0] }
 0x224   :  { %v1019_v25 = vadd.f32 %v1018_v18, %v6776_v7  ;;  %v1046_v26 = vrot.slane %v1037_v19, 4  ;;  %2772 = vmatpush.bf16.msrb.mxu2 %v5336_v13 }
 0x225   :  { %v1014_v28 = vrot.slane %v1013_v22, 2  ;;  %v1041_v29 = vadd.f32 %v1040_v23, %v1036_v14  ;;  %2735 = vmatpush.bf16.msra.mxu3 %v4504_v46 }
 0x226   :  { %v1020_v33 = vrot.slane %v1019_v25, 2  ;;  %v1047_v35 = vadd.f32 %v1046_v26, %v1037_v19  ;;  %v917_v36 = vpop.f32.mrf.mxu3  ;;  %2759 = vmatpush.bf16.msrb.mxu1 %v5080_v45  ;;  %v6009_v26 = vld [vmem:[#allocation14 + $0x45c] sm:$0xf0]  ;;  %v4732_v45 = vor.u32 %v5925_v60, %v4729_v2 }
 0x227   :  { %v1015_v41 = vadd.f32 %v1014_v28, %v1013_v22  ;;  %v1042_v42 = vrot.slane %v1041_v29, 2  ;;  %v956_v43 = vpop.f32.mrf.mxu2  ;;  %v5048_v30 = vor.u32 %v6009_v26, %v5047_v21 }
 0x228   :  { %v1021_v48 = vadd.f32 %v1020_v33, %v1019_v25  ;;  %v1048_v49 = vrot.slane %v1047_v35, 2  ;;  %v980_v51 = vpop.f32.mrf.mxu0  ;;  %v4792_v25 = vor.u32 %v5945_v4, %v4791_v16  ;;  %2773 = vmatpush.bf16.msrb.mxu2 %v5304_v39  ;;  %v6053_v16 = vld [vmem:[#allocation14 + $0x5c4] sm:$0xf] }
 0x229   :  { %v1016_v53 = vrot.slane %v1015_v41, 1  ;;  %v1043_v54 = vadd.f32 %v1042_v42, %v1041_v29  ;;  %v993_v55 = vpop.f32.mrf.mxu1  ;;  %2780 = vmatpush.bf16.msrb.mxu3 %v4732_v45  ;;  %v5433_v45 = vld [vmem:[#allocation14 + $0x760] sm:$0xf0] }
 0x22a   :  { %v1022_v58 = vrot.slane %v1021_v48, 1  ;;  %v1049_v59 = vadd.f32 %v1048_v49, %v1047_v35  ;;  %2747 = vmatpush.bf16.msrb.mxu0 %v4792_v25  ;;  %2760 = vmatpush.bf16.msrb.mxu1 %v5048_v30  ;;  %v5917_v25 = vld [vmem:[#allocation14 + $0x184] sm:$0xf] }
 0x22b   :  { %v1017_v0 = vadd.f32 %v1016_v53, %v1015_v41  ;;  %v1044_v1 = vrot.slane %v1043_v54, 1  ;;  %v4759_v41 = vld [vmem:[#allocation14 + $0x200] sm:$0xf] }
 0x22c   :  { %v1023_v50 = vadd.f32 %v1022_v58, %v1021_v48  ;;  %v1050_v8 = vrot.slane %v1049_v59, 1  ;;  %v5015_v48 = vld [vmem:[#allocation14 + $0x400] sm:$0xf]  ;;  %v4760_v53 = vor.u32 %v5937_v47, %v4759_v41  ;;  %v6109_v41 = vld [vmem:[#allocation14 + $0x784] sm:$0xf] }
 0x22d   :  { %v1045_v11 = vadd.f32 %v1044_v1, %v1043_v54  ;;  %v6786_v14 = vmul.f32 0.125, %v1017_v0  ;;  %v6001_v54 = vld [vmem:[#allocation14 + $0x41c] sm:$0xf0] }
 0x22e   :  { %v1051_v17 = vadd.f32 %v1050_v8, %v1049_v59  ;;  %v6788_v18 = vmul.f32 0.125, %v1023_v50  ;;  %v967_v19 = vpop.f32.mrf.mxu3  ;;  %v5016_v58 = vor.u32 %v6001_v54, %v5015_v48  ;;  %v6065_v59 = vld [vmem:[#allocation14 + $0x61c] sm:$0xf0]  ;;  %2748 = vmatpush.bf16.msrb.mxu0 %v4760_v53  ;;  %v4665_v54 = vld [vmem:[#allocation14 + $0x160] sm:$0xf0] }
 0x22f   :  { %v1068_v22 = vmul.f32 0.125, %v1045_v11  ;;  %v1072_v23 = vmul.f32 %v6786_v14, %v6786_v14  ;;  %v6792_v24 = vadd.f32 %v980_v51, %v967_v19  ;;  %v1006_v34 = vpop.f32.mrf.mxu2  ;;  %v5241_v19 = vld [vmem:[#allocation14 + $0x5e0] sm:$0xf0] }
 0x230   :  { %v1069_v37 = vmul.f32 0.125, %v1051_v17  ;;  %v1073_v62 = vmul.f32 %v6788_v18, %v6788_v18  ;;  %v6796_v28 = vadd.f32 %v1006_v34, %v993_v55  ;;  %v982_v29 = vpop.f32.mrf.mxu0  ;;  %v5271_v55 = vld [vmem:[#allocation14 + $0x600] sm:$0xf]  ;;  %2761 = vmatpush.bf16.msrb.mxu1 %v5016_v58  ;;  %v5497_v34 = vld [vmem:[#allocation14 + $0x7e0] sm:$0xf0]  ;;  %v5244_v27 = vor.u32 %v6053_v16, %v5241_v19 }
 0x231   :  { %v1076_v33 = vsub.f32 %v1068_v22, %v1072_v23  ;;  %v1024_v35 = vrot.slane %v6792_v24, 4  ;;  %v1038_v36 = vmul.f32 %v6792_v24, %v6792_v24  ;;  %v995_v38 = vpop.f32.mrf.mxu1  ;;  %v5272_v1 = vor.u32 %v6065_v59, %v5271_v55  ;;  %v5981_v29 = vld [vmem:[#allocation14 + $0x384] sm:$0xf] }
 0x232   :  { %v1077_v42 = vsub.f32 %v1069_v37, %v1073_v62  ;;  %v1030_v43 = vrot.slane %v6796_v28, 4  ;;  %v1039_v44 = vmul.f32 %v6796_v28, %v6796_v28  ;;  %v4988_v23 = vor.u32 %v5989_v9, %v4985_v15  ;;  %v4697_v62 = vld [vmem:[#allocation14 + $0x1a0] sm:$0xf0] }
 0x233   :  { %v1080_v49 = vmax.f32 %v1076_v33, 0.0  ;;  %v1025_v51 = vadd.f32 %v1024_v35, %v6792_v24  ;;  %v1052_v52 = vrot.slane %v1038_v36, 4  ;;  %2774 = vmatpush.bf16.msrb.mxu2 %v5272_v1  ;;  %v5500_v37 = vor.u32 %v6117_v20, %v5497_v34  ;;  %v4953_v35 = vld [vmem:[#allocation14 + $0x3a0] sm:$0xf0] }
 0x234   :  { %v1081_v12 = vmax.f32 %v1077_v42, 0.0  ;;  %v1031_v56 = vadd.f32 %v1030_v43, %v6796_v28  ;;  %v1058_v57 = vrot.slane %v1039_v44, 4  ;;  %2793 = vmatpush.bf16.msra.mxu0 %v4988_v23  ;;  %v4700_v33 = vor.u32 %v5917_v25, %v4697_v62  ;;  %2806 = vmatpush.bf16.msra.mxu1 %v5244_v27  ;;  %v5465_v42 = vld [vmem:[#allocation14 + $0x7a0] sm:$0xf0] }
 0x235   :  { %v6806_v61 = vadd.f32 0.8, %v1080_v49  ;;  %v1026_v63 = vrot.slane %v1025_v51, 2  ;;  %v1053_v0 = vadd.f32 %v1052_v52, %v1038_v36  ;;  %v6045_v36 = vld [vmem:[#allocation14 + $0x584] sm:$0xf]  ;;  %v4956_v39 = vor.u32 %v5981_v29, %v4953_v35 }
 0x236   :  { %v6808_v3 = vadd.f32 0.8, %v1081_v12  ;;  %v1032_v6 = vrot.slane %v1031_v56, 2  ;;  %v1059_v50 = vadd.f32 %v1058_v57, %v1039_v44  ;;  %v969_v8 = vpop.f32.mrf.mxu3  ;;  %2781 = vmatpush.bf16.msrb.mxu3 %v4700_v33  ;;  %v5212_v48 = vor.u32 %v6045_v36, %v5209_v40  ;;  %v5909_v49 = vld [vmem:[#allocation14 + $0x144] sm:$0xf] }
 0x237   :  { %6216 = vrsqrt.f32 %v6806_v61  ;;  %v1027_v10 = vadd.f32 %v1026_v63, %v1025_v51  ;;  %v1054_v11 = vrot.slane %v1053_v0, 2  ;;  %v1008_v13 = vpop.f32.mrf.mxu2  ;;  %2819 = vmatpush.bf16.msra.mxu2 %v5500_v37  ;;  %v5468_v53 = vor.u32 %v6109_v41, %v5465_v42  ;;  %v5973_v55 = vld [vmem:[#allocation14 + $0x344] sm:$0xf] }
 0x238   :  { %6218 = vrsqrt.f32 %v6808_v3  ;;  %v1033_v17 = vadd.f32 %v1032_v6, %v1031_v56  ;;  %v1060_v22 = vrot.slane %v1059_v50, 2  ;;  %2794 = vmatpush.bf16.msra.mxu0 %v4956_v39  ;;  %v4921_v58 = vld [vmem:[#allocation14 + $0x360] sm:$0xf0]  ;;  %2807 = vmatpush.bf16.msra.mxu1 %v5212_v48  ;;  %vm1104_vm8 = vweird.f32 %v6808_v3 }
 0x239   :  { %v1028_v4 = vrot.slane %v1027_v10, 1  ;;  %v1055_v21 = vadd.f32 %v1054_v11, %v1053_v0  ;;  %v6037_v59 = vld [vmem:[#allocation14 + $0x544] sm:$0xf]  ;;  %v4924_v8 = vor.u32 %v5973_v55, %v4921_v58  ;;  %vm1094_vm13 = vweird.f32 %v6806_v61 }
 0x23a   :  { %v1034_v26 = vrot.slane %v1033_v17, 1  ;;  %v1061_v32 = vadd.f32 %v1060_v22, %v1059_v50  ;;  %v5177_v0 = vld [vmem:[#allocation14 + $0x560] sm:$0xf0]  ;;  %v4668_v50 = vor.u32 %v5909_v49, %v4665_v54 }
 0x23b   :  { %v1029_v30 = vadd.f32 %v1028_v4, %v1027_v10  ;;  %v1056_v31 = vrot.slane %v1055_v21, 1  ;;  %2820 = vmatpush.bf16.msra.mxu2 %v5468_v53  ;;  %v6101_v1 = vld [vmem:[#allocation14 + $0x744] sm:$0xf]  ;;  %v5180_v15 = vor.u32 %v6037_v59, %v5177_v0 }
 0x23c   :  { %v1035_v38 = vadd.f32 %v1034_v26, %v1033_v17  ;;  %v1062_v47 = vrot.slane %v1061_v32, 1  ;;  %v5901_v9 = vld [vmem:[#allocation14 + $0x104] sm:$0xf]  ;;  %2782 = vmatpush.bf16.msrb.mxu3 %v4668_v50  ;;  %2795 = vmatpush.bf16.msra.mxu0 %v4924_v8  ;;  %v5436_v20 = vor.u32 %v6101_v1, %v5433_v45 }
 0x23d   :  { %v6812_v43 = vpop.eup %6216  ;;  %v1057_v44 = vadd.f32 %v1056_v31, %v1055_v21  ;;  %v6814_v46 = vmul.f32 0.125, %v1029_v30  ;;  %v4633_v10 = vld [vmem:[#allocation14 + $0x120] sm:$0xf0]  ;;  %2808 = vmatpush.bf16.msra.mxu1 %v5180_v15 }
 0x23e   :  { %v6816_v51 = vpop.eup %6218  ;;  %v6818_v52 = vmul.f32 0.125, %v1035_v38  ;;  %v1063_v60 = vadd.f32 %v1062_v47, %v1061_v32  ;;  %v1089_v11 = vmul.f32 %v6812_v43, %v6806_v61  ;;  %v5965_v16 = vld [vmem:[#allocation14 + $0x304] sm:$0xf]  ;;  %v4636_v4 = vor.u32 %v5901_v9, %v4633_v10 }
 0x23f   :  { %v1099_v12 = vmul.f32 %v6816_v51, %v6808_v3  ;;  %v1070_v56 = vmul.f32 0.125, %v1057_v44  ;;  %v1074_v57 = vmul.f32 %v6814_v46, %v6814_v46  ;;  %v4889_v21 = vld [vmem:[#allocation14 + $0x320] sm:$0xf0]  ;;  %2821 = vmatpush.bf16.msra.mxu2 %v5436_v20  ;;  %vm1105_vm7 = vweird.f32 %v6816_v51 }
 0x240   :  { %v1075_v63 = vmul.f32 %v6818_v52, %v6818_v52  ;;  %v1071_v13 = vmul.f32 0.125, %v1063_v60  ;;  %v6029_v22 = vld [vmem:[#allocation14 + $0x504] sm:$0xf]  ;;  %v4892_v34 = vor.u32 %v5965_v16, %v4889_v21  ;;  %v1090_v35 = vmul.f32 %v6812_v43, %v1089_v11  ;;  %2783 = vmatpush.bf16.msrb.mxu3 %v4636_v4  ;;  %v6845_v11 = vld [vmem:[%s7092_s7] sm:$0xf]  ;;  %vm6853_vm9 = vmor %vm1104_vm8, %vm1105_vm7  ;;  %s6590_s7 = smov [#allocation22]  }
 0x241   :  { %v1100_v2 = vmul.f32 %v6816_v51, %v1099_v12  ;;  %v1078_v6 = vsub.f32 %v1070_v56, %v1074_v57  ;;  %v5145_v25 = vld [vmem:[#allocation14 + $0x520] sm:$0xf0]  ;;  %vm1095_vm11 = vweird.f32 %v6812_v43  ;;  %s4131_s22 = sshll.u32 %s6590_s7, 4  ;;  %s4132_s22 = int_to_ptr.vmem [resolvable:$true] %s4131_s22 }
 0x242   :  { %v1079_v23 = vsub.f32 %v1071_v13, %v1075_v63  ;;  %v6093_v26 = vld [vmem:[#allocation14 + $0x704] sm:$0xf]  ;;  %v5148_v37 = vor.u32 %v6029_v22, %v5145_v25  ;;  %2796 = vmatpush.bf16.msra.mxu0 %v4892_v34  ;;  %v1091_v58 = vmul.f32 0.5, %v1090_v35  ;;  %vm1096_vm0 = vmor %vm1094_vm13, %vm1095_vm11 }
 0x243   :  { %v6829_v17 = vmul.f32 0.5, %v1100_v2  ;;  %v1082_v19 = vmax.f32 %v1078_v6, 0.0  ;;  %v5401_v62 = vld [vmem:[#allocation14 + $0x720] sm:$0xf0] }
 0x244   :  { %v1083_v30 = vmax.f32 %v1079_v23, 0.0  ;;  %v5404_v31 = vor.u32 %v6093_v26, %v5401_v62  ;;  %v5893_v32 = vld [vmem:[#allocation14 + $0xc4] sm:$0xf]  ;;  %2809 = vmatpush.bf16.msra.mxu1 %v5148_v37 }
 0x245   :  { %v6831_v27 = vadd.f32 0.8, %v1082_v19  ;;  %v1102_v29 = vsub.f32 1.5, %v6829_v17  ;;  %v4601_v33 = vld [vmem:[#allocation14 + $0xe0] sm:$0xf0]  ;;  %v1092_v19 = vsub.f32 1.5, %v1091_v58 }
 0x246   :  { %v4604_v36 = vor.u32 %v5893_v32, %v4601_v33  ;;  %v5957_v38 = vld [vmem:[#allocation14 + $0x2c4] sm:$0xf]  ;;  %v6836_v41 = vadd.f32 0.8, %v1083_v30  ;;  %2822 = vmatpush.bf16.msra.mxu2 %v5404_v31  ;;  %v1129_v58 = vperm.slane %v6845_v11, 0 }
 0x247   :  { %6220 = vrsqrt.f32 %v6831_v27  ;;  %v4857_v39 = vld [vmem:[#allocation14 + $0x2e0] sm:$0xf0]  ;;  %v1103_v13 = vmul.f32 %v6816_v51, %v1102_v29  ;;  %vm1114_vm12 = vweird.f32 %v6831_v27 }
 0x248   :  { %v6021_v40 = vld [vmem:[#allocation14 + $0x4c4] sm:$0xf]  ;;  %v4860_v42 = vor.u32 %v5957_v38, %v4857_v39  ;;  %6222 = vrsqrt.f32 %v6836_v41  ;;  %2784 = vmatpush.bf16.msrb.mxu3 %v4604_v36  ;;  %v1130_v36 = vperm.slane %v6845_v11, 1  ;;  %vm1124_vm1 = vweird.f32 %v6836_v41 }
 0x249   :  { %v5113_v44 = vld [vmem:[#allocation14 + $0x4e0] sm:$0xf0]  ;;  %v1107_v35 = vsel %vm6853_vm9, %v6816_v51, %v1103_v13 }
 0x24a   :  { %v6085_v47 = vld [vmem:[#allocation14 + $0x6c4] sm:$0xf]  ;;  %v5116_v48 = vor.u32 %v6021_v40, %v5113_v44  ;;  %2797 = vmatpush.bf16.msra.mxu0 %v4860_v42 }
 0x24b   :  { %v5369_v49 = vld [vmem:[#allocation14 + $0x6e0] sm:$0xf0] }
 0x24c   :  { %v5885_v53 = vld [vmem:[#allocation14 + $0x84] sm:$0xf]  ;;  %v5372_v55 = vor.u32 %v6085_v47, %v5369_v49  ;;  %2810 = vmatpush.bf16.msra.mxu1 %v5116_v48  ;;  %v1131_v49 = vperm.slane %v6845_v11, 2 }
 0x24d   :  { %v4569_v54 = vld [vmem:[#allocation14 + $0xa0] sm:$0xf0]  ;;  %v6840_v50 = vpop.eup %6220 }
 0x24e   :  { %v5949_v12 = vld [vmem:[#allocation14 + $0x284] sm:$0xf]  ;;  %v4572_v59 = vor.u32 %v5885_v53, %v4569_v54  ;;  %2823 = vmatpush.bf16.msra.mxu2 %v5372_v55  ;;  %v1109_v15 = vmul.f32 %v6840_v50, %v6831_v27  ;;  %v6223_v34 = vpop.eup %6222  ;;  %vm1115_vm10 = vweird.f32 %v6840_v50  ;;  %v1093_v54 = vmul.f32 %v6812_v43, %v1092_v19 }
 0x24f   :  { %v4825_v56 = vld [vmem:[#allocation14 + $0x2a0] sm:$0xf0]  ;;  %v1119_v29 = vmul.f32 %v6223_v34, %v6836_v41  ;;  %vm1116_vm14 = vmor %vm1114_vm12, %vm1115_vm10  ;;  %vm1125_vm15 = vweird.f32 %v6223_v34 }
 0x250   :  { %v6013_v57 = vld [vmem:[#allocation14 + $0x484] sm:$0xf]  ;;  %v4828_v60 = vor.u32 %v5949_v12, %v4825_v56  ;;  %2785 = vmatpush.bf16.msrb.mxu3 %v4572_v59  ;;  %v1110_v3 = vmul.f32 %v6840_v50, %v1109_v15  ;;  %v1138_v12 = vmul.f32 %v1130_v36, %v1107_v35  ;;  %vm1126_vm2 = vmor %vm1124_vm1, %vm1125_vm15  ;;  %v1011_v15 = vld [vmem:[#allocation13] sm:$0xf] }
 0x251   :  { %v5081_v63 = vld [vmem:[#allocation14 + $0x4a0] sm:$0xf0]  ;;  %v1120_v42 = vmul.f32 %v6223_v34, %v1119_v29  ;;  %v5930_v29 = vld [vmem:[#allocation14 + $0x1e4] sm:$0xf0] }
 0x252   :  { %v6077_v0 = vld [vmem:[#allocation14 + $0x684] sm:$0xf]  ;;  %v5084_v1 = vor.u32 %v6013_v57, %v5081_v63  ;;  %2798 = vmatpush.bf16.msra.mxu0 %v4828_v60  ;;  %v1111_v38 = vmul.f32 0.5, %v1110_v3  ;;  %v1132_v60 = vperm.slane %v6845_v11, 3  ;;  %v1097_v63 = vsel %vm1096_vm0, %v6812_v43, %v1093_v54  ;;  %v5247_v35 = vld [vmem:[#allocation14 + $0x5c8] sm:$0xf] }
 0x253   :  { %v5337_v2 = vld [vmem:[#allocation14 + $0x6a0] sm:$0xf0]  ;;  %v1121_v51 = vmul.f32 0.5, %v1120_v42  ;;  %v1142_v61 = vmul.f32 %v1138_v12, %v6788_v18  ;;  %v1160_v41 = vperm.slane %v1138_v12, 0  ;;  %v4703_v54 = vld [vmem:[#allocation14 + $0x188] sm:$0xf] }
 0x254   :  { %v5877_v6 = vld [vmem:[#allocation14 + $0x44] sm:$0xf]  ;;  %v5340_v8 = vor.u32 %v6077_v0, %v5337_v2  ;;  %2811 = vmatpush.bf16.msra.mxu1 %v5084_v1  ;;  %v1112_v48 = vsub.f32 1.5, %v1111_v38  ;;  %v6058_v38 = vld [vmem:[#allocation14 + $0x5e4] sm:$0xf0] }
 0x255   :  { %v4537_v45 = vld [vmem:[#allocation14 + $0x60] sm:$0xf0]  ;;  %v1122_v57 = vsub.f32 1.5, %v1121_v51  ;;  %v5922_v51 = vld [vmem:[#allocation14 + $0x1a4] sm:$0xf0]  ;;  %v5248_v12 = vor.u32 %v6058_v38, %v5247_v35 }
 0x256   :  { %v5941_v9 = vld [vmem:[#allocation14 + $0x244] sm:$0xf]  ;;  %v4540_v4 = vor.u32 %v5877_v6, %v4537_v45  ;;  %2824 = vmatpush.bf16.msra.mxu2 %v5340_v8  ;;  %v1113_v56 = vmul.f32 %v6840_v50, %v1112_v48  ;;  %v1137_v6 = vmul.f32 %v1129_v58, %v1097_v63  ;;  %v1149_v45 = vrot.slane %v1142_v61, 7  ;;  %v5986_v58 = vld [vmem:[#allocation14 + $0x3a4] sm:$0xf0] }
 0x257   :  { %v4793_v10 = vld [vmem:[#allocation14 + $0x260] sm:$0xf0]  ;;  %v1123_v1 = vmul.f32 %v6223_v34, %v1122_v57  ;;  %v4959_v57 = vld [vmem:[#allocation14 + $0x388] sm:$0xf] }
 0x258   :  { %v6005_v16 = vld [vmem:[#allocation14 + $0x444] sm:$0xf]  ;;  %v4796_v21 = vor.u32 %v5941_v9, %v4793_v10  ;;  %2786 = vmatpush.bf16.msrb.mxu3 %v4540_v4  ;;  %v1117_v59 = vsel %vm1116_vm14, %v6840_v50, %v1113_v56  ;;  %v1141_v43 = vmul.f32 %v1137_v6, %v6786_v14  ;;  %v1159_v11 = vperm.slane %v1137_v6, 0  ;;  %v5471_v63 = vld [vmem:[#allocation14 + $0x788] sm:$0xf] }
 0x259   :  { %v5049_v17 = vld [vmem:[#allocation14 + $0x460] sm:$0xf0]  ;;  %v1139_v0 = vmul.f32 %v1131_v49, %v1117_v59  ;;  %v1127_v2 = vsel %vm1126_vm2, %v6223_v34, %v1123_v1  ;;  %v5215_v59 = vld [vmem:[#allocation14 + $0x588] sm:$0xf]  ;;  %v4704_v1 = vor.u32 %v5922_v51, %v4703_v54  ;;  %v4960_v61 = vor.u32 %v5986_v58, %v4959_v57 }
 0x25a   :  { %v6069_v22 = vld [vmem:[#allocation14 + $0x644] sm:$0xf]  ;;  %v5052_v25 = vor.u32 %v6005_v16, %v5049_v17  ;;  %2799 = vmatpush.bf16.msra.mxu0 %v4796_v21  ;;  %v1140_v8 = vmul.f32 %v1132_v60, %v1127_v2  ;;  %v1152_v16 = vsel %vm501_vm6, %v1141_v43, %v1149_v45  ;;  %v1163_v20 = vmul.f32 %v1159_v11, %v6774_v5  ;;  %v6050_v60 = vld [vmem:[#allocation14 + $0x5a4] sm:$0xf0] }
 0x25b   :  { %v5305_v23 = vld [vmem:[#allocation14 + $0x660] sm:$0xf0]  ;;  %v1143_v27 = vmul.f32 %v1139_v0, %v6814_v46  ;;  %v1161_v13 = vperm.slane %v1139_v0, 0  ;;  %v6114_v0 = vld [vmem:[#allocation14 + $0x7a4] sm:$0xf0]  ;;  %v5216_v6 = vor.u32 %v6050_v60, %v5215_v59 }
 0x25c   :  { %v5869_v26 = vld [vmem:[#allocation14 + $0x4] sm:$0xf]  ;;  %v5308_v30 = vor.u32 %v6069_v22, %v5305_v23  ;;  %2812 = vmatpush.bf16.msra.mxu1 %v5052_v25  ;;  %v1144_v9 = vmul.f32 %v1140_v8, %v6818_v52  ;;  %v1162_v18 = vperm.slane %v1140_v8, 0  ;;  %v1164_v52 = vmul.f32 %v1160_v41, %v6776_v7  ;;  %v5994_v7 = vld [vmem:[#allocation14 + $0x3e4] sm:$0xf0] }
 0x25d   :  { %v4505_v37 = vld [vmem:[#allocation14 + $0x20] sm:$0xf0]  ;;  %v1150_v50 = vrot.slane %v1143_v27, 6  ;;  %v1165_v14 = vmul.f32 %v1161_v13, %v6792_v24  ;;  %v4671_v27 = vld [vmem:[#allocation14 + $0x148] sm:$0xf]  ;;  %v5472_v8 = vor.u32 %v6114_v0, %v5471_v63 }
 0x25e   :  { %v5933_v62 = vld [vmem:[#allocation14 + $0x204] sm:$0xf]  ;;  %v4508_v44 = vor.u32 %v5869_v26, %v4505_v37  ;;  %2825 = vmatpush.bf16.msra.mxu2 %v5308_v30  ;;  %v1151_v10 = vrot.slane %v1144_v9, 5  ;;  %v1166_v4 = vmul.f32 %v1162_v18, %v6796_v28  ;;  %v4991_v30 = vld [vmem:[#allocation14 + $0x3c8] sm:$0xf] }
 0x25f   :  { %v4761_v31 = vld [vmem:[#allocation14 + $0x220] sm:$0xf0]  ;;  %v5914_v2 = vld [vmem:[#allocation14 + $0x164] sm:$0xf0] }
 0x260   :  { %v5997_v32 = vld [vmem:[#allocation14 + $0x404] sm:$0xf]  ;;  %v4764_v47 = vor.u32 %v5933_v62, %v4761_v31  ;;  %2787 = vmatpush.bf16.msrb.mxu3 %v4508_v44  ;;  %v1154_v46 = vsel %vm1153_vm3, %v1150_v50, %v1151_v10  ;;  %v4735_v62 = vld [vmem:[#allocation14 + $0x1c8] sm:$0xf]  ;;  %v4672_v41 = vor.u32 %v5914_v2, %v4671_v27 }
 0x261   :  { %v5017_v33 = vld [vmem:[#allocation14 + $0x420] sm:$0xf0]  ;;  %v1156_v17 = vsel %vm1155_vm4, %v1152_v16, %v1154_v46  ;;  %v4736_v44 = vor.u32 %v5930_v29, %v4735_v62  ;;  %v4927_v45 = vld [vmem:[#allocation14 + $0x348] sm:$0xf] }
 0x262   :  { %v6061_v39 = vld [vmem:[#allocation14 + $0x604] sm:$0xf]  ;;  %v5020_v53 = vor.u32 %v5997_v32, %v5017_v33  ;;  %2800 = vmatpush.bf16.msra.mxu0 %v4764_v47  ;;  %v1158_v19 = vsub.f32 %v1011_v15, %v1156_v17  ;;  %v5978_v50 = vld [vmem:[#allocation14 + $0x364] sm:$0xf0] }
 0x263   :  { %v5273_v40 = vld [vmem:[#allocation14 + $0x620] sm:$0xf0]  ;;  %v5183_v9 = vld [vmem:[#allocation14 + $0x548] sm:$0xf]  ;;  %v4928_v13 = vor.u32 %v5978_v50, %v4927_v45 }
 0x264   :  { %v5276_v55 = vor.u32 %v6061_v39, %v5273_v40  ;;  %2813 = vmatpush.bf16.msra.mxu1 %v5020_v53  ;;  %v1168_v21 = vperm.slane %v1158_v19, 0  ;;  %v1169_v22 = vperm.slane %v1158_v19, 1  ;;  %v1170_v23 = vperm.slane %v1158_v19, 2  ;;  %v5503_v39 = vld [vmem:[#allocation14 + $0x7c8] sm:$0xf] }
 0x265   :  { %v1171_v34 = vperm.slane %v1158_v19, 3  ;;  %v6122_v40 = vld [vmem:[#allocation14 + $0x7e4] sm:$0xf0]  ;;  %v4992_v53 = vor.u32 %v5994_v7, %v4991_v30 }
 0x266   :  { %2826 = vmatpush.bf16.msra.mxu2 %v5276_v55  ;;  %v1176_v3 = vadd.f32 %v1168_v21, %v1163_v20  ;;  %v1177_v25 = vadd.f32 %v1169_v22, %v1164_v52  ;;  %v1178_v26 = vadd.f32 %v1170_v23, %v1165_v14  ;;  %v5504_v56 = vor.u32 %v6122_v40, %v5503_v39  ;;  %v6042_v43 = vld [vmem:[#allocation14 + $0x564] sm:$0xf0] }
 0x267   :  { %v1179_v37 = vadd.f32 %v1171_v34, %v1166_v4  ;;  %v5439_v10 = vld [vmem:[#allocation14 + $0x748] sm:$0xf]  ;;  %v5184_v16 = vor.u32 %v6042_v43, %v5183_v9 }
 0x268   :  { %v1180_v31 = vmul.f32 0.2, %v1176_v3  ;;  %v1181_v32 = vmul.f32 0.2, %v1177_v25  ;;  %v1182_v5 = vmul.f32 0.2, %v1178_v26 }
 0x269   :  { %v1183_v33 = vmul.f32 0.2, %v1179_v37  ;;  %v6106_v11 = vld [vmem:[#allocation14 + $0x764] sm:$0xf0] }
 0x26a   :  { %v1184_v24 = vmax.f32 %v1176_v3, %v1180_v31  ;;  %v1185_v36 = vmax.f32 %v1177_v25, %v1181_v32  ;;  %v1186_v28 = vmax.f32 %v1178_v26, %v1182_v5  ;;  %v4639_v15 = vld [vmem:[#allocation14 + $0x108] sm:$0xf]  ;;  %v5440_v46 = vor.u32 %v6106_v11, %v5439_v10 }
 0x26b   :  { %v1187_v42 = vmax.f32 %v1179_v37, %v1183_v33  ;;  %v5906_v18 = vld [vmem:[#allocation14 + $0x124] sm:$0xf0] }
 0x26c   :  { %v6886_v47 = vpack.c.bf16 %v1184_v24, %v1184_v24  ;;  %v6888_v48 = vpack.c.bf16 %v1185_v36, %v1185_v36  ;;  %v6890_v49 = vpack.c.bf16 %v1186_v28, %v1186_v28  ;;  %v4895_v17 = vld [vmem:[#allocation14 + $0x308] sm:$0xf]  ;;  %v4640_v21 = vor.u32 %v5906_v18, %v4639_v15  ;;  %v5990_v15 = vld [vmem:[#allocation14 + $0x3cc] sm:$0xf] }
 0x26d   :  { %v6892_v55 = vpack.c.bf16 %v1187_v42, %v1187_v42  ;;  %v5970_v19 = vld [vmem:[#allocation14 + $0x324] sm:$0xf0]  ;;  %v4993_v18 = vld [vmem:[#allocation14 + $0x3e8] sm:$0xf0] }
 0x26e   :  { %2736 = vmatmul.bf16.vlgmr.msra.gmra.mxu3 %v6886_v47  ;;  %2749 = vmatmul.bf16.vlgmr.msrb.gmra.mxu0 %v6888_v48  ;;  %v5151_v20 = vld [vmem:[#allocation14 + $0x508] sm:$0xf]  ;;  %v4896_v22 = vor.u32 %v5970_v19, %v4895_v17  ;;  %v5249_v19 = vld [vmem:[#allocation14 + $0x5e8] sm:$0xf0] }
 0x26f   :  { %2762 = vmatmul.bf16.vlgmr.msrb.gmra.mxu1 %v6890_v49  ;;  %2775 = vmatmul.bf16.vlgmr.msrb.gmra.mxu2 %v6892_v55  ;;  %v6034_v52 = vld [vmem:[#allocation14 + $0x524] sm:$0xf0] }
 0x270   :  { %2832 = vmatpush.bf16.msra.mxu3 %v4736_v44  ;;  %2845 = vmatpush.bf16.msrb.mxu0 %v4992_v53  ;;  %v5407_v14 = vld [vmem:[#allocation14 + $0x708] sm:$0xf]  ;;  %v5152_v3 = vor.u32 %v6034_v52, %v5151_v20  ;;  %v6118_v20 = vld [vmem:[#allocation14 + $0x7cc] sm:$0xf] }
 0x271   :  { %2858 = vmatpush.bf16.msrb.mxu1 %v5248_v12  ;;  %2871 = vmatpush.bf16.msrb.mxu2 %v5504_v56  ;;  %v6098_v4 = vld [vmem:[#allocation14 + $0x724] sm:$0xf0]  ;;  %v5505_v52 = vld [vmem:[#allocation14 + $0x7e8] sm:$0xf0] }
 0x272   :  { %v4607_v23 = vld [vmem:[#allocation14 + $0xc8] sm:$0xf]  ;;  %v5408_v25 = vor.u32 %v6098_v4, %v5407_v14 }
 0x273   :  { %v5898_v34 = vld [vmem:[#allocation14 + $0xe4] sm:$0xf0] }
 0x274   :  { %2833 = vmatpush.bf16.msra.mxu3 %v4704_v1  ;;  %2846 = vmatpush.bf16.msrb.mxu0 %v4960_v61  ;;  %v4863_v26 = vld [vmem:[#allocation14 + $0x2c8] sm:$0xf]  ;;  %v4608_v32 = vor.u32 %v5898_v34, %v4607_v23  ;;  %v5918_v23 = vld [vmem:[#allocation14 + $0x18c] sm:$0xf] }
 0x275   :  { %2859 = vmatpush.bf16.msrb.mxu1 %v5216_v6  ;;  %2872 = vmatpush.bf16.msrb.mxu2 %v5472_v8  ;;  %v5962_v37 = vld [vmem:[#allocation14 + $0x2e4] sm:$0xf0]  ;;  %v4705_v34 = vld [vmem:[#allocation14 + $0x1a8] sm:$0xf0] }
 0x276   :  { %v5119_v62 = vld [vmem:[#allocation14 + $0x4c8] sm:$0xf]  ;;  %v4864_v5 = vor.u32 %v5962_v37, %v4863_v26  ;;  %v5982_v26 = vld [vmem:[#allocation14 + $0x38c] sm:$0xf] }
 0x277   :  { %v6026_v29 = vld [vmem:[#allocation14 + $0x4e4] sm:$0xf0]  ;;  %v4961_v37 = vld [vmem:[#allocation14 + $0x3a8] sm:$0xf0] }
 0x278   :  { %2834 = vmatpush.bf16.msra.mxu3 %v4672_v41  ;;  %2847 = vmatpush.bf16.msrb.mxu0 %v4928_v13  ;;  %v5375_v30 = vld [vmem:[#allocation14 + $0x6c8] sm:$0xf]  ;;  %v5120_v35 = vor.u32 %v6026_v29, %v5119_v62  ;;  %v5926_v41 = vld [vmem:[#allocation14 + $0x1cc] sm:$0xf] }
 0x279   :  { %2860 = vmatpush.bf16.msrb.mxu1 %v5184_v16  ;;  %2873 = vmatpush.bf16.msrb.mxu2 %v5440_v46  ;;  %v6090_v31 = vld [vmem:[#allocation14 + $0x6e4] sm:$0xf0]  ;;  %v4737_v13 = vld [vmem:[#allocation14 + $0x1e8] sm:$0xf0] }
 0x27a   :  { %v4575_v33 = vld [vmem:[#allocation14 + $0x88] sm:$0xf]  ;;  %v5376_v24 = vor.u32 %v6090_v31, %v5375_v30  ;;  %v6054_v16 = vld [vmem:[#allocation14 + $0x5cc] sm:$0xf] }
 0x27b   :  { %v5890_v7 = vld [vmem:[#allocation14 + $0xa4] sm:$0xf0]  ;;  %v6046_v62 = vld [vmem:[#allocation14 + $0x58c] sm:$0xf] }
 0x27c   :  { %2835 = vmatpush.bf16.msra.mxu3 %v4640_v21  ;;  %2848 = vmatpush.bf16.msrb.mxu0 %v4896_v22  ;;  %v4831_v36 = vld [vmem:[#allocation14 + $0x288] sm:$0xf]  ;;  %v4576_v44 = vor.u32 %v5890_v7, %v4575_v33  ;;  %v4740_v21 = vor.u32 %v5926_v41, %v4737_v13  ;;  %v4996_v22 = vor.u32 %v5990_v15, %v4993_v18  ;;  %v5217_v29 = vld [vmem:[#allocation14 + $0x5a8] sm:$0xf0] }
 0x27d   :  { %2861 = vmatpush.bf16.msrb.mxu1 %v5152_v3  ;;  %2874 = vmatpush.bf16.msrb.mxu2 %v5408_v25  ;;  %v5954_v28 = vld [vmem:[#allocation14 + $0x2a4] sm:$0xf0]  ;;  %v5252_v3 = vor.u32 %v6054_v16, %v5249_v19  ;;  %v5508_v25 = vor.u32 %v6118_v20, %v5505_v52  ;;  %v6110_v30 = vld [vmem:[#allocation14 + $0x78c] sm:$0xf] }
 0x27e   :  { %v5087_v38 = vld [vmem:[#allocation14 + $0x488] sm:$0xf]  ;;  %2788 = vmatmul.bf16.vlgmr.msrb.gmra.mxu3 %v6886_v47  ;;  %2801 = vmatmul.bf16.vlgmr.msra.gmra.mxu0 %v6888_v48  ;;  %v4832_v53 = vor.u32 %v5954_v28, %v4831_v36  ;;  %v5473_v31 = vld [vmem:[#allocation14 + $0x7a8] sm:$0xf0] }
 0x27f   :  { %v6018_v39 = vld [vmem:[#allocation14 + $0x4a4] sm:$0xf0]  ;;  %2814 = vmatmul.bf16.vlgmr.msra.gmra.mxu1 %v6890_v49  ;;  %2827 = vmatmul.bf16.vlgmr.msra.gmra.mxu2 %v6892_v55  ;;  %v5910_v33 = vld [vmem:[#allocation14 + $0x14c] sm:$0xf] }
 0x280   :  { %v5343_v40 = vld [vmem:[#allocation14 + $0x688] sm:$0xf]  ;;  %2836 = vmatpush.bf16.msra.mxu3 %v4608_v32  ;;  %2849 = vmatpush.bf16.msrb.mxu0 %v4864_v5  ;;  %v5088_v12 = vor.u32 %v6018_v39, %v5087_v38  ;;  %v4708_v32 = vor.u32 %v5918_v23, %v4705_v34  ;;  %v4964_v5 = vor.u32 %v5982_v26, %v4961_v37  ;;  %v4673_v7 = vld [vmem:[#allocation14 + $0x168] sm:$0xf0] }
 0x281   :  { %v6082_v42 = vld [vmem:[#allocation14 + $0x6a4] sm:$0xf0]  ;;  %2862 = vmatpush.bf16.msrb.mxu1 %v5120_v35  ;;  %2875 = vmatpush.bf16.msrb.mxu2 %v5376_v24  ;;  %v5220_v35 = vor.u32 %v6046_v62, %v5217_v29  ;;  %v5476_v24 = vor.u32 %v6110_v30, %v5473_v31  ;;  %v5974_v36 = vld [vmem:[#allocation14 + $0x34c] sm:$0xf] }
 0x282   :  { %v4543_v54 = vld [vmem:[#allocation14 + $0x48] sm:$0xf]  ;;  %v5344_v56 = vor.u32 %v6082_v42, %v5343_v40  ;;  %v4929_v28 = vld [vmem:[#allocation14 + $0x368] sm:$0xf0] }
 0x283   :  { %v5882_v51 = vld [vmem:[#allocation14 + $0x64] sm:$0xf0]  ;;  %v6038_v38 = vld [vmem:[#allocation14 + $0x54c] sm:$0xf] }
 0x284   :  { %v4799_v57 = vld [vmem:[#allocation14 + $0x248] sm:$0xf]  ;;  %2837 = vmatpush.bf16.msra.mxu3 %v4576_v44  ;;  %2850 = vmatpush.bf16.msrb.mxu0 %v4832_v53  ;;  %v4544_v61 = vor.u32 %v5882_v51, %v4543_v54  ;;  %v5185_v39 = vld [vmem:[#allocation14 + $0x568] sm:$0xf0]  ;;  %v4676_v44 = vor.u32 %v5910_v33, %v4673_v7  ;;  %v4932_v53 = vor.u32 %v5974_v36, %v4929_v28 }
 0x285   :  { %v5946_v58 = vld [vmem:[#allocation14 + $0x264] sm:$0xf0]  ;;  %2863 = vmatpush.bf16.msrb.mxu1 %v5088_v12  ;;  %2876 = vmatpush.bf16.msrb.mxu2 %v5344_v56  ;;  %v6102_v40 = vld [vmem:[#allocation14 + $0x74c] sm:$0xf]  ;;  %v5188_v12 = vor.u32 %v6038_v38, %v5185_v39 }
 0x286   :  { %v5055_v59 = vld [vmem:[#allocation14 + $0x448] sm:$0xf]  ;;  %v4800_v27 = vor.u32 %v5946_v58, %v4799_v57  ;;  %v5441_v42 = vld [vmem:[#allocation14 + $0x768] sm:$0xf0] }
 0x287   :  { %v6010_v60 = vld [vmem:[#allocation14 + $0x464] sm:$0xf0]  ;;  %v5902_v54 = vld [vmem:[#allocation14 + $0x10c] sm:$0xf]  ;;  %v5444_v56 = vor.u32 %v6102_v40, %v5441_v42 }
 0x288   :  { %v5311_v63 = vld [vmem:[#allocation14 + $0x648] sm:$0xf]  ;;  %v5056_v45 = vor.u32 %v6010_v60, %v5055_v59  ;;  %2838 = vmatpush.bf16.msra.mxu3 %v4544_v61  ;;  %2851 = vmatpush.bf16.msrb.mxu0 %v4800_v27  ;;  %v4641_v51 = vld [vmem:[#allocation14 + $0x128] sm:$0xf0] }
 0x289   :  { %v6074_v0 = vld [vmem:[#allocation14 + $0x664] sm:$0xf0]  ;;  %v5966_v57 = vld [vmem:[#allocation14 + $0x30c] sm:$0xf] }
 0x28a   :  { %v4511_v1 = vld [vmem:[#allocation14 + $0x8] sm:$0xf]  ;;  %v5312_v50 = vor.u32 %v6074_v0, %v5311_v63  ;;  %2864 = vmatpush.bf16.msrb.mxu1 %v5056_v45  ;;  %v4897_v58 = vld [vmem:[#allocation14 + $0x328] sm:$0xf0] }
 0x28b   :  { %v5874_v2 = vld [vmem:[#allocation14 + $0x24] sm:$0xf0]  ;;  %v6030_v59 = vld [vmem:[#allocation14 + $0x50c] sm:$0xf]  ;;  %v4900_v61 = vor.u32 %v5966_v57, %v4897_v58  ;;  %v6059_v58 = vld [vmem:[#allocation14 + $0x5ec] sm:$0xf0] }
 0x28c   :  { %v4767_v6 = vld [vmem:[#allocation14 + $0x208] sm:$0xf]  ;;  %v4512_v46 = vor.u32 %v5874_v2, %v4511_v1  ;;  %2877 = vmatpush.bf16.msrb.mxu2 %v5312_v50  ;;  %v5153_v60 = vld [vmem:[#allocation14 + $0x528] sm:$0xf0]  ;;  %v4644_v1 = vor.u32 %v5902_v54, %v4641_v51  ;;  %v4999_v54 = vld [vmem:[#allocation14 + $0x3d0] sm:$0xf] }
 0x28d   :  { %v5938_v8 = vld [vmem:[#allocation14 + $0x224] sm:$0xf0]  ;;  %v6094_v63 = vld [vmem:[#allocation14 + $0x70c] sm:$0xf]  ;;  %v5995_v51 = vld [vmem:[#allocation14 + $0x3ec] sm:$0xf0] }
 0x28e   :  { %v5023_v9 = vld [vmem:[#allocation14 + $0x408] sm:$0xf]  ;;  %v4768_v17 = vor.u32 %v5938_v8, %v4767_v6  ;;  %2839 = vmatpush.bf16.msra.mxu3 %v4512_v46  ;;  %v5409_v0 = vld [vmem:[#allocation14 + $0x728] sm:$0xf0]  ;;  %v5156_v6 = vor.u32 %v6030_v59, %v5153_v60  ;;  %v5511_v59 = vld [vmem:[#allocation14 + $0x7d0] sm:$0xf] }
 0x28f   :  { %v6002_v43 = vld [vmem:[#allocation14 + $0x424] sm:$0xf0]  ;;  %v5894_v27 = vld [vmem:[#allocation14 + $0xcc] sm:$0xf]  ;;  %v5412_v8 = vor.u32 %v6094_v63, %v5409_v0  ;;  %v6123_v60 = vld [vmem:[#allocation14 + $0x7ec] sm:$0xf0] }
 0x290   :  { %v5279_v10 = vld [vmem:[#allocation14 + $0x608] sm:$0xf]  ;;  %v5024_v14 = vor.u32 %v6002_v43, %v5023_v9  ;;  %2852 = vmatpush.bf16.msrb.mxu0 %v4768_v17  ;;  %v4609_v2 = vld [vmem:[#allocation14 + $0xe8] sm:$0xf0] }
 0x291   :  { %v6066_v11 = vld [vmem:[#allocation14 + $0x624] sm:$0xf0]  ;;  %2840 = vmatmul.bf16.vlgmr.msra.gmra.mxu3 %v6886_v47  ;;  %v5958_v45 = vld [vmem:[#allocation14 + $0x2cc] sm:$0xf]  ;;  %v4612_v41 = vor.u32 %v5894_v27, %v4609_v2  ;;  %v4711_v27 = vld [vmem:[#allocation14 + $0x190] sm:$0xf] }
 0x292   :  { %v5280_v4 = vor.u32 %v6066_v11, %v5279_v10  ;;  %2865 = vmatpush.bf16.msrb.mxu1 %v5024_v14  ;;  %2884 = vmatpush.bf16.msrb.mxu3 %v4740_v21  ;;  %v4865_v50 = vld [vmem:[#allocation14 + $0x2e8] sm:$0xf0]  ;;  %v5923_v2 = vld [vmem:[#allocation14 + $0x1ac] sm:$0xf0] }
 0x293   :  { %2853 = vmatmul.bf16.vlgmr.msrb.gmra.mxu0 %v6888_v48  ;;  %v6022_v9 = vld [vmem:[#allocation14 + $0x4cc] sm:$0xf]  ;;  %v4868_v13 = vor.u32 %v5958_v45, %v4865_v50  ;;  %v4967_v45 = vld [vmem:[#allocation14 + $0x390] sm:$0xf] }
 0x294   :  { %2878 = vmatpush.bf16.msrb.mxu2 %v5280_v4  ;;  %2897 = vmatpush.bf16.msra.mxu0 %v4996_v22  ;;  %v5121_v43 = vld [vmem:[#allocation14 + $0x4e8] sm:$0xf0]  ;;  %v5987_v50 = vld [vmem:[#allocation14 + $0x3ac] sm:$0xf0] }
 0x295   :  { %2866 = vmatmul.bf16.vlgmr.msrb.gmra.mxu1 %v6890_v49  ;;  %v6086_v10 = vld [vmem:[#allocation14 + $0x6cc] sm:$0xf]  ;;  %v5124_v16 = vor.u32 %v6022_v9, %v5121_v43  ;;  %v5223_v9 = vld [vmem:[#allocation14 + $0x590] sm:$0xf] }
 0x296   :  { %2910 = vmatpush.bf16.msra.mxu1 %v5252_v3  ;;  %2885 = vmatpush.bf16.msrb.mxu3 %v4708_v32  ;;  %v5377_v11 = vld [vmem:[#allocation14 + $0x6e8] sm:$0xf0]  ;;  %v6051_v43 = vld [vmem:[#allocation14 + $0x5ac] sm:$0xf0] }
 0x297   :  { %2879 = vmatmul.bf16.vlgmr.msrb.gmra.mxu2 %v6892_v55  ;;  %v5886_v15 = vld [vmem:[#allocation14 + $0x8c] sm:$0xf]  ;;  %v5380_v46 = vor.u32 %v6086_v10, %v5377_v11  ;;  %v5479_v10 = vld [vmem:[#allocation14 + $0x790] sm:$0xf] }
 0x298   :  { %2923 = vmatpush.bf16.msra.mxu2 %v5508_v25  ;;  %2898 = vmatpush.bf16.msra.mxu0 %v4964_v5  ;;  %v4577_v18 = vld [vmem:[#allocation14 + $0xa8] sm:$0xf0]  ;;  %v6115_v11 = vld [vmem:[#allocation14 + $0x7ac] sm:$0xf0] }
 0x299   :  { %v5950_v17 = vld [vmem:[#allocation14 + $0x28c] sm:$0xf]  ;;  %v4580_v21 = vor.u32 %v5886_v15, %v4577_v18  ;;  %v4679_v15 = vld [vmem:[#allocation14 + $0x150] sm:$0xf] }
 0x29a   :  { %2911 = vmatpush.bf16.msra.mxu1 %v5220_v35  ;;  %2886 = vmatpush.bf16.msrb.mxu3 %v4676_v44  ;;  %v4833_v19 = vld [vmem:[#allocation14 + $0x2a8] sm:$0xf0]  ;;  %v4743_v44 = vld [vmem:[#allocation14 + $0x1d0] sm:$0xf] }
 0x29b   :  { %v6014_v20 = vld [vmem:[#allocation14 + $0x48c] sm:$0xf]  ;;  %v4836_v22 = vor.u32 %v5950_v17, %v4833_v19  ;;  %v5915_v18 = vld [vmem:[#allocation14 + $0x16c] sm:$0xf0] }
 0x29c   :  { %2924 = vmatpush.bf16.msra.mxu2 %v5476_v24  ;;  %2899 = vmatpush.bf16.msra.mxu0 %v4932_v53  ;;  %v5089_v52 = vld [vmem:[#allocation14 + $0x4a8] sm:$0xf0]  ;;  %v5931_v53 = vld [vmem:[#allocation14 + $0x1ec] sm:$0xf0] }
 0x29d   :  { %v6078_v14 = vld [vmem:[#allocation14 + $0x68c] sm:$0xf]  ;;  %v5092_v3 = vor.u32 %v6014_v20, %v5089_v52  ;;  %v4935_v17 = vld [vmem:[#allocation14 + $0x350] sm:$0xf] }
 0x29e   :  { %2912 = vmatpush.bf16.msra.mxu1 %v5188_v12  ;;  %2887 = vmatpush.bf16.msrb.mxu3 %v4644_v1  ;;  %v5345_v4 = vld [vmem:[#allocation14 + $0x6a8] sm:$0xf0]  ;;  %v5255_v12 = vld [vmem:[#allocation14 + $0x5d0] sm:$0xf]  ;;  %v4744_v1 = vor.u32 %v5931_v53, %v4743_v44 }
 0x29f   :  { %v5878_v23 = vld [vmem:[#allocation14 + $0x4c] sm:$0xf]  ;;  %v5348_v25 = vor.u32 %v6078_v14, %v5345_v4  ;;  %v5979_v19 = vld [vmem:[#allocation14 + $0x36c] sm:$0xf0] }
 0x2a0   :  { %2925 = vmatpush.bf16.msra.mxu2 %v5444_v56  ;;  %2900 = vmatpush.bf16.msra.mxu0 %v4900_v61  ;;  %v4545_v34 = vld [vmem:[#allocation14 + $0x68] sm:$0xf0]  ;;  %v5000_v61 = vor.u32 %v5995_v51, %v4999_v54  ;;  %v5191_v20 = vld [vmem:[#allocation14 + $0x550] sm:$0xf] }
 0x2a1   :  { %v5942_v26 = vld [vmem:[#allocation14 + $0x24c] sm:$0xf]  ;;  %v4548_v5 = vor.u32 %v5878_v23, %v4545_v34  ;;  %v6043_v52 = vld [vmem:[#allocation14 + $0x56c] sm:$0xf0] }
 0x2a2   :  { %2913 = vmatpush.bf16.msra.mxu1 %v5156_v6  ;;  %2888 = vmatpush.bf16.msrb.mxu3 %v4612_v41  ;;  %v4801_v37 = vld [vmem:[#allocation14 + $0x268] sm:$0xf0]  ;;  %v5256_v6 = vor.u32 %v6059_v58, %v5255_v12  ;;  %v4712_v41 = vor.u32 %v5923_v2, %v4711_v27  ;;  %v5447_v14 = vld [vmem:[#allocation14 + $0x750] sm:$0xf] }
 0x2a3   :  { %v6006_v62 = vld [vmem:[#allocation14 + $0x44c] sm:$0xf]  ;;  %v4804_v33 = vor.u32 %v5942_v26, %v4801_v37  ;;  %v6107_v4 = vld [vmem:[#allocation14 + $0x76c] sm:$0xf0] }
 0x2a4   :  { %2926 = vmatpush.bf16.msra.mxu2 %v5412_v8  ;;  %2901 = vmatpush.bf16.msra.mxu0 %v4868_v13  ;;  %v5057_v29 = vld [vmem:[#allocation14 + $0x468] sm:$0xf0]  ;;  %v5512_v8 = vor.u32 %v6123_v60, %v5511_v59  ;;  %v4968_v13 = vor.u32 %v5987_v50, %v4967_v45  ;;  %v4647_v23 = vld [vmem:[#allocation14 + $0x110] sm:$0xf] }
 0x2a5   :  { %v6070_v30 = vld [vmem:[#allocation14 + $0x64c] sm:$0xf]  ;;  %v5060_v36 = vor.u32 %v6006_v62, %v5057_v29  ;;  %v5907_v34 = vld [vmem:[#allocation14 + $0x12c] sm:$0xf0] }
 0x2a6   :  { %2914 = vmatpush.bf16.msra.mxu1 %v5124_v16  ;;  %v5313_v31 = vld [vmem:[#allocation14 + $0x668] sm:$0xf0]  ;;  %2889 = vmatpush.bf16.msrb.mxu3 %v4580_v21  ;;  %v5224_v16 = vor.u32 %v6051_v43, %v5223_v9  ;;  %v4680_v21 = vor.u32 %v5915_v18, %v4679_v15  ;;  %v4903_v26 = vld [vmem:[#allocation14 + $0x310] sm:$0xf] }
 0x2a7   :  { %v5870_v32 = vld [vmem:[#allocation14 + $0xc] sm:$0xf]  ;;  %v5316_v28 = vor.u32 %v6070_v30, %v5313_v31  ;;  %v5971_v37 = vld [vmem:[#allocation14 + $0x32c] sm:$0xf0] }
 0x2a8   :  { %2927 = vmatpush.bf16.msra.mxu2 %v5380_v46  ;;  %2902 = vmatpush.bf16.msra.mxu0 %v4836_v22  ;;  %v4513_v7 = vld [vmem:[#allocation14 + $0x28] sm:$0xf0]  ;;  %v5480_v46 = vor.u32 %v6115_v11, %v5479_v10  ;;  %v4936_v22 = vor.u32 %v5979_v19, %v4935_v17  ;;  %v5159_v62 = vld [vmem:[#allocation14 + $0x510] sm:$0xf] }
 0x2a9   :  { %v5934_v35 = vld [vmem:[#allocation14 + $0x20c] sm:$0xf]  ;;  %v4516_v56 = vor.u32 %v5870_v32, %v4513_v7  ;;  %v6035_v29 = vld [vmem:[#allocation14 + $0x52c] sm:$0xf0]  ;;  %v4648_v32 = vor.u32 %v5907_v34, %v4647_v23  ;;  %v5991_v23 = vld [vmem:[#allocation14 + $0x3d4] sm:$0xf] }
 0x2aa   :  { %v4769_v24 = vld [vmem:[#allocation14 + $0x228] sm:$0xf0]  ;;  %2915 = vmatpush.bf16.msra.mxu1 %v5092_v3  ;;  %2890 = vmatpush.bf16.msrb.mxu3 %v4548_v5  ;;  %v5192_v3 = vor.u32 %v6043_v52, %v5191_v20  ;;  %v5415_v30 = vld [vmem:[#allocation14 + $0x710] sm:$0xf]  ;;  %v4904_v5 = vor.u32 %v5971_v37, %v4903_v26  ;;  %v5001_v34 = vld [vmem:[#allocation14 + $0x3f0] sm:$0xf0] }
 0x2ab   :  { %v5998_v38 = vld [vmem:[#allocation14 + $0x40c] sm:$0xf]  ;;  %v4772_v57 = vor.u32 %v5934_v35, %v4769_v24  ;;  %v6099_v31 = vld [vmem:[#allocation14 + $0x72c] sm:$0xf0]  ;;  %v5160_v35 = vor.u32 %v6035_v29, %v5159_v62  ;;  %v5257_v37 = vld [vmem:[#allocation14 + $0x5f0] sm:$0xf0] }
 0x2ac   :  { %2928 = vmatpush.bf16.msra.mxu2 %v5348_v25  ;;  %v5025_v39 = vld [vmem:[#allocation14 + $0x428] sm:$0xf0]  ;;  %2903 = vmatpush.bf16.msra.mxu0 %v4804_v33  ;;  %v5448_v25 = vor.u32 %v6107_v4, %v5447_v14  ;;  %v4615_v33 = vld [vmem:[#allocation14 + $0xd0] sm:$0xf]  ;;  %v5416_v24 = vor.u32 %v6099_v31, %v5415_v30  ;;  %v6119_v62 = vld [vmem:[#allocation14 + $0x7d4] sm:$0xf] }
 0x2ad   :  { %v6062_v40 = vld [vmem:[#allocation14 + $0x60c] sm:$0xf]  ;;  %v5028_v63 = vor.u32 %v5998_v38, %v5025_v39  ;;  %v5899_v7 = vld [vmem:[#allocation14 + $0xec] sm:$0xf0]  ;;  %v5513_v29 = vld [vmem:[#allocation14 + $0x7f0] sm:$0xf0] }
 0x2ae   :  { %v5281_v42 = vld [vmem:[#allocation14 + $0x628] sm:$0xf0]  ;;  %2916 = vmatpush.bf16.msra.mxu1 %v5060_v36  ;;  %2891 = vmatpush.bf16.msrb.mxu3 %v4516_v56  ;;  %v4871_v36 = vld [vmem:[#allocation14 + $0x2d0] sm:$0xf]  ;;  %v4616_v44 = vor.u32 %v5899_v7, %v4615_v33  ;;  %v5919_v33 = vld [vmem:[#allocation14 + $0x194] sm:$0xf] }
 0x2af   :  { %v5284_v0 = vor.u32 %v6062_v40, %v5281_v42  ;;  %v5127_v38 = vld [vmem:[#allocation14 + $0x4d0] sm:$0xf]  ;;  %v4713_v7 = vld [vmem:[#allocation14 + $0x1b0] sm:$0xf0] }
 0x2b0   :  { %2929 = vmatpush.bf16.msra.mxu2 %v5316_v28  ;;  %2904 = vmatpush.bf16.msra.mxu0 %v4772_v57  ;;  %v5963_v28 = vld [vmem:[#allocation14 + $0x2ec] sm:$0xf0] }
 0x2b1   :  { %2892 = vmatmul.bf16.vlgmr.msrb.gmra.mxu3 %v6886_v47  ;;  %v6027_v39 = vld [vmem:[#allocation14 + $0x4ec] sm:$0xf0]  ;;  %v4872_v53 = vor.u32 %v5963_v28, %v4871_v36  ;;  %v5983_v36 = vld [vmem:[#allocation14 + $0x394] sm:$0xf] }
 0x2b2   :  { %2917 = vmatpush.bf16.msra.mxu1 %v5028_v63  ;;  %2936 = vmatpush.bf16.msra.mxu3 %v4744_v1  ;;  %v5383_v40 = vld [vmem:[#allocation14 + $0x6d0] sm:$0xf]  ;;  %v5128_v12 = vor.u32 %v6027_v39, %v5127_v38  ;;  %v4969_v28 = vld [vmem:[#allocation14 + $0x3b0] sm:$0xf0] }
 0x2b3   :  { %2905 = vmatmul.bf16.vlgmr.msra.gmra.mxu0 %v6888_v48  ;;  %v6091_v42 = vld [vmem:[#allocation14 + $0x6ec] sm:$0xf0]  ;;  %v6047_v38 = vld [vmem:[#allocation14 + $0x594] sm:$0xf] }
 0x2b4   :  { %2930 = vmatpush.bf16.msra.mxu2 %v5284_v0  ;;  %2949 = vmatpush.bf16.msrb.mxu0 %v5000_v61  ;;  %v4583_v54 = vld [vmem:[#allocation14 + $0x90] sm:$0xf]  ;;  %v5384_v56 = vor.u32 %v6091_v42, %v5383_v40  ;;  %v5225_v39 = vld [vmem:[#allocation14 + $0x5b0] sm:$0xf0] }
 0x2b5   :  { %2918 = vmatmul.bf16.vlgmr.msra.gmra.mxu1 %v6890_v49  ;;  %v5891_v51 = vld [vmem:[#allocation14 + $0xac] sm:$0xf0]  ;;  %v6111_v40 = vld [vmem:[#allocation14 + $0x794] sm:$0xf] }
 0x2b6   :  { %2962 = vmatpush.bf16.msrb.mxu1 %v5256_v6  ;;  %2937 = vmatpush.bf16.msra.mxu3 %v4712_v41  ;;  %v4839_v57 = vld [vmem:[#allocation14 + $0x290] sm:$0xf]  ;;  %v4584_v1 = vor.u32 %v5891_v51, %v4583_v54  ;;  %v5481_v42 = vld [vmem:[#allocation14 + $0x7b0] sm:$0xf0] }
 0x2b7   :  { %2931 = vmatmul.bf16.vlgmr.msra.gmra.mxu2 %v6892_v55  ;;  %v5955_v58 = vld [vmem:[#allocation14 + $0x2ac] sm:$0xf0]  ;;  %v5911_v54 = vld [vmem:[#allocation14 + $0x154] sm:$0xf] }
 0x2b8   :  { %2975 = vmatpush.bf16.msrb.mxu2 %v5512_v8  ;;  %2950 = vmatpush.bf16.msrb.mxu0 %v4968_v13  ;;  %v5095_v59 = vld [vmem:[#allocation14 + $0x490] sm:$0xf]  ;;  %v4840_v61 = vor.u32 %v5955_v58, %v4839_v57  ;;  %v4681_v51 = vld [vmem:[#allocation14 + $0x170] sm:$0xf0] }
 0x2b9   :  { %v6019_v60 = vld [vmem:[#allocation14 + $0x4ac] sm:$0xf0]  ;;  %v5975_v57 = vld [vmem:[#allocation14 + $0x354] sm:$0xf] }
 0x2ba   :  { %2963 = vmatpush.bf16.msrb.mxu1 %v5224_v16  ;;  %2938 = vmatpush.bf16.msra.mxu3 %v4680_v21  ;;  %v5351_v63 = vld [vmem:[#allocation14 + $0x690] sm:$0xf]  ;;  %v5096_v6 = vor.u32 %v6019_v60, %v5095_v59  ;;  %v5927_v21 = vld [vmem:[#allocation14 + $0x1d4] sm:$0xf] }
 0x2bb   :  { %v6083_v0 = vld [vmem:[#allocation14 + $0x6ac] sm:$0xf0]  ;;  %v4937_v58 = vld [vmem:[#allocation14 + $0x370] sm:$0xf0] }
 0x2bc   :  { %2976 = vmatpush.bf16.msrb.mxu2 %v5480_v46  ;;  %2951 = vmatpush.bf16.msrb.mxu0 %v4936_v22  ;;  %v4551_v27 = vld [vmem:[#allocation14 + $0x50] sm:$0xf]  ;;  %v5352_v8 = vor.u32 %v6083_v0, %v5351_v63  ;;  %v4745_v22 = vld [vmem:[#allocation14 + $0x1f0] sm:$0xf0] }
 0x2bd   :  { %v5883_v2 = vld [vmem:[#allocation14 + $0x6c] sm:$0xf0]  ;;  %v6039_v59 = vld [vmem:[#allocation14 + $0x554] sm:$0xf] }
 0x2be   :  { %2964 = vmatpush.bf16.msrb.mxu1 %v5192_v3  ;;  %2939 = vmatpush.bf16.msra.mxu3 %v4648_v32  ;;  %v4807_v45 = vld [vmem:[#allocation14 + $0x250] sm:$0xf]  ;;  %v4552_v13 = vor.u32 %v5883_v2, %v4551_v27  ;;  %v6055_v3 = vld [vmem:[#allocation14 + $0x5d4] sm:$0xf]  ;;  %v4748_v32 = vor.u32 %v5927_v21, %v4745_v22 }
 0x2bf   :  { %v5947_v50 = vld [vmem:[#allocation14 + $0x26c] sm:$0xf0]  ;;  %v5193_v60 = vld [vmem:[#allocation14 + $0x570] sm:$0xf0] }
 0x2c0   :  { %2977 = vmatpush.bf16.msrb.mxu2 %v5448_v25  ;;  %2952 = vmatpush.bf16.msrb.mxu0 %v4904_v5  ;;  %v5063_v9 = vld [vmem:[#allocation14 + $0x450] sm:$0xf]  ;;  %v4808_v15 = vor.u32 %v5947_v50, %v4807_v45  ;;  %v5004_v5 = vor.u32 %v5991_v23, %v5001_v34  ;;  %v6103_v63 = vld [vmem:[#allocation14 + $0x754] sm:$0xf] }
 0x2c1   :  { %v6011_v43 = vld [vmem:[#allocation14 + $0x46c] sm:$0xf0]  ;;  %v5449_v0 = vld [vmem:[#allocation14 + $0x770] sm:$0xf0] }
 0x2c2   :  { %2965 = vmatpush.bf16.msrb.mxu1 %v5160_v35  ;;  %2940 = vmatpush.bf16.msra.mxu3 %v4616_v44  ;;  %v5319_v10 = vld [vmem:[#allocation14 + $0x650] sm:$0xf]  ;;  %v5064_v17 = vor.u32 %v6011_v43, %v5063_v9  ;;  %v5260_v35 = vor.u32 %v6055_v3, %v5257_v37  ;;  %v4716_v44 = vor.u32 %v5919_v33, %v4713_v7  ;;  %v5903_v27 = vld [vmem:[#allocation14 + $0x114] sm:$0xf] }
 0x2c3   :  { %v6075_v11 = vld [vmem:[#allocation14 + $0x66c] sm:$0xf0]  ;;  %v4649_v2 = vld [vmem:[#allocation14 + $0x130] sm:$0xf0] }
 0x2c4   :  { %2978 = vmatpush.bf16.msrb.mxu2 %v5416_v24  ;;  %2953 = vmatpush.bf16.msrb.mxu0 %v4872_v53  ;;  %v4519_v41 = vld [vmem:[#allocation14 + $0x10] sm:$0xf]  ;;  %v5320_v19 = vor.u32 %v6075_v11, %v5319_v10  ;;  %v5516_v24 = vor.u32 %v6119_v62, %v5513_v29  ;;  %v4972_v53 = vor.u32 %v5983_v36, %v4969_v28  ;;  %v5967_v45 = vld [vmem:[#allocation14 + $0x314] sm:$0xf] }
 0x2c5   :  { %v5875_v18 = vld [vmem:[#allocation14 + $0x2c] sm:$0xf0]  ;;  %v4905_v50 = vld [vmem:[#allocation14 + $0x330] sm:$0xf0] }
 0x2c6   :  { %2966 = vmatpush.bf16.msrb.mxu1 %v5128_v12  ;;  %2941 = vmatpush.bf16.msra.mxu3 %v4584_v1  ;;  %v4775_v16 = vld [vmem:[#allocation14 + $0x210] sm:$0xf]  ;;  %v4520_v25 = vor.u32 %v5875_v18, %v4519_v41  ;;  %v5228_v12 = vor.u32 %v6047_v38, %v5225_v39  ;;  %v4684_v1 = vor.u32 %v5911_v54, %v4681_v51  ;;  %v6031_v9 = vld [vmem:[#allocation14 + $0x514] sm:$0xf] }
 0x2c7   :  { %v5939_v46 = vld [vmem:[#allocation14 + $0x22c] sm:$0xf0]  ;;  %v5161_v43 = vld [vmem:[#allocation14 + $0x530] sm:$0xf0]  ;;  %v4652_v41 = vor.u32 %v5903_v27, %v4649_v2  ;;  %v5007_v27 = vld [vmem:[#allocation14 + $0x3d8] sm:$0xf] }
 0x2c8   :  { %2979 = vmatpush.bf16.msrb.mxu2 %v5384_v56  ;;  %2954 = vmatpush.bf16.msrb.mxu0 %v4840_v61  ;;  %v5031_v20 = vld [vmem:[#allocation14 + $0x410] sm:$0xf]  ;;  %v4776_v26 = vor.u32 %v5939_v46, %v4775_v16  ;;  %v5484_v56 = vor.u32 %v6111_v40, %v5481_v42  ;;  %v4940_v61 = vor.u32 %v5975_v57, %v4937_v58  ;;  %v6095_v10 = vld [vmem:[#allocation14 + $0x714] sm:$0xf]  ;;  %v5996_v2 = vld [vmem:[#allocation14 + $0x3f4] sm:$0xf0] }
 0x2c9   :  { %v6003_v52 = vld [vmem:[#allocation14 + $0x42c] sm:$0xf0]  ;;  %v5417_v11 = vld [vmem:[#allocation14 + $0x730] sm:$0xf0]  ;;  %v5164_v16 = vor.u32 %v6031_v9, %v5161_v43  ;;  %v5519_v9 = vld [vmem:[#allocation14 + $0x7d8] sm:$0xf] }
 0x2ca   :  { %2967 = vmatpush.bf16.msrb.mxu1 %v5096_v6  ;;  %v5287_v14 = vld [vmem:[#allocation14 + $0x610] sm:$0xf]  ;;  %2942 = vmatpush.bf16.msra.mxu3 %v4552_v13  ;;  %v5032_v30 = vor.u32 %v6003_v52, %v5031_v20  ;;  %v5196_v6 = vor.u32 %v6039_v59, %v5193_v60  ;;  %v4908_v13 = vor.u32 %v5967_v45, %v4905_v50  ;;  %v4617_v18 = vld [vmem:[#allocation14 + $0xf0] sm:$0xf0]  ;;  %v6060_v50 = vld [vmem:[#allocation14 + $0x5f4] sm:$0xf0] }
 0x2cb   :  { %v6067_v4 = vld [vmem:[#allocation14 + $0x62c] sm:$0xf0]  ;;  %v5420_v46 = vor.u32 %v6095_v10, %v5417_v11  ;;  %v6023_v20 = vld [vmem:[#allocation14 + $0x4d4] sm:$0xf]  ;;  %v6124_v43 = vld [vmem:[#allocation14 + $0x7f4] sm:$0xf0] }
 0x2cc   :  { %2980 = vmatpush.bf16.msrb.mxu2 %v5352_v8  ;;  %2955 = vmatpush.bf16.msrb.mxu0 %v4808_v15  ;;  %v5288_v31 = vor.u32 %v6067_v4, %v5287_v14  ;;  %v5452_v8 = vor.u32 %v6103_v63, %v5449_v0  ;;  %v5895_v15 = vld [vmem:[#allocation14 + $0xd4] sm:$0xf] }
 0x2cd   :  { %v5129_v52 = vld [vmem:[#allocation14 + $0x4f0] sm:$0xf0]  ;;  %v4620_v21 = vor.u32 %v5895_v15, %v4617_v18  ;;  %v4719_v15 = vld [vmem:[#allocation14 + $0x198] sm:$0xf] }
 0x2ce   :  { %2968 = vmatpush.bf16.msrb.mxu1 %v5064_v17  ;;  %2943 = vmatpush.bf16.msra.mxu3 %v4520_v25  ;;  %v5959_v17 = vld [vmem:[#allocation14 + $0x2d4] sm:$0xf]  ;;  %v5132_v3 = vor.u32 %v6023_v20, %v5129_v52  ;;  %v5924_v18 = vld [vmem:[#allocation14 + $0x1b4] sm:$0xf0] }
 0x2cf   :  { %v6087_v14 = vld [vmem:[#allocation14 + $0x6d4] sm:$0xf]  ;;  %v5231_v20 = vld [vmem:[#allocation14 + $0x598] sm:$0xf] }
 0x2d0   :  { %2981 = vmatpush.bf16.msrb.mxu2 %v5320_v19  ;;  %2956 = vmatpush.bf16.msrb.mxu0 %v4776_v26  ;;  %v4873_v19 = vld [vmem:[#allocation14 + $0x2f0] sm:$0xf0]  ;;  %v6052_v52 = vld [vmem:[#allocation14 + $0x5b4] sm:$0xf0] }
 0x2d1   :  { %2944 = vmatmul.bf16.vlgmr.msra.gmra.mxu3 %v6886_v47  ;;  %v5385_v4 = vld [vmem:[#allocation14 + $0x6f0] sm:$0xf0]  ;;  %v4876_v22 = vor.u32 %v5959_v17, %v4873_v19  ;;  %v4975_v17 = vld [vmem:[#allocation14 + $0x398] sm:$0xf] }
 0x2d2   :  { %2969 = vmatpush.bf16.msrb.mxu1 %v5032_v30  ;;  %2988 = vmatpush.bf16.msrb.mxu3 %v4748_v32  ;;  %v5887_v23 = vld [vmem:[#allocation14 + $0x94] sm:$0xf]  ;;  %v5388_v25 = vor.u32 %v6087_v14, %v5385_v4  ;;  %v5988_v19 = vld [vmem:[#allocation14 + $0x3b4] sm:$0xf0] }
 0x2d3   :  { %2957 = vmatmul.bf16.vlgmr.msrb.gmra.mxu0 %v6888_v48  ;;  %v4585_v34 = vld [vmem:[#allocation14 + $0xb0] sm:$0xf0]  ;;  %v5487_v14 = vld [vmem:[#allocation14 + $0x798] sm:$0xf] }
 0x2d4   :  { %2982 = vmatpush.bf16.msrb.mxu2 %v5288_v31  ;;  %3001 = vmatpush.bf16.msra.mxu0 %v5004_v5  ;;  %v5951_v26 = vld [vmem:[#allocation14 + $0x294] sm:$0xf]  ;;  %v4588_v32 = vor.u32 %v5887_v23, %v4585_v34  ;;  %v6116_v4 = vld [vmem:[#allocation14 + $0x7b4] sm:$0xf0] }
 0x2d5   :  { %2970 = vmatmul.bf16.vlgmr.msrb.gmra.mxu1 %v6890_v49  ;;  %v4841_v37 = vld [vmem:[#allocation14 + $0x2b0] sm:$0xf0]  ;;  %v4687_v23 = vld [vmem:[#allocation14 + $0x158] sm:$0xf] }
 0x2d6   :  { %3014 = vmatpush.bf16.msra.mxu1 %v5260_v35  ;;  %2989 = vmatpush.bf16.msrb.mxu3 %v4716_v44  ;;  %v6015_v62 = vld [vmem:[#allocation14 + $0x494] sm:$0xf]  ;;  %v4844_v5 = vor.u32 %v5951_v26, %v4841_v37  ;;  %v5916_v34 = vld [vmem:[#allocation14 + $0x174] sm:$0xf0] }
 0x2d7   :  { %2983 = vmatmul.bf16.vlgmr.msrb.gmra.mxu2 %v6892_v55  ;;  %v5097_v29 = vld [vmem:[#allocation14 + $0x4b0] sm:$0xf0]  ;;  %v4943_v26 = vld [vmem:[#allocation14 + $0x358] sm:$0xf] }
 0x2d8   :  { %3027 = vmatpush.bf16.msra.mxu2 %v5516_v24  ;;  %3002 = vmatpush.bf16.msra.mxu0 %v4972_v53  ;;  %v6079_v30 = vld [vmem:[#allocation14 + $0x694] sm:$0xf]  ;;  %v5100_v35 = vor.u32 %v6015_v62, %v5097_v29  ;;  %v5980_v37 = vld [vmem:[#allocation14 + $0x374] sm:$0xf0] }
 0x2d9   :  { %v5353_v31 = vld [vmem:[#allocation14 + $0x6b0] sm:$0xf0]  ;;  %v5199_v62 = vld [vmem:[#allocation14 + $0x558] sm:$0xf] }
 0x2da   :  { %3015 = vmatpush.bf16.msra.mxu1 %v5228_v12  ;;  %2990 = vmatpush.bf16.msrb.mxu3 %v4684_v1  ;;  %v5879_v33 = vld [vmem:[#allocation14 + $0x54] sm:$0xf]  ;;  %v5356_v24 = vor.u32 %v6079_v30, %v5353_v31  ;;  %v4751_v1 = vld [vmem:[#allocation14 + $0x1d8] sm:$0xf] }
 0x2db   :  { %v4553_v7 = vld [vmem:[#allocation14 + $0x70] sm:$0xf0]  ;;  %v6044_v29 = vld [vmem:[#allocation14 + $0x574] sm:$0xf0] }
 0x2dc   :  { %3028 = vmatpush.bf16.msra.mxu2 %v5484_v56  ;;  %3003 = vmatpush.bf16.msra.mxu0 %v4940_v61  ;;  %v5943_v36 = vld [vmem:[#allocation14 + $0x254] sm:$0xf]  ;;  %v4556_v53 = vor.u32 %v5879_v33, %v4553_v7  ;;  %v5932_v61 = vld [vmem:[#allocation14 + $0x1f4] sm:$0xf0]  ;;  %v4944_v33 = vor.u32 %v5980_v37, %v4943_v26 }
 0x2dd   :  { %v4809_v28 = vld [vmem:[#allocation14 + $0x270] sm:$0xf0]  ;;  %v5455_v30 = vld [vmem:[#allocation14 + $0x758] sm:$0xf] }
 0x2de   :  { %3016 = vmatpush.bf16.msra.mxu1 %v5196_v6  ;;  %2991 = vmatpush.bf16.msrb.mxu3 %v4652_v41  ;;  %v6007_v38 = vld [vmem:[#allocation14 + $0x454] sm:$0xf]  ;;  %v4812_v54 = vor.u32 %v5943_v36, %v4809_v28  ;;  %v5263_v6 = vld [vmem:[#allocation14 + $0x5d8] sm:$0xf]  ;;  %v4752_v41 = vor.u32 %v5932_v61, %v4751_v1  ;;  %v5200_v36 = vor.u32 %v6044_v29, %v5199_v62 }
 0x2df   :  { %v5065_v39 = vld [vmem:[#allocation14 + $0x470] sm:$0xf0]  ;;  %v6108_v31 = vld [vmem:[#allocation14 + $0x774] sm:$0xf0] }
 0x2e0   :  { %3029 = vmatpush.bf16.msra.mxu2 %v5452_v8  ;;  %3004 = vmatpush.bf16.msra.mxu0 %v4908_v13  ;;  %v6071_v40 = vld [vmem:[#allocation14 + $0x654] sm:$0xf]  ;;  %v5068_v57 = vor.u32 %v6007_v38, %v5065_v39  ;;  %v5008_v13 = vor.u32 %v5996_v2, %v5007_v27  ;;  %v5456_v28 = vor.u32 %v6108_v31, %v5455_v30  ;;  %v4911_v38 = vld [vmem:[#allocation14 + $0x318] sm:$0xf] }
 0x2e1   :  { %v5321_v42 = vld [vmem:[#allocation14 + $0x670] sm:$0xf0]  ;;  %v5972_v39 = vld [vmem:[#allocation14 + $0x334] sm:$0xf0] }
 0x2e2   :  { %3017 = vmatpush.bf16.msra.mxu1 %v5164_v16  ;;  %2992 = vmatpush.bf16.msrb.mxu3 %v4620_v21  ;;  %v5871_v44 = vld [vmem:[#allocation14 + $0x14] sm:$0xf]  ;;  %v5324_v58 = vor.u32 %v6071_v40, %v5321_v42  ;;  %v5264_v16 = vor.u32 %v6060_v50, %v5263_v6  ;;  %v4720_v21 = vor.u32 %v5924_v18, %v4719_v15  ;;  %v5167_v40 = vld [vmem:[#allocation14 + $0x518] sm:$0xf] }
 0x2e3   :  { %v4521_v51 = vld [vmem:[#allocation14 + $0x30] sm:$0xf0]  ;;  %v6036_v42 = vld [vmem:[#allocation14 + $0x534] sm:$0xf0] }
 0x2e4   :  { %3030 = vmatpush.bf16.msra.mxu2 %v5420_v46  ;;  %3005 = vmatpush.bf16.msra.mxu0 %v4876_v22  ;;  %v5935_v12 = vld [vmem:[#allocation14 + $0x214] sm:$0xf]  ;;  %v4524_v8 = vor.u32 %v5871_v44, %v4521_v51  ;;  %v5520_v46 = vor.u32 %v6124_v43, %v5519_v9  ;;  %v4976_v22 = vor.u32 %v5988_v19, %v4975_v17  ;;  %v5423_v44 = vld [vmem:[#allocation14 + $0x718] sm:$0xf] }
 0x2e5   :  { %v4777_v56 = vld [vmem:[#allocation14 + $0x230] sm:$0xf0]  ;;  %v4912_v51 = vor.u32 %v5972_v39, %v4911_v38  ;;  %v6028_v27 = vld [vmem:[#allocation14 + $0x4f4] sm:$0xf0] }
 0x2e6   :  { %3018 = vmatpush.bf16.msra.mxu1 %v5132_v3  ;;  %2993 = vmatpush.bf16.msrb.mxu3 %v4588_v32  ;;  %v5999_v59 = vld [vmem:[#allocation14 + $0x414] sm:$0xf]  ;;  %v4780_v45 = vor.u32 %v5935_v12, %v4777_v56  ;;  %v5232_v3 = vor.u32 %v6052_v52, %v5231_v20  ;;  %v4623_v12 = vld [vmem:[#allocation14 + $0xd8] sm:$0xf] }
 0x2e7   :  { %v5033_v60 = vld [vmem:[#allocation14 + $0x430] sm:$0xf0]  ;;  %v5900_v56 = vld [vmem:[#allocation14 + $0xf4] sm:$0xf0] }
 0x2e8   :  { %3031 = vmatpush.bf16.msra.mxu2 %v5388_v25  ;;  %3006 = vmatpush.bf16.msra.mxu0 %v4844_v5  ;;  %v6063_v63 = vld [vmem:[#allocation14 + $0x614] sm:$0xf]  ;;  %v5036_v10 = vor.u32 %v5999_v59, %v5033_v60  ;;  %v5488_v25 = vor.u32 %v6116_v4, %v5487_v14  ;;  %v4688_v5 = vor.u32 %v5916_v34, %v4687_v23  ;;  %v4879_v60 = vld [vmem:[#allocation14 + $0x2d8] sm:$0xf] }
 0x2e9   :  { %v5289_v0 = vld [vmem:[#allocation14 + $0x630] sm:$0xf0]  ;;  %v5391_v2 = vld [vmem:[#allocation14 + $0x6d8] sm:$0xf]  ;;  %v4624_v50 = vor.u32 %v5900_v56, %v4623_v12 }
 0x2ea   :  { %3019 = vmatpush.bf16.msra.mxu1 %v5100_v35  ;;  %2994 = vmatpush.bf16.msrb.mxu3 %v4556_v53  ;;  %v5292_v11 = vor.u32 %v6063_v63, %v5289_v0  ;;  %v4655_v35 = vld [vmem:[#allocation14 + $0x118] sm:$0xf] }
 0x2eb   :  { %v2750_v32 = vpop.f32.mrf.mxu0  ;;  %v6100_v53 = vld [vmem:[#allocation14 + $0x734] sm:$0xf0] }
 0x2ec   :  { %3032 = vmatpush.bf16.msra.mxu2 %v5356_v24  ;;  %3007 = vmatpush.bf16.msra.mxu0 %v4812_v54  ;;  %v2763_v7 = vpop.f32.mrf.mxu1  ;;  %v5908_v24 = vld [vmem:[#allocation14 + $0x134] sm:$0xf0] }
 0x2ed   :  { %v4656_v54 = vor.u32 %v5908_v24, %v4655_v35  ;;  %v5964_v63 = vld [vmem:[#allocation14 + $0x2f4] sm:$0xf0] }
 0x2ee   :  { %3020 = vmatpush.bf16.msra.mxu1 %v5068_v57  ;;  %2995 = vmatpush.bf16.msrb.mxu3 %v4524_v8  ;;  %v5168_v57 = vor.u32 %v6036_v42, %v5167_v40  ;;  %v5135_v0 = vld [vmem:[#allocation14 + $0x4d8] sm:$0xf]  ;;  %v4880_v9 = vor.u32 %v5964_v63, %v4879_v60  ;;  %v4753_v63 = vld [vmem:[#allocation14 + $0x1f8] sm:$0xf0] }
 0x2ef   :  { %v6092_v6 = vld [vmem:[#allocation14 + $0x6f4] sm:$0xf0] }
 0x2f0   :  { %3033 = vmatpush.bf16.msra.mxu2 %v5324_v58  ;;  %3008 = vmatpush.bf16.msra.mxu0 %v4780_v45  ;;  %v5424_v58 = vor.u32 %v6100_v53, %v5423_v44  ;;  %v4847_v15 = vld [vmem:[#allocation14 + $0x298] sm:$0xf] }
 0x2f1   :  { %2996 = vmatmul.bf16.vlgmr.msrb.gmra.mxu3 %v6886_v47  ;;  %v2737_v59 = vpop.f32.mrf.mxu3  ;;  %v5956_v18 = vld [vmem:[#allocation14 + $0x2b4] sm:$0xf0] }
 0x2f2   :  { %3021 = vmatpush.bf16.msra.mxu1 %v5036_v10  ;;  %3040 = vmatpush.bf16.msra.mxu3 %v4752_v41  ;;  %v2751_v1 = vadd.f32 %v2750_v32, %v2737_v59  ;;  %v2776_v61 = vpop.f32.mrf.mxu2  ;;  %v4591_v10 = vld [vmem:[#allocation14 + $0x98] sm:$0xf]  ;;  %v5136_v41 = vor.u32 %v6028_v27, %v5135_v0  ;;  %v5992_v0 = vld [vmem:[#allocation14 + $0x3dc] sm:$0xf] }
 0x2f3   :  { %3009 = vmatmul.bf16.vlgmr.msra.gmra.mxu0 %v6888_v48  ;;  %v2752_v8 = vpop.f32.mrf.mxu0  ;;  %v6020_v17 = vld [vmem:[#allocation14 + $0x4b4] sm:$0xf0]  ;;  %v5265_v27 = vld [vmem:[#allocation14 + $0x5f8] sm:$0xf0] }
 0x2f4   :  { %3034 = vmatpush.bf16.msra.mxu2 %v5292_v11  ;;  %3053 = vmatpush.bf16.msrb.mxu0 %v5008_v13  ;;  %v2764_v45 = vadd.f32 %v2763_v7, %v2751_v1  ;;  %v2765_v43 = vpop.f32.mrf.mxu1  ;;  %v5892_v11 = vld [vmem:[#allocation14 + $0xb4] sm:$0xf0]  ;;  %v5392_v13 = vor.u32 %v6092_v6, %v5391_v2  ;;  %v5009_v1 = vld [vmem:[#allocation14 + $0x3f8] sm:$0xf0] }
 0x2f5   :  { %3022 = vmatmul.bf16.vlgmr.msra.gmra.mxu1 %v6890_v49  ;;  %v5359_v19 = vld [vmem:[#allocation14 + $0x698] sm:$0xf] }
 0x2f6   :  { %3066 = vmatpush.bf16.msrb.mxu1 %v5264_v16  ;;  %3041 = vmatpush.bf16.msra.mxu3 %v4720_v21  ;;  %v5103_v16 = vld [vmem:[#allocation14 + $0x498] sm:$0xf]  ;;  %v4592_v21 = vor.u32 %v5892_v11, %v4591_v10 }
 0x2f7   :  { %3035 = vmatmul.bf16.vlgmr.msra.gmra.mxu2 %v6892_v55  ;;  %v6084_v20 = vld [vmem:[#allocation14 + $0x6b4] sm:$0xf0] }
 0x2f8   :  { %3079 = vmatpush.bf16.msrb.mxu2 %v5520_v46  ;;  %3054 = vmatpush.bf16.msrb.mxu0 %v4976_v22  ;;  %v6918_v46 = vadd.f32 %v2776_v61, %v2764_v45  ;;  %v4559_v52 = vld [vmem:[#allocation14 + $0x58] sm:$0xf]  ;;  %v4848_v22 = vor.u32 %v5956_v18, %v4847_v15  ;;  %v6056_v61 = vld [vmem:[#allocation14 + $0x5dc] sm:$0xf] }
 0x2f9   :  { %v5884_v23 = vld [vmem:[#allocation14 + $0x74] sm:$0xf0]  ;;  %v2739_v26 = vpop.f32.mrf.mxu3 }
 0x2fa   :  { %3067 = vmatpush.bf16.msrb.mxu1 %v5232_v3  ;;  %3042 = vmatpush.bf16.msra.mxu3 %v4688_v5  ;;  %v3146_v14 = vrot.slane %v6918_v46, 4  ;;  %v3194_v4 = vmul.f32 %v6918_v46, %v6918_v46  ;;  %v4815_v34 = vld [vmem:[#allocation14 + $0x258] sm:$0xf]  ;;  %v5104_v3 = vor.u32 %v6020_v17, %v5103_v16  ;;  %v2778_v32 = vpop.f32.mrf.mxu2  ;;  %v4560_v40 = vor.u32 %v5884_v23, %v4559_v52  ;;  %v5984_v52 = vld [vmem:[#allocation14 + $0x39c] sm:$0xf] }
 0x2fb   :  { %v5948_v37 = vld [vmem:[#allocation14 + $0x274] sm:$0xf0]  ;;  %v2802_v7 = vpop.f32.mrf.mxu0  ;;  %v5012_v16 = vor.u32 %v5992_v0, %v5009_v1  ;;  %v6048_v23 = vld [vmem:[#allocation14 + $0x59c] sm:$0xf] }
 0x2fc   :  { %3080 = vmatpush.bf16.msrb.mxu2 %v5488_v25  ;;  %3055 = vmatpush.bf16.msrb.mxu0 %v4944_v33  ;;  %v5360_v25 = vor.u32 %v6084_v20, %v5359_v19  ;;  %v5071_v62 = vld [vmem:[#allocation14 + $0x458] sm:$0xf]  ;;  %v3147_v30 = vadd.f32 %v3146_v14, %v6918_v46  ;;  %v3202_v31 = vrot.slane %v3194_v4, 4  ;;  %v4816_v42 = vor.u32 %v5948_v37, %v4815_v34  ;;  %v2815_v44 = vpop.f32.mrf.mxu1  ;;  %v4721_v20 = vld [vmem:[#allocation14 + $0x1b8] sm:$0xf0] }
 0x2fd   :  { %v6012_v29 = vld [vmem:[#allocation14 + $0x474] sm:$0xf0]  ;;  %v5268_v14 = vor.u32 %v6056_v61, %v5265_v27  ;;  %v5233_v34 = vld [vmem:[#allocation14 + $0x5b8] sm:$0xf0] }
 0x2fe   :  { %3068 = vmatpush.bf16.msrb.mxu1 %v5200_v36  ;;  %3043 = vmatpush.bf16.msra.mxu3 %v4656_v54  ;;  %v5327_v5 = vld [vmem:[#allocation14 + $0x658] sm:$0xf]  ;;  %v3148_v38 = vrot.slane %v3147_v30, 2  ;;  %v3203_v39 = vadd.f32 %v3202_v31, %v3194_v4  ;;  %v5912_v31 = vld [vmem:[#allocation14 + $0x15c] sm:$0xf] }
 0x2ff   :  { %v6076_v33 = vld [vmem:[#allocation14 + $0x674] sm:$0xf0]  ;;  %v5968_v61 = vld [vmem:[#allocation14 + $0x31c] sm:$0xf] }
 0x300   :  { %3081 = vmatpush.bf16.msrb.mxu2 %v5456_v28  ;;  %3056 = vmatpush.bf16.msrb.mxu0 %v4912_v51  ;;  %v4527_v35 = vld [vmem:[#allocation14 + $0x18] sm:$0xf]  ;;  %v5072_v51 = vor.u32 %v6012_v29, %v5071_v62  ;;  %v5328_v12 = vor.u32 %v6076_v33, %v5327_v5  ;;  %v3149_v59 = vadd.f32 %v3148_v38, %v3147_v30  ;;  %v3204_v60 = vrot.slane %v3203_v39, 2  ;;  %v6112_v62 = vld [vmem:[#allocation14 + $0x79c] sm:$0xf] }
 0x301   :  { %v5876_v24 = vld [vmem:[#allocation14 + $0x34] sm:$0xf0]  ;;  %v5489_v29 = vld [vmem:[#allocation14 + $0x7b8] sm:$0xf0] }
 0x302   :  { %3069 = vmatpush.bf16.msrb.mxu1 %v5168_v57  ;;  %3044 = vmatpush.bf16.msra.mxu3 %v4624_v50  ;;  %v4783_v36 = vld [vmem:[#allocation14 + $0x218] sm:$0xf]  ;;  %v3150_v2 = vrot.slane %v3149_v59, 1  ;;  %v3205_v6 = vadd.f32 %v3204_v60, %v3203_v39  ;;  %v4528_v8 = vor.u32 %v5876_v24, %v4527_v35  ;;  %v6120_v50 = vld [vmem:[#allocation14 + $0x7dc] sm:$0xf]  ;;  %v2828_v19 = vpop.f32.mrf.mxu2 }
 0x303   :  { %v5940_v28 = vld [vmem:[#allocation14 + $0x234] sm:$0xf0]  ;;  %v4689_v35 = vld [vmem:[#allocation14 + $0x178] sm:$0xf0] }
 0x304   :  { %3082 = vmatpush.bf16.msrb.mxu2 %v5424_v58  ;;  %3057 = vmatpush.bf16.msrb.mxu0 %v4880_v9  ;;  %v5039_v53 = vld [vmem:[#allocation14 + $0x418] sm:$0xf]  ;;  %v5928_v58 = vld [vmem:[#allocation14 + $0x1dc] sm:$0xf]  ;;  %v4784_v45 = vor.u32 %v5940_v28, %v4783_v36  ;;  %v3151_v15 = vadd.f32 %v3150_v2, %v3149_v59  ;;  %v3206_v18 = vrot.slane %v3205_v6, 1  ;;  %v2817_v37 = vpop.f32.mrf.mxu1  ;;  %v5236_v36 = vor.u32 %v6048_v23, %v5233_v34 }
 0x305   :  { %v6004_v54 = vld [vmem:[#allocation14 + $0x434] sm:$0xf0]  ;;  %v5521_v9 = vld [vmem:[#allocation14 + $0x7f8] sm:$0xf0]  ;;  %v4756_v11 = vor.u32 %v5928_v58, %v4753_v63  ;;  %v5492_v28 = vor.u32 %v6112_v62, %v5489_v29 }
 0x306   :  { %3070 = vmatpush.bf16.msrb.mxu1 %v5136_v41  ;;  %3045 = vmatpush.bf16.msra.mxu3 %v4592_v21  ;;  %v5295_v56 = vld [vmem:[#allocation14 + $0x618] sm:$0xf]  ;;  %v5040_v43 = vor.u32 %v6004_v54, %v5039_v53  ;;  %v2789_v41 = vpop.f32.mrf.mxu3  ;;  %v5524_v4 = vor.u32 %v6120_v50, %v5521_v9  ;;  %v2804_v21 = vpop.f32.mrf.mxu0  ;;  %v5976_v24 = vld [vmem:[#allocation14 + $0x35c] sm:$0xf] }
 0x307   :  { %v6068_v57 = vld [vmem:[#allocation14 + $0x634] sm:$0xf0]  ;;  %v2803_v17 = vadd.f32 %v2802_v7, %v2789_v41  ;;  %v4945_v38 = vld [vmem:[#allocation14 + $0x378] sm:$0xf0] }
 0x308   :  { %3083 = vmatpush.bf16.msrb.mxu2 %v5392_v13  ;;  %3058 = vmatpush.bf16.msrb.mxu0 %v4848_v22  ;;  %v5296_v10 = vor.u32 %v6068_v57, %v5295_v56  ;;  %v5920_v13 = vld [vmem:[#allocation14 + $0x19c] sm:$0xf]  ;;  %v4948_v0 = vor.u32 %v5976_v24, %v4945_v38 }
 0x309   :  { %v4977_v22 = vld [vmem:[#allocation14 + $0x3b8] sm:$0xf0]  ;;  %v2816_v26 = vadd.f32 %v2815_v44, %v2803_v17  ;;  %v4724_v30 = vor.u32 %v5920_v13, %v4721_v20 }
 0x30a   :  { %3071 = vmatpush.bf16.msrb.mxu1 %v5104_v3  ;;  %3046 = vmatpush.bf16.msra.mxu3 %v4560_v40  ;;  %v3207_v3 = vadd.f32 %v3206_v18, %v3205_v6  ;;  %v4980_v7 = vor.u32 %v5984_v52, %v4977_v22  ;;  %v6040_v39 = vld [vmem:[#allocation14 + $0x55c] sm:$0xf]  ;;  %v2830_v1 = vpop.f32.mrf.mxu2 }
 0x30b   :  { %v6928_v33 = vadd.f32 %v2828_v19, %v2816_v26  ;;  %v5201_v40 = vld [vmem:[#allocation14 + $0x578] sm:$0xf0] }
 0x30c   :  { %3084 = vmatpush.bf16.msrb.mxu2 %v5360_v25  ;;  %3059 = vmatpush.bf16.msrb.mxu0 %v4816_v42  ;;  %v6924_v25 = vmul.f32 0.125, %v3151_v15  ;;  %v3258_v32 = vmul.f32 0.125, %v3207_v3  ;;  %v6104_v54 = vld [vmem:[#allocation14 + $0x75c] sm:$0xf]  ;;  %v5204_v2 = vor.u32 %v6040_v39, %v5201_v40 }
 0x30d   :  { %v3152_v44 = vrot.slane %v6928_v33, 4  ;;  %v3195_v53 = vmul.f32 %v6928_v33, %v6928_v33  ;;  %v5904_v57 = vld [vmem:[#allocation14 + $0x11c] sm:$0xf] }
 0x30e   :  { %3072 = vmatpush.bf16.msrb.mxu1 %v5072_v51  ;;  %3047 = vmatpush.bf16.msra.mxu3 %v4528_v8  ;;  %v3266_v5 = vmul.f32 %v6924_v25, %v6924_v25  ;;  %v5457_v51 = vld [vmem:[#allocation14 + $0x778] sm:$0xf0]  ;;  %v2791_v56 = vpop.f32.mrf.mxu3 }
 0x30f   :  { %v4657_v58 = vld [vmem:[#allocation14 + $0x138] sm:$0xf0]  ;;  %v3153_v60 = vadd.f32 %v3152_v44, %v6928_v33  ;;  %v3208_v63 = vrot.slane %v3195_v53, 4  ;;  %v5460_v6 = vor.u32 %v6104_v54, %v5457_v51 }
 0x310   :  { %3085 = vmatpush.bf16.msrb.mxu2 %v5328_v12  ;;  %3060 = vmatpush.bf16.msrb.mxu0 %v4784_v45  ;;  %v3274_v42 = vsub.f32 %v3258_v32, %v3266_v5  ;;  %v4692_v12 = vor.u32 %v5912_v31, %v4689_v35  ;;  %v4913_v27 = vld [vmem:[#allocation14 + $0x338] sm:$0xf0]  ;;  %v2854_v41 = vpop.f32.mrf.mxu0  ;;  %v4660_v17 = vor.u32 %v5904_v57, %v4657_v58 }
 0x311   :  { %3048 = vmatmul.bf16.vlgmr.msra.gmra.mxu3 %v6886_v47  ;;  %v6032_v8 = vld [vmem:[#allocation14 + $0x51c] sm:$0xf]  ;;  %v4916_v19 = vor.u32 %v5968_v61, %v4913_v27 }
 0x312   :  { %3073 = vmatpush.bf16.msrb.mxu1 %v5040_v43  ;;  %3092 = vmatpush.bf16.msrb.mxu3 %v4756_v11  ;;  %v3282_v59 = vmax.f32 %v3274_v42, 0.0  ;;  %v5169_v45 = vld [vmem:[#allocation14 + $0x538] sm:$0xf0]  ;;  %v3154_v43 = vrot.slane %v3153_v60, 2 }
 0x313   :  { %3061 = vmatmul.bf16.vlgmr.msrb.gmra.mxu0 %v6888_v48  ;;  %v6096_v50 = vld [vmem:[#allocation14 + $0x71c] sm:$0xf] }
 0x314   :  { %3086 = vmatpush.bf16.msrb.mxu2 %v5296_v10  ;;  %3105 = vmatpush.bf16.msra.mxu0 %v5012_v16  ;;  %v6938_v9 = vadd.f32 0.8, %v3282_v59  ;;  %v3209_v10 = vadd.f32 %v3208_v63, %v3195_v53  ;;  %v5425_v11 = vld [vmem:[#allocation14 + $0x738] sm:$0xf0]  ;;  %v3155_v15 = vadd.f32 %v3154_v43, %v3153_v60  ;;  %v2867_v16 = vpop.f32.mrf.mxu1 }
 0x315   :  { %3074 = vmatmul.bf16.vlgmr.msrb.gmra.mxu1 %v6890_v49  ;;  %v5896_v13 = vld [vmem:[#allocation14 + $0xdc] sm:$0xf] }
 0x316   :  { %3118 = vmatpush.bf16.msra.mxu1 %v5268_v14  ;;  %3093 = vmatpush.bf16.msrb.mxu3 %v4724_v30  ;;  %v3210_v18 = vrot.slane %v3209_v10, 2  ;;  %v4625_v20 = vld [vmem:[#allocation14 + $0xf8] sm:$0xf0]  ;;  %v5172_v14 = vor.u32 %v6032_v8, %v5169_v45  ;;  %6224 = vrsqrt.f32 %v6938_v9  ;;  %v3156_v34 = vrot.slane %v3155_v15, 1 }
 0x317   :  { %3087 = vmatmul.bf16.vlgmr.msrb.gmra.mxu2 %v6892_v55  ;;  %v5960_v52 = vld [vmem:[#allocation14 + $0x2dc] sm:$0xf]  ;;  %v4628_v31 = vor.u32 %v5896_v13, %v4625_v20  ;;  %vm3304_vm7 = vweird.f32 %v6938_v9 }
 0x318   :  { %3131 = vmatpush.bf16.msra.mxu2 %v5524_v4  ;;  %3106 = vmatpush.bf16.msra.mxu0 %v4980_v7  ;;  %v5428_v4 = vor.u32 %v6096_v50, %v5425_v11  ;;  %v4881_v21 = vld [vmem:[#allocation14 + $0x2f8] sm:$0xf0]  ;;  %v3211_v3 = vadd.f32 %v3210_v18, %v3209_v10  ;;  %v3157_v29 = vadd.f32 %v3156_v34, %v3155_v15 }
 0x319   :  { %v6024_v22 = vld [vmem:[#allocation14 + $0x4dc] sm:$0xf]  ;;  %v4884_v32 = vor.u32 %v5960_v52, %v4881_v21 }
 0x31a   :  { %3119 = vmatpush.bf16.msra.mxu1 %v5236_v36  ;;  %3094 = vmatpush.bf16.msrb.mxu3 %v4692_v12  ;;  %v5137_v23 = vld [vmem:[#allocation14 + $0x4f8] sm:$0xf0]  ;;  %v3212_v30 = vrot.slane %v3211_v3, 1  ;;  %v2841_v36 = vpop.f32.mrf.mxu3  ;;  %v6941_v42 = vmul.f32 0.125, %v3157_v29  ;;  %v2880_v53 = vpop.f32.mrf.mxu2 }
 0x31b   :  { %v6088_v26 = vld [vmem:[#allocation14 + $0x6dc] sm:$0xf]  ;;  %v5140_v35 = vor.u32 %v6024_v22, %v5137_v23  ;;  %v2855_v44 = vadd.f32 %v2854_v41, %v2841_v36  ;;  %v2856_v12 = vpop.f32.mrf.mxu0 }
 0x31c   :  { %3132 = vmatpush.bf16.msra.mxu2 %v5492_v28  ;;  %3107 = vmatpush.bf16.msra.mxu0 %v4948_v0  ;;  %v5393_v37 = vld [vmem:[#allocation14 + $0x6f8] sm:$0xf0]  ;;  %v3213_v40 = vadd.f32 %v3212_v30, %v3211_v3  ;;  %v6943_v57 = vpop.eup %6224  ;;  %v3267_v59 = vmul.f32 %v6941_v42, %v6941_v42  ;;  %v2869_v63 = vpop.f32.mrf.mxu1 }
 0x31d   :  { %v5888_v62 = vld [vmem:[#allocation14 + $0x9c] sm:$0xf]  ;;  %v5396_v24 = vor.u32 %v6088_v26, %v5393_v37  ;;  %v2868_v60 = vadd.f32 %v2867_v16, %v2855_v44  ;;  %v3299_v13 = vmul.f32 %v6943_v57, %v6938_v9  ;;  %vm3305_vm5 = vweird.f32 %v6943_v57 }
 0x31e   :  { %3120 = vmatpush.bf16.msra.mxu1 %v5204_v2  ;;  %3095 = vmatpush.bf16.msrb.mxu3 %v4660_v17  ;;  %v4593_v5 = vld [vmem:[#allocation14 + $0xb8] sm:$0xf0]  ;;  %v3259_v58 = vmul.f32 0.125, %v3213_v40  ;;  %vm3306_vm9 = vmor %vm3304_vm7, %vm3305_vm5 }
 0x31f   :  { %v5952_v7 = vld [vmem:[#allocation14 + $0x29c] sm:$0xf]  ;;  %v4596_v56 = vor.u32 %v5888_v62, %v4593_v5  ;;  %v6947_v43 = vadd.f32 %v2880_v53, %v2868_v60 }
 0x320   :  { %3133 = vmatpush.bf16.msra.mxu2 %v5460_v6  ;;  %3108 = vmatpush.bf16.msra.mxu0 %v4916_v19  ;;  %v4849_v28 = vld [vmem:[#allocation14 + $0x2b8] sm:$0xf0]  ;;  %v3275_v50 = vsub.f32 %v3259_v58, %v3267_v59 }
 0x321   :  { %v6016_v38 = vld [vmem:[#allocation14 + $0x49c] sm:$0xf]  ;;  %v4852_v0 = vor.u32 %v5952_v7, %v4849_v28  ;;  %v3158_v19 = vrot.slane %v6947_v43, 4  ;;  %v3196_v20 = vmul.f32 %v6947_v43, %v6947_v43 }
 0x322   :  { %3121 = vmatpush.bf16.msra.mxu1 %v5172_v14  ;;  %v5105_v39 = vld [vmem:[#allocation14 + $0x4b8] sm:$0xf0]  ;;  %3096 = vmatpush.bf16.msrb.mxu3 %v4628_v31  ;;  %v3283_v17 = vmax.f32 %v3275_v50, 0.0  ;;  %v2843_v23 = vpop.f32.mrf.mxu3  ;;  %v2882_v30 = vpop.f32.mrf.mxu2 }
 0x323   :  { %v6080_v54 = vld [vmem:[#allocation14 + $0x69c] sm:$0xf]  ;;  %v5108_v27 = vor.u32 %v6016_v38, %v5105_v39  ;;  %v3159_v62 = vadd.f32 %v3158_v19, %v6947_v43  ;;  %v3214_v29 = vrot.slane %v3196_v20, 4 }
 0x324   :  { %3134 = vmatpush.bf16.msra.mxu2 %v5428_v4  ;;  %v5361_v51 = vld [vmem:[#allocation14 + $0x6b8] sm:$0xf0]  ;;  %3109 = vmatpush.bf16.msra.mxu0 %v4884_v32  ;;  %v3291_v37 = vadd.f32 0.8, %v3283_v17  ;;  %v3300_v32 = vmul.f32 %v6943_v57, %v3299_v13 }
 0x325   :  { %v5880_v1 = vld [vmem:[#allocation14 + $0x5c] sm:$0xf]  ;;  %v5364_v2 = vor.u32 %v6080_v54, %v5361_v51  ;;  %v3160_v7 = vrot.slane %v3159_v62, 2 }
 0x326   :  { %v4561_v61 = vld [vmem:[#allocation14 + $0x78] sm:$0xf0]  ;;  %3122 = vmatpush.bf16.msra.mxu1 %v5140_v35  ;;  %3097 = vmatpush.bf16.msrb.mxu3 %v4596_v56  ;;  %6226 = vrsqrt.f32 %v3291_v37  ;;  %v3215_v35 = vadd.f32 %v3214_v29, %v3196_v20  ;;  %v3301_v40 = vmul.f32 0.5, %v3300_v32  ;;  %vm3314_vm10 = vweird.f32 %v3291_v37 }
 0x327   :  { %v5944_v6 = vld [vmem:[#allocation14 + $0x25c] sm:$0xf]  ;;  %v4564_v15 = vor.u32 %v5880_v1, %v4561_v61  ;;  %v3161_v38 = vadd.f32 %v3160_v7, %v3159_v62 }
 0x328   :  { %3135 = vmatpush.bf16.msra.mxu2 %v5396_v24  ;;  %v4817_v8 = vld [vmem:[#allocation14 + $0x278] sm:$0xf0]  ;;  %3110 = vmatpush.bf16.msra.mxu0 %v4852_v0  ;;  %v3216_v39 = vrot.slane %v3215_v35, 2  ;;  %v3302_v56 = vsub.f32 1.5, %v3301_v40  ;;  %v6962_v0 = vld [vmem:[#allocation16] sm:$0xff] }
 0x329   :  { %v6008_v45 = vld [vmem:[#allocation14 + $0x45c] sm:$0xf]  ;;  %v4820_v52 = vor.u32 %v5944_v6, %v4817_v8  ;;  %v3162_v44 = vrot.slane %v3161_v38, 1 }
 0x32a   :  { %v5073_v10 = vld [vmem:[#allocation14 + $0x478] sm:$0xf0]  ;;  %3123 = vmatpush.bf16.msra.mxu1 %v5108_v27  ;;  %3098 = vmatpush.bf16.msrb.mxu3 %v4564_v15  ;;  %v3217_v53 = vadd.f32 %v3216_v39, %v3215_v35  ;;  %v3303_v1 = vmul.f32 %v6943_v57, %v3302_v56 }
 0x32b   :  { %v6072_v11 = vld [vmem:[#allocation14 + $0x65c] sm:$0xf]  ;;  %v5076_v21 = vor.u32 %v6008_v45, %v5073_v10  ;;  %v3163_v51 = vadd.f32 %v3162_v44, %v3161_v38 }
 0x32c   :  { %v5329_v41 = vld [vmem:[#allocation14 + $0x678] sm:$0xf0]  ;;  %3136 = vmatpush.bf16.msra.mxu2 %v5364_v2  ;;  %3111 = vmatpush.bf16.msra.mxu0 %v4820_v52  ;;  %v6227_v54 = vpop.eup %6226  ;;  %v3218_v12 = vrot.slane %v3217_v53, 1  ;;  %v3307_v8 = vsel %vm3306_vm9, %v6943_v57, %v3303_v1 }
 0x32d   :  { %v5872_v18 = vld [vmem:[#allocation14 + $0x1c] sm:$0xf]  ;;  %v5332_v22 = vor.u32 %v6072_v11, %v5329_v41  ;;  %v3309_v58 = vmul.f32 %v6227_v54, %v3291_v37  ;;  %v6960_v63 = vmul.f32 0.125, %v3163_v51  ;;  %vm3315_vm8 = vweird.f32 %v6227_v54 }
 0x32e   :  { %v4529_v16 = vld [vmem:[#allocation14 + $0x38] sm:$0xf0]  ;;  %3124 = vmatpush.bf16.msra.mxu1 %v5076_v21  ;;  %v3219_v60 = vadd.f32 %v3218_v12, %v3217_v53  ;;  %vm3316_vm11 = vmor %vm3314_vm10, %vm3315_vm8  ;;  %vm3429_vm8 = vcmask 1044484  }
 0x32f   :  { %v5936_v14 = vld [vmem:[#allocation14 + $0x21c] sm:$0xf]  ;;  %v4532_v5 = vor.u32 %v5872_v18, %v4529_v16  ;;  %v3310_v59 = vmul.f32 %v6227_v54, %v3309_v58  ;;  %v3268_v2 = vmul.f32 %v6960_v63, %v6960_v63 }
 0x330   :  { %v4785_v4 = vld [vmem:[#allocation14 + $0x238] sm:$0xf0]  ;;  %3137 = vmatpush.bf16.msra.mxu2 %v5332_v22  ;;  %v3260_v27 = vmul.f32 0.125, %v3219_v60 }
 0x331   :  { %v6000_v34 = vld [vmem:[#allocation14 + $0x41c] sm:$0xf]  ;;  %v4788_v24 = vor.u32 %v5936_v14, %v4785_v4  ;;  %3099 = vmatpush.bf16.msrb.mxu3 %v4532_v5  ;;  %v3311_v61 = vmul.f32 0.5, %v3310_v59 }
 0x332   :  { %v5041_v3 = vld [vmem:[#allocation14 + $0x438] sm:$0xf0]  ;;  %v2919_v6 = vpop.f32.mrf.mxu1  ;;  %v3276_v11 = vsub.f32 %v3260_v27, %v3268_v2 }
 0x333   :  { %v6064_v26 = vld [vmem:[#allocation14 + $0x61c] sm:$0xf]  ;;  %v5044_v36 = vor.u32 %v6000_v34, %v5041_v3  ;;  %3112 = vmatpush.bf16.msra.mxu0 %v4788_v24 }
 0x334   :  { %v5297_v31 = vld [vmem:[#allocation14 + $0x638] sm:$0xf0]  ;;  %3100 = vmatmul.bf16.vlgmr.msrb.gmra.mxu3 %v6886_v47  ;;  %v3312_v47 = vsub.f32 1.5, %v3311_v61  ;;  %v2893_v41 = vpop.f32.mrf.mxu3  ;;  %v3284_v19 = vmax.f32 %v3276_v11, 0.0 }
 0x335   :  { %v5300_v28 = vor.u32 %v6064_v26, %v5297_v31  ;;  %3125 = vmatpush.bf16.msra.mxu1 %v5044_v36 }
 0x336   :  { %3113 = vmatmul.bf16.vlgmr.msra.gmra.mxu0 %v6888_v48  ;;  %v2906_v48 = vpop.f32.mrf.mxu0  ;;  %v3313_v45 = vmul.f32 %v6227_v54, %v3312_v47  ;;  %v3292_v21 = vadd.f32 0.8, %v3284_v19 }
 0x337   :  { %3138 = vmatpush.bf16.msra.mxu2 %v5300_v28  ;;  %v2907_v15 = vadd.f32 %v2906_v48, %v2893_v41 }
 0x338   :  { %3126 = vmatmul.bf16.vlgmr.msra.gmra.mxu1 %v6890_v49  ;;  %v3379_v49 = vperm.slane %v6962_v0, 0  ;;  %v3317_v50 = vsel %vm3316_vm11, %v6227_v54, %v3313_v45  ;;  %6228 = vrsqrt.f32 %v3292_v21  ;;  %vm3324_vm12 = vweird.f32 %v3292_v21 }
 0x339   :  { %v2920_v20 = vadd.f32 %v2919_v6, %v2907_v15 }
 0x33a   :  { %3139 = vmatmul.bf16.vlgmr.msra.gmra.mxu2 %v6892_v55  ;;  %v3380_v55 = vperm.slane %v6962_v0, 1  ;;  %v6972_v9 = vmul.f32 %v3379_v49, %v3307_v8  ;;  %v2932_v18 = vpop.f32.mrf.mxu2  ;;  %v2921_v52 = vpop.f32.mrf.mxu1 }
 0x33b   :  { %v6983_v4 = vadd.f32 %v2932_v18, %v2920_v20  ;;  %v3382_v20 = vperm.slane %v6962_v0, 3 }
 0x33c   :  { %v6974_v10 = vmul.f32 %v3380_v55, %v3317_v50  ;;  %v3403_v17 = vmul.f32 %v6972_v9, %v6924_v25  ;;  %v2895_v23 = vpop.f32.mrf.mxu3  ;;  %v3381_v50 = vperm.slane %v6962_v0, 2 }
 0x33d   :  { %v3164_v22 = vrot.slane %v6983_v4, 4 }
 0x33e   :  { %v3404_v13 = vmul.f32 %v6974_v10, %v6941_v42  ;;  %v2908_v16 = vpop.f32.mrf.mxu0  ;;  %v3197_v42 = vmul.f32 %v6983_v4, %v6983_v4  ;;  %v6229_v32 = vpop.eup %6228 }
 0x33f   :  { %v3165_v34 = vadd.f32 %v3164_v22, %v6983_v4  ;;  %v3319_v36 = vmul.f32 %v6229_v32, %v3292_v21 }
 0x340   :  { %v3419_v57 = vrot.slane %v3404_v13, 7  ;;  %v3220_v3 = vrot.slane %v3197_v42, 4 }
 0x341   :  { %v3166_v26 = vrot.slane %v3165_v34, 2  ;;  %v3320_v40 = vmul.f32 %v6229_v32, %v3319_v36 }
 0x342   :  { %v6981_v14 = vsel %vm501_vm6, %v3403_v17, %v3419_v57  ;;  %v2934_v25 = vpop.f32.mrf.mxu2  ;;  %v3221_v37 = vadd.f32 %v3220_v3, %v3197_v42  ;;  %vm3325_vm6 = vweird.f32 %v6229_v32 }
 0x343   :  { %v3167_v62 = vadd.f32 %v3166_v26, %v3165_v34  ;;  %v3321_v12 = vmul.f32 0.5, %v3320_v40  ;;  %vm3326_vm13 = vmor %vm3324_vm12, %vm3325_vm6 }
 0x344   :  { %v3222_v29 = vrot.slane %v3221_v37, 2 }
 0x345   :  { %v3168_v30 = vrot.slane %v3167_v62, 1  ;;  %v3322_v60 = vsub.f32 1.5, %v3321_v12 }
 0x346   :  { %v3223_v31 = vadd.f32 %v3222_v29, %v3221_v37 }
 0x347   :  { %v3169_v5 = vadd.f32 %v3168_v30, %v3167_v62  ;;  %v3323_v55 = vmul.f32 %v6229_v32, %v3322_v60 }
 0x348   :  { %v3224_v7 = vrot.slane %v3223_v31, 1 }
 0x349   :  { %v3253_v24 = vmul.f32 0.125, %v3169_v5  ;;  %v3327_v15 = vsel %vm3326_vm13, %v6229_v32, %v3323_v55 }
 0x34a   :  { %v3225_v35 = vadd.f32 %v3224_v7, %v3223_v31  ;;  %v6996_v19 = vmul.f32 %v3381_v50, %v3327_v15 }
 0x34b   :  { %v3269_v38 = vmul.f32 %v3253_v24, %v3253_v24 }
 0x34c   :  { %v3261_v28 = vmul.f32 0.125, %v3225_v35  ;;  %v3405_v3 = vmul.f32 %v6996_v19, %v6960_v63 }
 0x34e   :  { %v3277_v39 = vsub.f32 %v3261_v28, %v3269_v38  ;;  %v3420_v29 = vrot.slane %v3405_v3, 6 }
 0x350   :  { %v2958_v44 = vpop.f32.mrf.mxu0  ;;  %v3285_v53 = vmax.f32 %v3277_v39, 0.0 }
 0x352   :  { %v2971_v54 = vpop.f32.mrf.mxu1  ;;  %v3293_v51 = vadd.f32 0.8, %v3285_v53 }
 0x354   :  { %6230 = vrsqrt.f32 %v3293_v51  ;;  %v2945_v56 = vpop.f32.mrf.mxu3  ;;  %vm3334_vm15 = vweird.f32 %v3293_v51 }
 0x355   :  { %v2959_v58 = vadd.f32 %v2958_v44, %v2945_v56 }
 0x357   :  { %v2972_v61 = vadd.f32 %v2971_v54, %v2959_v58 }
 0x358   :  { %v2960_v1 = vpop.f32.mrf.mxu0 }
 0x35a   :  { %v2984_v59 = vpop.f32.mrf.mxu2  ;;  %v2973_v47 = vpop.f32.mrf.mxu1 }
 0x35b   :  { %v6231_v48 = vpop.eup %6230  ;;  %v6989_v49 = vadd.f32 %v2984_v59, %v2972_v61 }
 0x35c   :  { %v3329_v27 = vmul.f32 %v6231_v48, %v3293_v51  ;;  %v2947_v45 = vpop.f32.mrf.mxu3  ;;  %vm3335_vm14 = vweird.f32 %v6231_v48 }
 0x35d   :  { %v3170_v2 = vrot.slane %v6989_v49, 4  ;;  %v3198_v6 = vmul.f32 %v6989_v49, %v6989_v49  ;;  %vm3336_vm0 = vmor %vm3334_vm15, %vm3335_vm14  ;;  %vm3431_vm14 = vcmask 1046534   ;;  %vm3433_vm15 = vcmask 1045508  }
 0x35e   :  { %v3330_v8 = vmul.f32 %v6231_v48, %v3329_v27 }
 0x35f   :  { %v3171_v11 = vadd.f32 %v3170_v2, %v6989_v49  ;;  %v3226_v41 = vrot.slane %v3198_v6, 4 }
 0x360   :  { %v3331_v18 = vmul.f32 0.5, %v3330_v8 }
 0x361   :  { %v3172_v16 = vrot.slane %v3171_v11, 2  ;;  %v3227_v17 = vadd.f32 %v3226_v41, %v3198_v6 }
 0x362   :  { %v2986_v13 = vpop.f32.mrf.mxu2  ;;  %v3332_v57 = vsub.f32 1.5, %v3331_v18 }
 0x363   :  { %v3173_v52 = vadd.f32 %v3172_v16, %v3171_v11  ;;  %v3228_v21 = vrot.slane %v3227_v17, 2 }
 0x364   :  { %v3333_v22 = vmul.f32 %v6231_v48, %v3332_v57 }
 0x365   :  { %v3174_v42 = vrot.slane %v3173_v52, 1  ;;  %v3229_v23 = vadd.f32 %v3228_v21, %v3227_v17 }
 0x366   :  { %v3337_v34 = vsel %vm3336_vm0, %v6231_v48, %v3333_v22  ;;  %vm3435_vm0 = vcmask 1043456  }
 0x367   :  { %v7001_v25 = vmul.f32 %v3382_v20, %v3337_v34  ;;  %v3175_v26 = vadd.f32 %v3174_v42, %v3173_v52  ;;  %v3230_v37 = vrot.slane %v3229_v23, 1 }
 0x369   :  { %v3406_v62 = vmul.f32 %v7001_v25, %v3253_v24  ;;  %v3231_v31 = vadd.f32 %v3230_v37, %v3229_v23  ;;  %v7004_v32 = vmul.f32 0.125, %v3175_v26 }
 0x36b   :  { %v3421_v30 = vrot.slane %v3406_v62, 5  ;;  %v3262_v36 = vmul.f32 0.125, %v3231_v31  ;;  %v3270_v63 = vmul.f32 %v7004_v32, %v7004_v32 }
 0x36d   :  { %v3427_v5 = vsel %vm1153_vm3, %v3420_v29, %v3421_v30  ;;  %v3278_v38 = vsub.f32 %v3262_v36, %v3270_v63 }
 0x36e   :  { %v7009_v7 = vsel %vm1155_vm4, %v6981_v14, %v3427_v5 }
 0x36f   :  { %v3286_v53 = vmax.f32 %v3278_v38, 0.0  ;;  %v3383_v38 = vperm.slane %v6962_v0, 4 }
 0x370   :  { %v3010_v35 = vpop.f32.mrf.mxu0 }
 0x371   :  { %v3294_v56 = vadd.f32 0.8, %v3286_v53 }
 0x372   :  { %v3023_v28 = vpop.f32.mrf.mxu1 }
 0x373   :  { %6232 = vrsqrt.f32 %v3294_v56  ;;  %vm3344_vm2 = vweird.f32 %v3294_v56 }
 0x374   :  { %v2997_v39 = vpop.f32.mrf.mxu3 }
 0x375   :  { %v3011_v24 = vadd.f32 %v3010_v35, %v2997_v39 }
 0x377   :  { %v3024_v54 = vadd.f32 %v3023_v28, %v3011_v24 }
 0x378   :  { %v3012_v44 = vpop.f32.mrf.mxu0 }
 0x379   :  { %v6233_v8 = vpop.eup %6232 }
 0x37a   :  { %v3036_v40 = vpop.f32.mrf.mxu2  ;;  %v3025_v51 = vpop.f32.mrf.mxu1  ;;  %v3339_v13 = vmul.f32 %v6233_v8, %v3294_v56  ;;  %vm3345_vm1 = vweird.f32 %v6233_v8 }
 0x37b   :  { %v7013_v12 = vadd.f32 %v3036_v40, %v3024_v54  ;;  %vm3346_vm3 = vmor %vm3344_vm2, %vm3345_vm1 }
 0x37c   :  { %v2999_v59 = vpop.f32.mrf.mxu3  ;;  %v3340_v17 = vmul.f32 %v6233_v8, %v3339_v13  ;;  %v6132_v13 = vld [vmem:[#allocation19 + $0x38] sm:$0xff] }
 0x37d   :  { %v3176_v14 = vrot.slane %v7013_v12, 4  ;;  %v3199_v58 = vmul.f32 %v7013_v12, %v7013_v12  ;;  %v3384_v59 = vperm.slane %v6962_v0, 5  ;;  %4020 = vmatpush.bf16.msra.mxu3 %v6132_v13 }
 0x37e   :  { %v3341_v22 = vmul.f32 0.5, %v3340_v17 }
 0x37f   :  { %v3177_v60 = vadd.f32 %v3176_v14, %v7013_v12  ;;  %v3232_v1 = vrot.slane %v3199_v58, 4 }
 0x380   :  { %v3342_v3 = vsub.f32 1.5, %v3341_v22 }
 0x381   :  { %v3178_v47 = vrot.slane %v3177_v60, 2  ;;  %v3233_v48 = vadd.f32 %v3232_v1, %v3199_v58 }
 0x382   :  { %v3038_v61 = vpop.f32.mrf.mxu2  ;;  %v3343_v31 = vmul.f32 %v6233_v8, %v3342_v3  ;;  %v6155_v3 = vld [vmem:[#allocation19 + $0xf0] sm:$0xff] }
 0x383   :  { %v3179_v55 = vadd.f32 %v3178_v47, %v3177_v60  ;;  %v3234_v27 = vrot.slane %v3233_v48, 2 }
 0x384   :  { %v3347_v44 = vsel %vm3346_vm3, %v6233_v8, %v3343_v31  ;;  %v6154_v31 = vld [vmem:[#allocation19 + $0xe8] sm:$0xff] }
 0x385   :  { %v3180_v2 = vrot.slane %v3179_v55, 1  ;;  %v3235_v6 = vadd.f32 %v3234_v27, %v3233_v48  ;;  %v7026_v58 = vmul.f32 %v3383_v38, %v3347_v44  ;;  %v6153_v44 = vld [vmem:[#allocation19 + $0xe0] sm:$0xff] }
 0x387   :  { %v3181_v45 = vadd.f32 %v3180_v2, %v3179_v55  ;;  %v3236_v50 = vrot.slane %v3235_v6, 1  ;;  %v3407_v55 = vmul.f32 %v7026_v58, %v7004_v32 }
 0x389   :  { %v3237_v11 = vadd.f32 %v3236_v50, %v3235_v6  ;;  %v3255_v41 = vmul.f32 0.125, %v3181_v45 }
 0x38b   :  { %v3263_v15 = vmul.f32 0.125, %v3237_v11  ;;  %v3271_v18 = vmul.f32 %v3255_v41, %v3255_v41 }
 0x38d   :  { %v3279_v16 = vsub.f32 %v3263_v15, %v3271_v18  ;;  %v6140_v15 = vld [vmem:[#allocation19 + $0x78] sm:$0xff] }
 0x38e   :  { %v6148_v18 = vld [vmem:[#allocation19 + $0xb8] sm:$0xff]  ;;  %4033 = vmatpush.bf16.msrb.mxu0 %v6140_v15 }
 0x38f   :  { %v3287_v20 = vmax.f32 %v3279_v16, 0.0  ;;  %v3422_v16 = vrot.slane %v3407_v55, 4  ;;  %4046 = vmatpush.bf16.msrb.mxu1 %v6148_v18 }
 0x390   :  { %v3062_v57 = vpop.f32.mrf.mxu0 }
 0x391   :  { %v3295_v21 = vadd.f32 0.8, %v3287_v20  ;;  %v6156_v20 = vld [vmem:[#allocation19 + $0xf8] sm:$0xff] }
 0x392   :  { %v3075_v52 = vpop.f32.mrf.mxu1  ;;  %4059 = vmatpush.bf16.msrb.mxu2 %v6156_v20  ;;  %v6134_v20 = vld [vmem:[#allocation19 + $0x48] sm:$0xff] }
 0x393   :  { %6234 = vrsqrt.f32 %v3295_v21  ;;  %vm3354_vm5 = vweird.f32 %v3295_v21 }
 0x394   :  { %v3049_v42 = vpop.f32.mrf.mxu3 }
 0x395   :  { %v3063_v23 = vadd.f32 %v3062_v57, %v3049_v42  ;;  %v6131_v42 = vld [vmem:[#allocation19 + $0x30] sm:$0xff] }
 0x396   :  { %4021 = vmatpush.bf16.msra.mxu3 %v6131_v42  ;;  %4060 = vmatpush.bf16.msrb.mxu2 %v6155_v3  ;;  %v6125_v3 = vld [vmem:[#allocation19] sm:$0xff] }
 0x397   :  { %v3076_v37 = vadd.f32 %v3075_v52, %v3063_v23  ;;  %v6139_v23 = vld [vmem:[#allocation19 + $0x70] sm:$0xff] }
 0x398   :  { %v3064_v26 = vpop.f32.mrf.mxu0  ;;  %4034 = vmatpush.bf16.msrb.mxu0 %v6139_v23 }
 0x399   :  { %v6235_v29 = vpop.eup %6234  ;;  %v6130_v26 = vld [vmem:[#allocation19 + $0x28] sm:$0xff] }
 0x39a   :  { %v3088_v34 = vpop.f32.mrf.mxu2  ;;  %v3077_v62 = vpop.f32.mrf.mxu1  ;;  %v3349_v5 = vmul.f32 %v6235_v29, %v3295_v21  ;;  %vm3355_vm4 = vweird.f32 %v6235_v29  ;;  %4022 = vmatpush.bf16.msra.mxu3 %v6130_v26  ;;  %4061 = vmatpush.bf16.msrb.mxu2 %v6154_v31  ;;  %v6141_v26 = vld [vmem:[#allocation19 + $0x80] sm:$0xff]  ;;  %v6172_v31 = vld [vmem:[#allocation19 + $0x178] sm:$0xff] }
 0x39b   :  { %v7019_v30 = vadd.f32 %v3088_v34, %v3076_v37  ;;  %vm3356_vm7 = vmor %vm3354_vm5, %vm3355_vm4  ;;  %v6147_v34 = vld [vmem:[#allocation19 + $0xb0] sm:$0xff]  ;;  %v6138_v37 = vld [vmem:[#allocation19 + $0x68] sm:$0xff] }
 0x39c   :  { %v3350_v63 = vmul.f32 %v6235_v29, %v3349_v5  ;;  %v3051_v28 = vpop.f32.mrf.mxu3  ;;  %4047 = vmatpush.bf16.msrb.mxu1 %v6147_v34  ;;  %v6146_v62 = vld [vmem:[#allocation19 + $0xa8] sm:$0xff]  ;;  %4035 = vmatpush.bf16.msrb.mxu0 %v6138_v37 }
 0x39d   :  { %v3182_v35 = vrot.slane %v7019_v30, 4  ;;  %v3200_v36 = vmul.f32 %v7019_v30, %v7019_v30 }
 0x39e   :  { %v3351_v53 = vmul.f32 0.5, %v3350_v63  ;;  %4062 = vmatpush.bf16.msrb.mxu2 %v6153_v44 }
 0x39f   :  { %v3183_v39 = vadd.f32 %v3182_v35, %v7019_v30  ;;  %v3238_v24 = vrot.slane %v3200_v36, 4 }
 0x3a0   :  { %v3352_v14 = vsub.f32 1.5, %v3351_v53  ;;  %4048 = vmatpush.bf16.msrb.mxu1 %v6146_v62  ;;  %v6149_v62 = vld [vmem:[#allocation19 + $0xc0] sm:$0xff] }
 0x3a1   :  { %v3184_v54 = vrot.slane %v3183_v39, 2  ;;  %v3239_v51 = vadd.f32 %v3238_v24, %v3200_v36  ;;  %v6137_v24 = vld [vmem:[#allocation19 + $0x60] sm:$0xff] }
 0x3a2   :  { %v3090_v40 = vpop.f32.mrf.mxu2  ;;  %v3353_v1 = vmul.f32 %v6235_v29, %v3352_v14  ;;  %4036 = vmatpush.bf16.msrb.mxu0 %v6137_v24  ;;  %v6171_v24 = vld [vmem:[#allocation19 + $0x170] sm:$0xff] }
 0x3a3   :  { %v3185_v56 = vadd.f32 %v3184_v54, %v3183_v39  ;;  %v3240_v60 = vrot.slane %v3239_v51, 2  ;;  %v6129_v39 = vld [vmem:[#allocation19 + $0x20] sm:$0xff] }
 0x3a4   :  { %v3357_v48 = vsel %vm3356_vm7, %v6235_v29, %v3353_v1  ;;  %v6145_v40 = vld [vmem:[#allocation19 + $0xa0] sm:$0xff]  ;;  %4023 = vmatpush.bf16.msra.mxu3 %v6129_v39  ;;  %v6163_v39 = vld [vmem:[#allocation19 + $0x130] sm:$0xff] }
 0x3a5   :  { %v3186_v61 = vrot.slane %v3185_v56, 1  ;;  %v3241_v47 = vadd.f32 %v3240_v60, %v3239_v51  ;;  %v3400_v27 = vmul.f32 %v3384_v59, %v3357_v48  ;;  %4049 = vmatpush.bf16.msrb.mxu1 %v6145_v40  ;;  %v6128_v59 = vld [vmem:[#allocation19 + $0x18] sm:$0xff]  ;;  %v6179_v40 = vld [vmem:[#allocation19 + $0x1b0] sm:$0xff] }
 0x3a6   :  { %v6144_v60 = vld [vmem:[#allocation19 + $0x98] sm:$0xff] }
 0x3a7   :  { %v3187_v2 = vadd.f32 %v3186_v61, %v3185_v56  ;;  %v3242_v6 = vrot.slane %v3241_v47, 1  ;;  %v3408_v8 = vmul.f32 %v3400_v27, %v3255_v41  ;;  %v3444_v45 = vperm.slane %v3400_v27, 0  ;;  %v6136_v56 = vld [vmem:[#allocation19 + $0x58] sm:$0xff] }
 0x3a8   :  { %v6152_v61 = vld [vmem:[#allocation19 + $0xd8] sm:$0xff]  ;;  %4024 = vmatpush.bf16.msra.mxu3 %v6128_v59  ;;  %4037 = vmatpush.bf16.msrb.mxu0 %v6136_v56  ;;  %v6162_v56 = vld [vmem:[#allocation19 + $0x128] sm:$0xff] }
 0x3a9   :  { %v3243_v50 = vadd.f32 %v3242_v6, %v3241_v47  ;;  %v7031_v11 = vmul.f32 0.125, %v3187_v2  ;;  %v3423_v17 = vrot.slane %v3408_v8, 3  ;;  %v7034_v57 = vmul.f32 %v3444_v45, %v7013_v12  ;;  %4050 = vmatpush.bf16.msrb.mxu1 %v6144_v60  ;;  %4063 = vmatpush.bf16.msrb.mxu2 %v6152_v61  ;;  %v6127_v6 = vld [vmem:[#allocation19 + $0x10] sm:$0xff]  ;;  %v6170_v60 = vld [vmem:[#allocation19 + $0x168] sm:$0xff] }
 0x3aa   :  { %v6135_v8 = vld [vmem:[#allocation19 + $0x50] sm:$0xff]  ;;  %v6186_v61 = vld [vmem:[#allocation19 + $0x1e8] sm:$0xff] }
 0x3ab   :  { %v7036_v32 = vsel %vm3429_vm8, %v3422_v16, %v3423_v17  ;;  %v3264_v41 = vmul.f32 0.125, %v3243_v50  ;;  %v3272_v21 = vmul.f32 %v7031_v11, %v7031_v11  ;;  %v6143_v45 = vld [vmem:[#allocation19 + $0x90] sm:$0xff]  ;;  %v6126_v17 = vld [vmem:[#allocation19 + $0x8] sm:$0xff] }
 0x3ac   :  { %v6151_v50 = vld [vmem:[#allocation19 + $0xd0] sm:$0xff]  ;;  %4025 = vmatpush.bf16.msra.mxu3 %v6127_v6  ;;  %4038 = vmatpush.bf16.msrb.mxu0 %v6135_v8 }
 0x3ad   :  { %v3280_v12 = vsub.f32 %v3264_v41, %v3272_v21  ;;  %4051 = vmatpush.bf16.msrb.mxu1 %v6143_v45  ;;  %4064 = vmatpush.bf16.msrb.mxu2 %v6151_v50  ;;  %v6150_v41 = vld [vmem:[#allocation19 + $0xc8] sm:$0xff]  ;;  %v6160_v50 = vld [vmem:[#allocation19 + $0x118] sm:$0xff] }
 0x3af   :  { %v3288_v63 = vmax.f32 %v3280_v12, 0.0  ;;  %v6133_v12 = vld [vmem:[#allocation19 + $0x40] sm:$0xff] }
 0x3b0   :  { %4026 = vmatpush.bf16.msra.mxu3 %v6126_v17  ;;  %4039 = vmatpush.bf16.msrb.mxu0 %v6134_v20  ;;  %v3385_v17 = vperm.slane %v6962_v0, 6  ;;  %v6159_v20 = vld [vmem:[#allocation19 + $0x110] sm:$0xff] }
 0x3b1   :  { %v7042_v54 = vadd.f32 0.8, %v3288_v63  ;;  %4065 = vmatpush.bf16.msrb.mxu2 %v6150_v41  ;;  %v6188_v63 = vld [vmem:[#allocation19 + $0x1f8] sm:$0xff] }
 0x3b3   :  { %v3114_v52 = vpop.f32.mrf.mxu0  ;;  %6236 = vrsqrt.f32 %v7042_v54  ;;  %vm3364_vm10 = vweird.f32 %v7042_v54 }
 0x3b4   :  { %4027 = vmatpush.bf16.msra.mxu3 %v6125_v3  ;;  %4040 = vmatpush.bf16.msrb.mxu0 %v6133_v12 }
 0x3b5   :  { %v3127_v22 = vpop.f32.mrf.mxu1  ;;  %4066 = vmatpush.bf16.msrb.mxu2 %v6149_v62 }
 0x3b7   :  { %v3101_v29 = vpop.f32.mrf.mxu3 }
 0x3b8   :  { %v3115_v5 = vadd.f32 %v3114_v52, %v3101_v29  ;;  %v6142_v52 = vld [vmem:[#allocation19 + $0x88] sm:$0xff]  ;;  %v6164_v29 = vld [vmem:[#allocation19 + $0x138] sm:$0xff]  ;;  %4085 = vmatpush.bf16.msra.mxu0 %v6172_v31 }
 0x3b9   :  { %v7049_v21 = vpop.eup %6236  ;;  %4052 = vmatpush.bf16.msrb.mxu1 %v6142_v52  ;;  %4072 = vmatpush.bf16.msrb.mxu3 %v6164_v29  ;;  %v6167_v52 = vld [vmem:[#allocation19 + $0x150] sm:$0xff]  ;;  %v6174_v29 = vld [vmem:[#allocation19 + $0x188] sm:$0xff] }
 0x3ba   :  { %v3128_v28 = vadd.f32 %v3127_v22, %v3115_v5  ;;  %v3359_v37 = vmul.f32 %v7049_v21, %v7042_v54  ;;  %4111 = vmatpush.bf16.msra.mxu2 %v6188_v63  ;;  %vm3365_vm9 = vweird.f32 %v7049_v21  ;;  %v3386_v54 = vperm.slane %v6962_v0, 7  ;;  %v6165_v63 = vld [vmem:[#allocation19 + $0x140] sm:$0xff] }
 0x3bb   :  { %v3116_v36 = vpop.f32.mrf.mxu0  ;;  %vm3366_vm11 = vmor %vm3364_vm10, %vm3365_vm9  ;;  %v6173_v0 = vld [vmem:[#allocation19 + $0x180] sm:$0xff] }
 0x3bc   :  { %v6180_v36 = vld [vmem:[#allocation19 + $0x1b8] sm:$0xff]  ;;  %4086 = vmatpush.bf16.msra.mxu0 %v6171_v24 }
 0x3bd   :  { %v3140_v35 = vpop.f32.mrf.mxu2  ;;  %v3129_v38 = vpop.f32.mrf.mxu1  ;;  %4053 = vmatpush.bf16.msrb.mxu1 %v6141_v26  ;;  %4073 = vmatpush.bf16.msrb.mxu3 %v6163_v39  ;;  %v6158_v26 = vld [vmem:[#allocation19 + $0x108] sm:$0xff]  ;;  %v3439_v39 = vperm.slane %v6972_v9, 0 }
 0x3be   :  { %v7040_v53 = vadd.f32 %v3140_v35, %v3128_v28  ;;  %v3360_v38 = vmul.f32 %v7049_v21, %v3359_v37  ;;  %v6166_v37 = vld [vmem:[#allocation19 + $0x148] sm:$0xff] }
 0x3bf   :  { %v3103_v1 = vpop.f32.mrf.mxu3 }
 0x3c0   :  { %v3188_v51 = vrot.slane %v7040_v53, 4  ;;  %v3201_v14 = vmul.f32 %v7040_v53, %v7040_v53  ;;  %v3361_v59 = vmul.f32 0.5, %v3360_v38  ;;  %v6178_v1 = vld [vmem:[#allocation19 + $0x1a8] sm:$0xff]  ;;  %4087 = vmatpush.bf16.msra.mxu0 %v6170_v60 }
 0x3c1   :  { %4098 = vmatpush.bf16.msra.mxu1 %v6180_v36  ;;  %4074 = vmatpush.bf16.msrb.mxu3 %v6162_v56  ;;  %v6157_v36 = vld [vmem:[#allocation19 + $0x100] sm:$0xff] }
 0x3c2   :  { %v3189_v47 = vadd.f32 %v3188_v51, %v7040_v53  ;;  %v3244_v48 = vrot.slane %v3201_v14, 4  ;;  %v6187_v51 = vld [vmem:[#allocation19 + $0x1f0] sm:$0xff] }
 0x3c3   :  { %4112 = vmatpush.bf16.msra.mxu2 %v6187_v51  ;;  %v3442_v51 = vperm.slane %v7001_v25, 0 }
 0x3c4   :  { %v3190_v27 = vrot.slane %v3189_v47, 2  ;;  %v3245_v2 = vadd.f32 %v3244_v48, %v3201_v14  ;;  %v6169_v48 = vld [vmem:[#allocation19 + $0x160] sm:$0xff] }
 0x3c5   :  { %v3142_v55 = vpop.f32.mrf.mxu2  ;;  %4099 = vmatpush.bf16.msra.mxu1 %v6179_v40  ;;  %4088 = vmatpush.bf16.msra.mxu0 %v6169_v48 }
 0x3c6   :  { %v3191_v13 = vadd.f32 %v3190_v27, %v3189_v47  ;;  %v3246_v15 = vrot.slane %v3245_v2, 2  ;;  %v6161_v47 = vld [vmem:[#allocation19 + $0x120] sm:$0xff]  ;;  %v3362_v55 = vsub.f32 1.5, %v3361_v59  ;;  %v3145_v59 = vld [vmem:[#allocation17] sm:$0xff] }
 0x3c7   :  { %4113 = vmatpush.bf16.msra.mxu2 %v6186_v61  ;;  %v6177_v27 = vld [vmem:[#allocation19 + $0x1a0] sm:$0xff]  ;;  %4075 = vmatpush.bf16.msrb.mxu3 %v6161_v47  ;;  %v3450_v47 = vmul.f32 %v3442_v51, %v6983_v4 }
 0x3c8   :  { %v3192_v18 = vrot.slane %v3191_v13, 1  ;;  %v3247_v16 = vadd.f32 %v3246_v15, %v3245_v2  ;;  %v6185_v2 = vld [vmem:[#allocation19 + $0x1e0] sm:$0xff]  ;;  %v3363_v8 = vmul.f32 %v7049_v21, %v3362_v55  ;;  %v6176_v15 = vld [vmem:[#allocation19 + $0x198] sm:$0xff] }
 0x3c9   :  { %4100 = vmatpush.bf16.msra.mxu1 %v6178_v1 }
 0x3ca   :  { %v3193_v22 = vadd.f32 %v3192_v18, %v3191_v13  ;;  %v3248_v42 = vrot.slane %v3247_v16, 1  ;;  %v6168_v13 = vld [vmem:[#allocation19 + $0x158] sm:$0xff]  ;;  %v3367_v41 = vsel %vm3366_vm11, %v7049_v21, %v3363_v8  ;;  %v6182_v21 = vld [vmem:[#allocation19 + $0x1c8] sm:$0xff] }
 0x3cb   :  { %4114 = vmatpush.bf16.msra.mxu2 %v6185_v2  ;;  %v6184_v18 = vld [vmem:[#allocation19 + $0x1d8] sm:$0xff]  ;;  %4076 = vmatpush.bf16.msrb.mxu3 %v6160_v50  ;;  %v3401_v12 = vmul.f32 %v3385_v17, %v3367_v41 }
 0x3cc   :  { %v3249_v23 = vadd.f32 %v3248_v42, %v3247_v16  ;;  %v7051_v34 = vmul.f32 0.125, %v3193_v22  ;;  %4089 = vmatpush.bf16.msra.mxu0 %v6168_v13  ;;  %v6175_v42 = vld [vmem:[#allocation19 + $0x190] sm:$0xff] }
 0x3cd   :  { %4101 = vmatpush.bf16.msra.mxu1 %v6177_v27 }
 0x3ce   :  { %v3265_v5 = vmul.f32 0.125, %v3249_v23  ;;  %v3273_v35 = vmul.f32 %v7051_v34, %v7051_v34  ;;  %v6183_v23 = vld [vmem:[#allocation19 + $0x1d0] sm:$0xff] }
 0x3cf   :  { %4115 = vmatpush.bf16.msra.mxu2 %v6184_v18  ;;  %4077 = vmatpush.bf16.msrb.mxu3 %v6159_v20 }
 0x3d0   :  { %v3281_v28 = vsub.f32 %v3265_v5, %v3273_v35  ;;  %4090 = vmatpush.bf16.msra.mxu0 %v6167_v52  ;;  %v3409_v5 = vmul.f32 %v3401_v12, %v7031_v11  ;;  %v3440_v11 = vperm.slane %v6974_v10, 0  ;;  %v3447_v10 = vmul.f32 %v3439_v39, %v6918_v46 }
 0x3d1   :  { %4102 = vmatpush.bf16.msra.mxu1 %v6176_v15 }
 0x3d2   :  { %v3289_v44 = vmax.f32 %v3281_v28, 0.0  ;;  %v6181_v28 = vld [vmem:[#allocation19 + $0x1c0] sm:$0xff]  ;;  %v3424_v24 = vrot.slane %v3409_v5, 2 }
 0x3d3   :  { %4116 = vmatpush.bf16.msra.mxu2 %v6183_v23  ;;  %4078 = vmatpush.bf16.msrb.mxu3 %v6158_v26 }
 0x3d4   :  { %v3297_v14 = vadd.f32 0.8, %v3289_v44  ;;  %4091 = vmatpush.bf16.msra.mxu0 %v6166_v37  ;;  %v3441_v44 = vperm.slane %v6996_v19, 0  ;;  %v3448_v19 = vmul.f32 %v3440_v11, %v6928_v33 }
 0x3d5   :  { %4103 = vmatpush.bf16.msra.mxu1 %v6175_v42 }
 0x3d6   :  { %6238 = vrsqrt.f32 %v3297_v14  ;;  %vm3374_vm12 = vweird.f32 %v3297_v14  ;;  %v3449_v25 = vmul.f32 %v3441_v44, %v6947_v43 }
 0x3d7   :  { %4117 = vmatpush.bf16.msra.mxu2 %v6182_v21  ;;  %4079 = vmatpush.bf16.msrb.mxu3 %v6157_v36 }
 0x3d8   :  { %4092 = vmatpush.bf16.msra.mxu0 %v6165_v63 }
 0x3d9   :  { %4104 = vmatpush.bf16.msra.mxu1 %v6174_v29 }
 0x3db   :  { %4118 = vmatpush.bf16.msra.mxu2 %v6181_v28 }
 0x3dc   :  { %v6239_v6 = vpop.eup %6238 }
 0x3dd   :  { %v3369_v45 = vmul.f32 %v6239_v6, %v3297_v14  ;;  %vm3375_vm6 = vweird.f32 %v6239_v6  ;;  %4105 = vmatpush.bf16.msra.mxu1 %v6173_v0  ;;  %v3443_v14 = vperm.slane %v7026_v58, 0 }
 0x3de   :  { %vm3376_vm13 = vmor %vm3374_vm12, %vm3375_vm6 }
 0x3df   :  { %v3370_v16 = vmul.f32 %v6239_v6, %v3369_v45  ;;  %v3451_v58 = vmul.f32 %v3443_v14, %v6989_v49 }
 0x3e1   :  { %v3371_v22 = vmul.f32 0.5, %v3370_v16 }
 0x3e3   :  { %v3372_v3 = vsub.f32 1.5, %v3371_v22 }
 0x3e5   :  { %v3373_v62 = vmul.f32 %v6239_v6, %v3372_v3 }
 0x3e7   :  { %v3377_v31 = vsel %vm3376_vm13, %v6239_v6, %v3373_v62 }
 0x3e8   :  { %v3402_v35 = vmul.f32 %v3386_v54, %v3377_v31 }
 0x3ea   :  { %v3410_v38 = vmul.f32 %v3402_v35, %v7051_v34  ;;  %v3445_v34 = vperm.slane %v3401_v12, 0  ;;  %v3446_v56 = vperm.slane %v3402_v35, 0 }
 0x3ec   :  { %v3425_v40 = vrot.slane %v3410_v38, 1  ;;  %v3453_v48 = vmul.f32 %v3445_v34, %v7019_v30  ;;  %v3454_v55 = vmul.f32 %v3446_v56, %v7040_v53  ;;  %v6211_v38 = vld [vmem:[#allocation20] ss:$0 sm:$0xff] }
 0x3ee   :  { %v3432_v9 = vsel %vm3431_vm14, %v3424_v24, %v3425_v40 }
 0x3ef   :  { %v3434_v60 = vsel %vm3433_vm15, %v7036_v32, %v3432_v9 }
 0x3f0   :  { %v3436_v1 = vsel %vm3435_vm0, %v7009_v7, %v3434_v60 }
 0x3f1   :  { %v3438_v61 = vsub.f32 %v3145_v59, %v3436_v1 }
 0x3f3   :  { %v3463_v27 = vperm.slane %v3438_v61, 7  ;;  %v3456_v2 = vperm.slane %v3438_v61, 0  ;;  %v3457_v32 = vperm.slane %v3438_v61, 1  ;;  %v3458_v6 = vperm.slane %v3438_v61, 2 }
 0x3f4   :  { %v3459_v7 = vperm.slane %v3438_v61, 3  ;;  %v3460_v8 = vperm.slane %v3438_v61, 4  ;;  %v3461_v46 = vperm.slane %v3438_v61, 5  ;;  %v3462_v45 = vperm.slane %v3438_v61, 6 }
 0x3f5   :  { %v3479_v33 = vadd.f32 %v3463_v27, %v3454_v55  ;;  %v3472_v50 = vadd.f32 %v3456_v2, %v3447_v10  ;;  %v3473_v43 = vadd.f32 %v3457_v32, %v3448_v19  ;;  %v3474_v13 = vadd.f32 %v3458_v6, %v3449_v25 }
 0x3f6   :  { %v3475_v15 = vadd.f32 %v3459_v7, %v3450_v47  ;;  %v3476_v4 = vadd.f32 %v3460_v8, %v3451_v58  ;;  %v3477_v49 = vadd.f32 %v3461_v46, %v7034_v57  ;;  %v3478_v18 = vadd.f32 %v3462_v45, %v3453_v48 }
 0x3f7   :  { %v3480_v30 = vmul.f32 0.2, %v3472_v50  ;;  %v3481_v16 = vmul.f32 0.2, %v3473_v43  ;;  %v3482_v53 = vmul.f32 0.2, %v3474_v13 }
 0x3f8   :  { %v3483_v17 = vmul.f32 0.2, %v3475_v15  ;;  %v3484_v54 = vmul.f32 0.2, %v3476_v4  ;;  %v3485_v26 = vmul.f32 0.2, %v3477_v49 }
 0x3f9   :  { %v3488_v20 = vmax.f32 %v3472_v50, %v3480_v30  ;;  %v3489_v52 = vmax.f32 %v3473_v43, %v3481_v16  ;;  %v3490_v41 = vmax.f32 %v3474_v13, %v3482_v53  ;;  %v3487_v57 = vmul.f32 0.2, %v3479_v33 }
 0x3fa   :  { %v3491_v22 = vmax.f32 %v3475_v15, %v3483_v17  ;;  %v3486_v37 = vmul.f32 0.2, %v3478_v18  ;;  %v3492_v62 = vmax.f32 %v3476_v4, %v3484_v54  ;;  %v3493_v29 = vmax.f32 %v3477_v49, %v3485_v26 }
 0x3fb   :  { %v3496_v42 = vpack.c.bf16 %v3488_v20, %v3488_v20  ;;  %v3497_v23 = vpack.c.bf16 %v3489_v52, %v3489_v52  ;;  %v3498_v3 = vpack.c.bf16 %v3490_v41, %v3490_v41  ;;  %v3495_v31 = vmax.f32 %v3479_v33, %v3487_v57 }
 0x3fc   :  { %v3499_v12 = vpack.c.bf16 %v3491_v22, %v3491_v22  ;;  %v3494_v21 = vmax.f32 %v3478_v18, %v3486_v37  ;;  %v3500_v5 = vpack.c.bf16 %v3492_v62, %v3492_v62  ;;  %v3501_v35 = vpack.c.bf16 %v3493_v29, %v3493_v29 }
 0x3fd   :  { %4028 = vmatmul.bf16.vlgmr.msra.gmra.mxu3 %v3496_v42  ;;  %4041 = vmatmul.bf16.vlgmr.msrb.gmra.mxu0 %v3497_v23  ;;  %v3503_v63 = vpack.c.bf16 %v3495_v31, %v3495_v31 }
 0x3fe   :  { %4054 = vmatmul.bf16.vlgmr.msrb.gmra.mxu1 %v3498_v3  ;;  %4067 = vmatmul.bf16.vlgmr.msrb.gmra.mxu2 %v3499_v12  ;;  %v3502_v36 = vpack.c.bf16 %v3494_v21, %v3494_v21 }
 0x40d   :  { %4080 = vmatmul.bf16.vlgmr.msrb.gmra.mxu3 %v3500_v5  ;;  %4093 = vmatmul.bf16.vlgmr.msra.gmra.mxu0 %v3501_v35 }
 0x40e   :  { %4106 = vmatmul.bf16.vlgmr.msra.gmra.mxu1 %v3502_v36  ;;  %4119 = vmatmul.bf16.vlgmr.msra.gmra.mxu2 %v3503_v63 }
 0x47a   :  { %v4042_v0 = vpop.f32.mrf.mxu0 }
 0x47b   :  { %v4055_v28 = vpop.f32.mrf.mxu1 }
 0x480   :  { %v4029_v39 = vpop.f32.mrf.mxu3 }
 0x481   :  { %v4068_v24 = vpop.f32.mrf.mxu2  ;;  %v4030_v11 = vadd.f32 %v6211_v38, %v4029_v39 }
 0x482   :  { %v4044_v40 = vpop.f32.mrf.mxu0 }
 0x483   :  { %v4057_v44 = vpop.f32.mrf.mxu1  ;;  %v4043_v51 = vadd.f32 %v4042_v0, %v4030_v11 }
 0x485   :  { %v4056_v9 = vadd.f32 %v4055_v28, %v4043_v51 }
 0x487   :  { %v4069_v60 = vadd.f32 %v4068_v24, %v4056_v9 }
 0x488   :  { %v4031_v14 = vpop.f32.mrf.mxu3 }
 0x489   :  { %v4070_v34 = vpop.f32.mrf.mxu2 }
 0x48a   :  { %v4094_v59 = vpop.f32.mrf.mxu0 }
 0x48b   :  { %v4107_v56 = vpop.f32.mrf.mxu1 }
 0x490   :  { %v4081_v1 = vpop.f32.mrf.mxu3 }
 0x491   :  { %v4082_v10 = vadd.f32 %v4081_v1, %v4069_v60  ;;  %v4120_v19 = vpop.f32.mrf.mxu2 }
 0x492   :  { %v4096_v25 = vpop.f32.mrf.mxu0 }
 0x493   :  { %v4095_v61 = vadd.f32 %v4094_v59, %v4082_v10  ;;  %v4109_v47 = vpop.f32.mrf.mxu1 }
 0x495   :  { %v4108_v58 = vadd.f32 %v4107_v56, %v4095_v61 }
 0x497   :  { %v4121_v48 = vadd.f32 %v4120_v19, %v4108_v58 }
 0x498   :  { %v4083_v55 = vpop.f32.mrf.mxu3 }
 0x499   :  { %6240 = vtanh.f32 %v4121_v48  ;;  %v4122_v27 = vpop.f32.mrf.mxu2 }
 0x49f   :  { %v6241_v2 = vpop.eup %6240 }
 0x4a0   :  { %4125 = vst [vmem:[#allocation22] sm:$0xff] %v6241_v2 }
 0x4a1   :  { %4136 = dma.vmem_to_hbm [thread:$0]  %s4132_s22, 128, %s4134_s0, [#allocation4]  }
 0x4a2   :  { %6568 = dma.done.wait [#allocation4], 128  }
 0x4a3   :  { %6569 = vsyncadd [#allocation4], 4294967168 }
 0x4a4   :  { %4141 = vsyncpa [#allocation3], 1 }
 0x4a5   :  { %4142 = vsyncpa [#allocation6], 1 }
 0x4a6   :  { %4143 = vsyncpa [#allocation9], 1 }
 0x4a7   :  { %4144 = vsyncpa [#allocation12], 1 }
 0x4a8   :  { %4145 = vsyncpa [#allocation15], 1 }
 0x4a9   :  { %4146 = vsyncpa [#allocation18], 1 }
 0x4aa   :  { %4147 = vsyncpa [#allocation21], 1 }
 0x4ab   :  { %4148 = vsyncpa [#allocation4], 1 }

</bundles_post_ra>
